<compile_context>
chip_gen: v7x
topology: tpu7x:2x2x1
jax: 0.10.0
libtpu: 0.0.40
codegen_flags: <defaults>
</compile_context>

<pallas_src>
import math

import jax
import jax.numpy as jnp
from jax.experimental import pallas as pl
from jax.experimental.pallas import tpu as pltpu

# ---------------- ModelConfig-equivalent constants ----------------
D_EMBED = 32
N_HEADS = 4
N_STREAMS = 8
SHORT_CTX_LEN = 8
OUT_CTX_LEN = 8
SEQ = SHORT_CTX_LEN + OUT_CTX_LEN          # 16
VOCAB_SIZE = 64
D_FF_INNER = 64
RESID_GATE_MULT = 2.0
LN_EPS = 1e-5                              # torch.nn.LayerNorm default
FF_IN_DIM = D_EMBED * (N_HEADS + 1)        # 160
HD = N_HEADS * D_EMBED                     # 128
BATCH = 2
# TODO(synk): config.get_activation() is unspecified; GELU (tanh approx) is assumed.


def _cross_attn_input_kernel(
    rec_ref,            # (S, B, D)        recurrent, stream-major
    emb_ref,            # (B*T, D)         input embeddings (+marker+pos), batch-major rows
    ln_ref,             # (2, D)           [gamma; beta]
    rec_wT_ref,         # (S, D, HD+2F)    [q_wT*scale | ffin_rec_wT*head_scale]
    rec_b_ref,          # (S, 1, HD+2F)    [q_b*scale  | ff_in_b]
    kv_wT_ref,          # (D, 2*HD)
    kv_b_ref,           # (1, 2*HD)
    ffin_head_wT_ref,   # (S, HD, 2F)      head_scales[:H] folded in
    ffout_wT_ref,       # (S, F, D+1)      value cols 0:D, inline-gate col D
    ffout_b_ref,        # (S, 1, D+1)
    out_ref,            # (S, B, D)
):
    B = rec_ref.shape[1]
    D = D_EMBED
    F = D_FF_INNER

    # ---- LayerNorm over d_embed, all (S, B) rows at once ----
    rec = rec_ref[...]
    mu = jnp.mean(rec, axis=-1, keepdims=True)
    var = jnp.mean((rec - mu) ** 2, axis=-1, keepdims=True)
    rec_norm = (rec - mu) * jax.lax.rsqrt(var + LN_EPS)
    rec_norm = rec_norm * ln_ref[0:1, :] + ln_ref[1:2, :]                # (S, B, D)

    # ---- shared kv projection: all B*T rows in one 2-D matmul ----
    kv = jnp.dot(emb_ref[...], kv_wT_ref[...],
                 preferred_element_type=jnp.float32) + kv_b_ref[...]     # (B*T, 2*HD)

    # ---- fused q / ff_in(recurrent-slice) projection: single S-batched dot.
    #      lanes [0:HD]  -> q (scale folded in)
    #      lanes [HD: ]  -> ff_in contribution of rec_norm (ff_in bias folded in)
    rec_proj = jnp.einsum("sbd,sdn->sbn", rec_norm, rec_wT_ref[...],
                          preferred_element_type=jnp.float32) + rec_b_ref[...]
    q_all = rec_proj[..., :HD]                                           # (S, B, HD)
    mid = rec_proj[..., HD:]                                             # (S, B, 2F)

    # ---- multi-head cross attention (head-batched logits / softmax) ----
    attn_cats = []
    for b in range(B):                      # static unroll; batch folded into ONE grid step
        q_b = q_all[:, b, :]                                             # (S, HD)
        kv_blk = kv[b * SEQ:(b + 1) * SEQ, :]                            # (T, 2*HD)

        qh = jnp.stack([q_b[:, h * D:(h + 1) * D] for h in range(N_HEADS)], axis=0)     # (H,S,D)
        kh = jnp.stack([kv_blk[:, h * D:(h + 1) * D] for h in range(N_HEADS)], axis=0)  # (H,T,D)

        logits = jnp.einsum("hsd,htd->hst", qh, kh,
                            preferred_element_type=jnp.float32)          # (H, S, T)
        m = jnp.max(logits, axis=-1, keepdims=True)
        p = jnp.exp(logits - m)
        p = p / jnp.sum(p, axis=-1, keepdims=True)   # exact divide: only B*H*S scalars

        # per-head PV product, lane-concatenated straight into the 128-lane head block
        o_heads = [
            jnp.dot(p[h], kv_blk[:, HD + h * D:HD + (h + 1) * D],
                    preferred_element_type=jnp.float32)                  # (S, D)
            for h in range(N_HEADS)
        ]
        attn_cats.append(jnp.concatenate(o_heads, axis=-1))              # (S, HD)

    attn_cat = jnp.stack(attn_cats, axis=1)                              # (S, B, HD)

    # ---- BatchGLU feedforward: head contribution accumulated onto the
    #      recurrent contribution; the 160-lane concat is never built. ----
    mid = mid + jnp.einsum("sbk,skn->sbn", attn_cat, ffin_head_wT_ref[...],
                           preferred_element_type=jnp.float32)           # (S, B, 2F)

    glu = jax.nn.gelu(mid[..., :F]) * mid[..., F:]                       # (S, B, F)

    ff = jnp.einsum("sbf,sfd->sbd", glu, ffout_wT_ref[...],
                    preferred_element_type=jnp.float32) + ffout_b_ref[...]   # (S, B, D+1)

    gate = jax.nn.sigmoid(ff[..., D:D + 1]) * RESID_GATE_MULT            # (S, B, 1)
    out_ref[...] = ff[..., :D] * gate


def cross_attention_input(recurrent, inputs, committed, params):
    """recurrent: (B, S, D) f32, inputs: (B, T) int32, committed: (B, T) bool."""
    B = recurrent.shape[0]
    scale = 1.0 / math.sqrt(D_EMBED)

    # --- XLA glue: embedding gather with marker/positional adds fused in ---
    emb = jnp.take(params["embedding"], inputs, axis=0)                  # (B, T, D)
    emb = emb + jnp.where(committed[..., None], 0.0, params["marker"])
    emb = emb + params["pos"]
    emb = emb.reshape(B * SEQ, D_EMBED)                                  # batch-major rows

    # --- one-time weight layout prep (plain JAX) ---
    ln = jnp.stack([params["ln_gamma"], params["ln_beta"]], axis=0)      # (2, D)

    hs = params["head_scales"]
    q_wT = jnp.swapaxes(params["q_w"], -1, -2) * scale                   # (S, D, HD)
    ff_in_wT = jnp.swapaxes(params["ff_in_w"], -1, -2)                   # (S, FF_IN, 2F)
    ffin_rec_wT = ff_in_wT[:, HD:, :] * hs[N_HEADS]                      # (S, D, 2F)
    rec_wT = jnp.concatenate([q_wT, ffin_rec_wT], axis=-1)               # (S, D, HD+2F)
    rec_b = jnp.concatenate([params["q_b"] * scale, params["ff_in_b"]],
                            axis=-1)[:, None, :]                         # (S, 1, HD+2F)

    kv_wT = params["kv_w"].T                                             # (D, 2*HD)
    kv_b = params["kv_b"][None, :]                                       # (1, 2*HD)

    head_scale_vec = jnp.repeat(hs[:N_HEADS], D_EMBED)                   # (HD,)
    ffin_head_wT = ff_in_wT[:, :HD, :] * head_scale_vec[None, :, None]   # (S, HD, 2F)

    ffout_wT = jnp.swapaxes(params["ff_out_w"], -1, -2)                  # (S, F, D+1)
    ffout_b = params["ff_out_b"][:, None, :]                             # (S, 1, D+1)

    # stream-major activations inside the kernel: every BatchLinear becomes a single
    # S-batched dot with M = B.
    rec_sbd = jnp.transpose(recurrent, (1, 0, 2))                        # (S, B, D)

    vmem = pltpu.MemorySpace.VMEM
    operands = (rec_sbd, emb, ln, rec_wT, rec_b, kv_wT, kv_b,
                ffin_head_wT, ffout_wT, ffout_b)

    out_sbd = pl.pallas_call(
        _cross_attn_input_kernel,
        out_shape=jax.ShapeDtypeStruct((N_STREAMS, B, D_EMBED), jnp.float32),
        in_specs=[pl.BlockSpec(memory_space=vmem) for _ in operands],
        out_specs=pl.BlockSpec(memory_space=vmem),
    )(*operands)

    # transpose back to (B, S, D) in the XLA glue.
    return jnp.transpose(out_sbd, (1, 0, 2))


def reference(recurrent, inputs, committed, params):
    """Pure-JAX mirror of the PyTorch forward pass (for verification)."""
    B = recurrent.shape[0]
    mu = jnp.mean(recurrent, axis=-1, keepdims=True)
    var = jnp.mean((recurrent - mu) ** 2, axis=-1, keepdims=True)
    rec_norm = (recurrent - mu) * jax.lax.rsqrt(var + LN_EPS)
    rec_norm = rec_norm * params["ln_gamma"] + params["ln_beta"]

    emb = params["embedding"][inputs]
    emb = emb + jnp.where(committed[..., None], 0.0, params["marker"])
    emb = emb + params["pos"]

    q = jnp.einsum("bsi,soi->bso", rec_norm, params["q_w"]) + params["q_b"]
    q = q.reshape(B, N_STREAMS, N_HEADS, D_EMBED).transpose(0, 2, 1, 3)
    kv = emb @ params["kv_w"].T + params["kv_b"]
    kv = kv.reshape(B, SEQ, 2, N_HEADS, D_EMBED)
    k = kv[:, :, 0].transpose(0, 2, 1, 3)
    v = kv[:, :, 1].transpose(0, 2, 1, 3)

    logits = jnp.einsum("bhsd,bhtd->bhst", q, k) / math.sqrt(D_EMBED)
    p = jax.nn.softmax(logits, axis=-1)
    attn = jnp.einsum("bhst,bhtd->bhsd", p, v).transpose(0, 2, 1, 3)   # (B,S,H,D)
    attn = jnp.concatenate([attn, rec_norm[:, :, None, :]], axis=2)    # (B,S,H+1,D)
    attn = params["head_scales"][:, None] * attn
    x = attn.reshape(B, N_STREAMS, FF_IN_DIM)

    mid = jnp.einsum("bsi,smi->bsm", x, params["ff_in_w"]) + params["ff_in_b"]
    mid = jax.nn.gelu(mid[..., :D_FF_INNER]) * mid[..., D_FF_INNER:]
    ff = jnp.einsum("bsi,soi->bso", mid, params["ff_out_w"]) + params["ff_out_b"]

    gate = jax.nn.sigmoid(ff[..., -1]) * RESID_GATE_MULT
    return ff[..., :D_EMBED] * gate[..., None]


def init_params(key):
    ks = jax.random.split(key, 11)
    bq = 1.0 / math.sqrt(D_EMBED)
    bkv = 1.0 / math.sqrt(D_EMBED)
    bfi = 1.0 / math.sqrt(FF_IN_DIM)
    bfo = 1.0 / math.sqrt(D_FF_INNER)
    u = lambda k, shape, b: jax.random.uniform(k, shape, jnp.float32, -b, b)
    return dict(
        embedding=jax.random.normal(ks[0], (VOCAB_SIZE, D_EMBED), jnp.float32),
        marker=jax.random.normal(ks[1], (D_EMBED,), jnp.float32),
        pos=jax.random.normal(ks[2], (SEQ, D_EMBED), jnp.float32),
        ln_gamma=jnp.ones((D_EMBED,), jnp.float32),
        ln_beta=jnp.zeros((D_EMBED,), jnp.float32),
        q_w=u(ks[3], (N_STREAMS, N_HEADS * D_EMBED, D_EMBED), bq),
        q_b=u(ks[4], (N_STREAMS, N_HEADS * D_EMBED), bq),
        kv_w=u(ks[5], (2 * N_HEADS * D_EMBED, D_EMBED), bkv),
        kv_b=u(ks[6], (2 * N_HEADS * D_EMBED,), bkv),
        head_scales=jnp.ones((N_HEADS + 1,), jnp.float32),
        ff_in_w=u(ks[7], (N_STREAMS, 2 * D_FF_INNER, FF_IN_DIM), bfi),
        ff_in_b=u(ks[8], (N_STREAMS, 2 * D_FF_INNER), bfi),
        ff_out_w=u(ks[9], (N_STREAMS, D_EMBED + 1, D_FF_INNER), bfo),
        ff_out_b=u(ks[10], (N_STREAMS, D_EMBED + 1), bfo),
    )


if __name__ == "__main__":
    root = jax.random.PRNGKey(0)
    kp, kr, ki, kc = jax.random.split(root, 4)
    params = init_params(kp)

    recurrent = jax.random.normal(kr, (BATCH, N_STREAMS, D_EMBED), jnp.float32)
    inputs = jax.random.randint(ki, (BATCH, SEQ), 0, VOCAB_SIZE, jnp.int32)
    committed = jax.random.bernoulli(kc, 0.5, (BATCH, SEQ))

    out = jax.block_until_ready(cross_attention_input(recurrent, inputs, committed, params))
    ref = jax.block_until_ready(reference(recurrent, inputs, committed, params))

    assert out.shape == (BATCH, N_STREAMS, D_EMBED)
    max_err = float(jnp.max(jnp.abs(out - ref)))
    assert max_err < 1e-3, f"mismatch vs reference, max abs err={max_err}"

    print("KERNEL_OK")
</pallas_src>

<mosaic_0001>
module attributes {stable_mosaic.version = 11 : i64} {
  func.func @_cross_attn_input_kernel(%arg0: memref<8x2x32xf32, #tpu.memory_space<vmem>>, %arg1: memref<32x32xf32, #tpu.memory_space<vmem>>, %arg2: memref<2x32xf32, #tpu.memory_space<vmem>>, %arg3: memref<8x32x256xf32, #tpu.memory_space<vmem>>, %arg4: memref<8x1x256xf32, #tpu.memory_space<vmem>>, %arg5: memref<32x256xf32, #tpu.memory_space<vmem>>, %arg6: memref<1x256xf32, #tpu.memory_space<vmem>>, %arg7: memref<8x128x128xf32, #tpu.memory_space<vmem>>, %arg8: memref<8x64x33xf32, #tpu.memory_space<vmem>>, %arg9: memref<8x1x33xf32, #tpu.memory_space<vmem>>, %arg10: memref<8x2x32xf32, #tpu.memory_space<vmem>>) attributes {dimension_semantics = [], scalar_prefetch = 0 : i64, scratch_operands = 0 : i64, tpu.core_type = #tpu.core_type<tc>} {
    %c0 = arith.constant 0 : index
    %c0_0 = arith.constant 0 : index
    %c0_1 = arith.constant 0 : index
    %0 = vector.load %arg0[%c0, %c0_0, %c0_1] : memref<8x2x32xf32, #tpu.memory_space<vmem>>, vector<8x2x32xf32>
    %cst = arith.constant dense<0.000000e+00> : vector<8x2xf32>
    %1 = vector.multi_reduction <add>, %0, %cst [2] : vector<8x2x32xf32> to vector<8x2xf32>
    %2 = vector.shape_cast %1 : vector<8x2xf32> to vector<8x2x1xf32>
    %cst_2 = arith.constant 3.200000e+01 : f32
    %3 = vector.broadcast %cst_2 : f32 to vector<8x2x1xf32>
    %4 = arith.divf %2, %3 : vector<8x2x1xf32>
    %5 = vector.broadcast %4 : vector<8x2x1xf32> to vector<8x2x32xf32>
    %6 = arith.subf %0, %5 : vector<8x2x32xf32>
    %7 = arith.mulf %6, %6 : vector<8x2x32xf32>
    %cst_3 = arith.constant dense<0.000000e+00> : vector<8x2xf32>
    %8 = vector.multi_reduction <add>, %7, %cst_3 [2] : vector<8x2x32xf32> to vector<8x2xf32>
    %9 = vector.shape_cast %8 : vector<8x2xf32> to vector<8x2x1xf32>
    %cst_4 = arith.constant 3.200000e+01 : f32
    %10 = vector.broadcast %cst_4 : f32 to vector<8x2x1xf32>
    %11 = arith.divf %9, %10 : vector<8x2x1xf32>
    %12 = vector.broadcast %4 : vector<8x2x1xf32> to vector<8x2x32xf32>
    %13 = arith.subf %0, %12 : vector<8x2x32xf32>
    %cst_5 = arith.constant 9.99999974E-6 : f32
    %14 = vector.broadcast %cst_5 : f32 to vector<8x2x1xf32>
    %15 = arith.addf %11, %14 : vector<8x2x1xf32>
    %16 = math.rsqrt %15 : vector<8x2x1xf32>
    %17 = vector.broadcast %16 : vector<8x2x1xf32> to vector<8x2x32xf32>
    %18 = arith.mulf %13, %17 : vector<8x2x32xf32>
    %c0_6 = arith.constant 0 : index
    %c0_7 = arith.constant 0 : index
    %19 = vector.load %arg2[%c0_6, %c0_7] : memref<2x32xf32, #tpu.memory_space<vmem>>, vector<1x32xf32>
    %20 = vector.shape_cast %19 : vector<1x32xf32> to vector<1x1x32xf32>
    %21 = vector.broadcast %20 : vector<1x1x32xf32> to vector<8x2x32xf32>
    %22 = arith.mulf %18, %21 : vector<8x2x32xf32>
    %c1 = arith.constant 1 : index
    %c0_8 = arith.constant 0 : index
    %23 = vector.load %arg2[%c1, %c0_8] : memref<2x32xf32, #tpu.memory_space<vmem>>, vector<1x32xf32>
    %24 = vector.shape_cast %23 : vector<1x32xf32> to vector<1x1x32xf32>
    %25 = vector.broadcast %24 : vector<1x1x32xf32> to vector<8x2x32xf32>
    %26 = arith.addf %22, %25 : vector<8x2x32xf32>
    %c0_9 = arith.constant 0 : index
    %c0_10 = arith.constant 0 : index
    %27 = vector.load %arg1[%c0_9, %c0_10] : memref<32x32xf32, #tpu.memory_space<vmem>>, vector<32x32xf32>
    %c0_11 = arith.constant 0 : index
    %c0_12 = arith.constant 0 : index
    %28 = vector.load %arg5[%c0_11, %c0_12] : memref<32x256xf32, #tpu.memory_space<vmem>>, vector<32x256xf32>
    %cst_13 = arith.constant dense<0.000000e+00> : vector<32x256xf32>
    %29 = tpu.matmul %27, %28, %cst_13 {dimension_numbers = #tpu.dot_dimension_numbers<[1], [0], [0], [1], [0, 0, 1, 1], [], []>} : vector<32x32xf32>, vector<32x256xf32>, vector<32x256xf32> -> vector<32x256xf32>
    %c0_14 = arith.constant 0 : index
    %c0_15 = arith.constant 0 : index
    %30 = vector.load %arg6[%c0_14, %c0_15] : memref<1x256xf32, #tpu.memory_space<vmem>>, vector<1x256xf32>
    %31 = vector.broadcast %30 : vector<1x256xf32> to vector<32x256xf32>
    %32 = arith.addf %29, %31 : vector<32x256xf32>
    %c0_16 = arith.constant 0 : index
    %c0_17 = arith.constant 0 : index
    %c0_18 = arith.constant 0 : index
    %33 = vector.load %arg3[%c0_16, %c0_17, %c0_18] : memref<8x32x256xf32, #tpu.memory_space<vmem>>, vector<8x32x256xf32>
    "tpu.trace_start"() <{level = 10 : i32, message = "sbd,sdn->sbn"}> : () -> ()
    %cst_19 = arith.constant dense<0.000000e+00> : vector<8x2x256xf32>
    %34 = tpu.matmul %26, %33, %cst_19 {dimension_numbers = #tpu.dot_dimension_numbers<[2], [1], [1], [2], [0, 0, 0, 1, 1, 2], [0], [0]>} : vector<8x2x32xf32>, vector<8x32x256xf32>, vector<8x2x256xf32> -> vector<8x2x256xf32>
    "tpu.trace_stop"() : () -> ()
    %c0_20 = arith.constant 0 : index
    %c0_21 = arith.constant 0 : index
    %c0_22 = arith.constant 0 : index
    %35 = vector.load %arg4[%c0_20, %c0_21, %c0_22] : memref<8x1x256xf32, #tpu.memory_space<vmem>>, vector<8x1x256xf32>
    %36 = vector.broadcast %35 : vector<8x1x256xf32> to vector<8x2x256xf32>
    %37 = arith.addf %34, %36 : vector<8x2x256xf32>
    %38 = vector.extract_strided_slice %37 {offsets = [0, 0, 0], sizes = [8, 2, 128], strides = [1, 1, 1]} : vector<8x2x256xf32> to vector<8x2x128xf32>
    %39 = vector.extract_strided_slice %37 {offsets = [0, 0, 128], sizes = [8, 2, 128], strides = [1, 1, 1]} : vector<8x2x256xf32> to vector<8x2x128xf32>
    %40 = vector.extract_strided_slice %38 {offsets = [0, 0, 0], sizes = [8, 1, 128], strides = [1, 1, 1]} : vector<8x2x128xf32> to vector<8x1x128xf32>
    %41 = vector.shape_cast %40 : vector<8x1x128xf32> to vector<8x128xf32>
    %42 = vector.extract_strided_slice %32 {offsets = [0, 0], sizes = [16, 256], strides = [1, 1]} : vector<32x256xf32> to vector<16x256xf32>
    %43 = vector.extract_strided_slice %41 {offsets = [0, 0], sizes = [8, 32], strides = [1, 1]} : vector<8x128xf32> to vector<8x32xf32>
    %44 = vector.extract_strided_slice %41 {offsets = [0, 32], sizes = [8, 32], strides = [1, 1]} : vector<8x128xf32> to vector<8x32xf32>
    %45 = vector.extract_strided_slice %41 {offsets = [0, 64], sizes = [8, 32], strides = [1, 1]} : vector<8x128xf32> to vector<8x32xf32>
    %46 = vector.extract_strided_slice %41 {offsets = [0, 96], sizes = [8, 32], strides = [1, 1]} : vector<8x128xf32> to vector<8x32xf32>
    %47 = vector.shape_cast %43 : vector<8x32xf32> to vector<1x8x32xf32>
    %48 = vector.shape_cast %44 : vector<8x32xf32> to vector<1x8x32xf32>
    %49 = vector.shape_cast %45 : vector<8x32xf32> to vector<1x8x32xf32>
    %50 = vector.shape_cast %46 : vector<8x32xf32> to vector<1x8x32xf32>
    %51 = tpu.concatenate %47, %48, %49, %50 in 0 : vector<1x8x32xf32>, vector<1x8x32xf32>, vector<1x8x32xf32>, vector<1x8x32xf32> -> vector<4x8x32xf32>
    %52 = vector.extract_strided_slice %42 {offsets = [0, 0], sizes = [16, 32], strides = [1, 1]} : vector<16x256xf32> to vector<16x32xf32>
    %53 = vector.extract_strided_slice %42 {offsets = [0, 32], sizes = [16, 32], strides = [1, 1]} : vector<16x256xf32> to vector<16x32xf32>
    %54 = vector.extract_strided_slice %42 {offsets = [0, 64], sizes = [16, 32], strides = [1, 1]} : vector<16x256xf32> to vector<16x32xf32>
    %55 = vector.extract_strided_slice %42 {offsets = [0, 96], sizes = [16, 32], strides = [1, 1]} : vector<16x256xf32> to vector<16x32xf32>
    %56 = vector.shape_cast %52 : vector<16x32xf32> to vector<1x16x32xf32>
    %57 = vector.shape_cast %53 : vector<16x32xf32> to vector<1x16x32xf32>
    %58 = vector.shape_cast %54 : vector<16x32xf32> to vector<1x16x32xf32>
    %59 = vector.shape_cast %55 : vector<16x32xf32> to vector<1x16x32xf32>
    %60 = tpu.concatenate %56, %57, %58, %59 in 0 : vector<1x16x32xf32>, vector<1x16x32xf32>, vector<1x16x32xf32>, vector<1x16x32xf32> -> vector<4x16x32xf32>
    "tpu.trace_start"() <{level = 10 : i32, message = "hsd,htd->hst"}> : () -> ()
    %cst_23 = arith.constant dense<0.000000e+00> : vector<4x8x16xf32>
    %61 = tpu.matmul %51, %60, %cst_23 {dimension_numbers = #tpu.dot_dimension_numbers<[2], [2], [1], [1], [0, 0, 0, 1, 1, 1], [0], [0]>} : vector<4x8x32xf32>, vector<4x16x32xf32>, vector<4x8x16xf32> -> vector<4x8x16xf32>
    "tpu.trace_stop"() : () -> ()
    %cst_24 = arith.constant dense<0xFF800000> : vector<4x8xf32>
    %62 = vector.multi_reduction <maximumf>, %61, %cst_24 [2] : vector<4x8x16xf32> to vector<4x8xf32>
    %63 = vector.shape_cast %62 : vector<4x8xf32> to vector<4x8x1xf32>
    %64 = vector.broadcast %63 : vector<4x8x1xf32> to vector<4x8x16xf32>
    %65 = arith.subf %61, %64 : vector<4x8x16xf32>
    %66 = math.exp %65 : vector<4x8x16xf32>
    %cst_25 = arith.constant dense<0.000000e+00> : vector<4x8xf32>
    %67 = vector.multi_reduction <add>, %66, %cst_25 [2] : vector<4x8x16xf32> to vector<4x8xf32>
    %68 = vector.shape_cast %67 : vector<4x8xf32> to vector<4x8x1xf32>
    %69 = vector.broadcast %68 : vector<4x8x1xf32> to vector<4x8x16xf32>
    %70 = arith.divf %66, %69 : vector<4x8x16xf32>
    %71 = vector.extract_strided_slice %70 {offsets = [0, 0, 0], sizes = [1, 8, 16], strides = [1, 1, 1]} : vector<4x8x16xf32> to vector<1x8x16xf32>
    %72 = vector.shape_cast %71 : vector<1x8x16xf32> to vector<8x16xf32>
    %73 = vector.extract_strided_slice %42 {offsets = [0, 128], sizes = [16, 32], strides = [1, 1]} : vector<16x256xf32> to vector<16x32xf32>
    %cst_26 = arith.constant dense<0.000000e+00> : vector<8x32xf32>
    %74 = tpu.matmul %72, %73, %cst_26 {dimension_numbers = #tpu.dot_dimension_numbers<[1], [0], [0], [1], [0, 0, 1, 1], [], []>} : vector<8x16xf32>, vector<16x32xf32>, vector<8x32xf32> -> vector<8x32xf32>
    %75 = vector.extract_strided_slice %70 {offsets = [1, 0, 0], sizes = [1, 8, 16], strides = [1, 1, 1]} : vector<4x8x16xf32> to vector<1x8x16xf32>
    %76 = vector.shape_cast %75 : vector<1x8x16xf32> to vector<8x16xf32>
    %77 = vector.extract_strided_slice %42 {offsets = [0, 160], sizes = [16, 32], strides = [1, 1]} : vector<16x256xf32> to vector<16x32xf32>
    %cst_27 = arith.constant dense<0.000000e+00> : vector<8x32xf32>
    %78 = tpu.matmul %76, %77, %cst_27 {dimension_numbers = #tpu.dot_dimension_numbers<[1], [0], [0], [1], [0, 0, 1, 1], [], []>} : vector<8x16xf32>, vector<16x32xf32>, vector<8x32xf32> -> vector<8x32xf32>
    %79 = vector.extract_strided_slice %70 {offsets = [2, 0, 0], sizes = [1, 8, 16], strides = [1, 1, 1]} : vector<4x8x16xf32> to vector<1x8x16xf32>
    %80 = vector.shape_cast %79 : vector<1x8x16xf32> to vector<8x16xf32>
    %81 = vector.extract_strided_slice %42 {offsets = [0, 192], sizes = [16, 32], strides = [1, 1]} : vector<16x256xf32> to vector<16x32xf32>
    %cst_28 = arith.constant dense<0.000000e+00> : vector<8x32xf32>
    %82 = tpu.matmul %80, %81, %cst_28 {dimension_numbers = #tpu.dot_dimension_numbers<[1], [0], [0], [1], [0, 0, 1, 1], [], []>} : vector<8x16xf32>, vector<16x32xf32>, vector<8x32xf32> -> vector<8x32xf32>
    %83 = vector.extract_strided_slice %70 {offsets = [3, 0, 0], sizes = [1, 8, 16], strides = [1, 1, 1]} : vector<4x8x16xf32> to vector<1x8x16xf32>
    %84 = vector.shape_cast %83 : vector<1x8x16xf32> to vector<8x16xf32>
    %85 = vector.extract_strided_slice %42 {offsets = [0, 224], sizes = [16, 32], strides = [1, 1]} : vector<16x256xf32> to vector<16x32xf32>
    %cst_29 = arith.constant dense<0.000000e+00> : vector<8x32xf32>
    %86 = tpu.matmul %84, %85, %cst_29 {dimension_numbers = #tpu.dot_dimension_numbers<[1], [0], [0], [1], [0, 0, 1, 1], [], []>} : vector<8x16xf32>, vector<16x32xf32>, vector<8x32xf32> -> vector<8x32xf32>
    %87 = tpu.concatenate %74, %78, %82, %86 in 1 : vector<8x32xf32>, vector<8x32xf32>, vector<8x32xf32>, vector<8x32xf32> -> vector<8x128xf32>
    %88 = vector.extract_strided_slice %38 {offsets = [0, 1, 0], sizes = [8, 1, 128], strides = [1, 1, 1]} : vector<8x2x128xf32> to vector<8x1x128xf32>
    %89 = vector.shape_cast %88 : vector<8x1x128xf32> to vector<8x128xf32>
    %90 = vector.extract_strided_slice %32 {offsets = [16, 0], sizes = [16, 256], strides = [1, 1]} : vector<32x256xf32> to vector<16x256xf32>
    %91 = vector.extract_strided_slice %89 {offsets = [0, 0], sizes = [8, 32], strides = [1, 1]} : vector<8x128xf32> to vector<8x32xf32>
    %92 = vector.extract_strided_slice %89 {offsets = [0, 32], sizes = [8, 32], strides = [1, 1]} : vector<8x128xf32> to vector<8x32xf32>
    %93 = vector.extract_strided_slice %89 {offsets = [0, 64], sizes = [8, 32], strides = [1, 1]} : vector<8x128xf32> to vector<8x32xf32>
    %94 = vector.extract_strided_slice %89 {offsets = [0, 96], sizes = [8, 32], strides = [1, 1]} : vector<8x128xf32> to vector<8x32xf32>
    %95 = vector.shape_cast %91 : vector<8x32xf32> to vector<1x8x32xf32>
    %96 = vector.shape_cast %92 : vector<8x32xf32> to vector<1x8x32xf32>
    %97 = vector.shape_cast %93 : vector<8x32xf32> to vector<1x8x32xf32>
    %98 = vector.shape_cast %94 : vector<8x32xf32> to vector<1x8x32xf32>
    %99 = tpu.concatenate %95, %96, %97, %98 in 0 : vector<1x8x32xf32>, vector<1x8x32xf32>, vector<1x8x32xf32>, vector<1x8x32xf32> -> vector<4x8x32xf32>
    %100 = vector.extract_strided_slice %90 {offsets = [0, 0], sizes = [16, 32], strides = [1, 1]} : vector<16x256xf32> to vector<16x32xf32>
    %101 = vector.extract_strided_slice %90 {offsets = [0, 32], sizes = [16, 32], strides = [1, 1]} : vector<16x256xf32> to vector<16x32xf32>
    %102 = vector.extract_strided_slice %90 {offsets = [0, 64], sizes = [16, 32], strides = [1, 1]} : vector<16x256xf32> to vector<16x32xf32>
    %103 = vector.extract_strided_slice %90 {offsets = [0, 96], sizes = [16, 32], strides = [1, 1]} : vector<16x256xf32> to vector<16x32xf32>
    %104 = vector.shape_cast %100 : vector<16x32xf32> to vector<1x16x32xf32>
    %105 = vector.shape_cast %101 : vector<16x32xf32> to vector<1x16x32xf32>
    %106 = vector.shape_cast %102 : vector<16x32xf32> to vector<1x16x32xf32>
    %107 = vector.shape_cast %103 : vector<16x32xf32> to vector<1x16x32xf32>
    %108 = tpu.concatenate %104, %105, %106, %107 in 0 : vector<1x16x32xf32>, vector<1x16x32xf32>, vector<1x16x32xf32>, vector<1x16x32xf32> -> vector<4x16x32xf32>
    "tpu.trace_start"() <{level = 10 : i32, message = "hsd,htd->hst"}> : () -> ()
    %cst_30 = arith.constant dense<0.000000e+00> : vector<4x8x16xf32>
    %109 = tpu.matmul %99, %108, %cst_30 {dimension_numbers = #tpu.dot_dimension_numbers<[2], [2], [1], [1], [0, 0, 0, 1, 1, 1], [0], [0]>} : vector<4x8x32xf32>, vector<4x16x32xf32>, vector<4x8x16xf32> -> vector<4x8x16xf32>
    "tpu.trace_stop"() : () -> ()
    %cst_31 = arith.constant dense<0xFF800000> : vector<4x8xf32>
    %110 = vector.multi_reduction <maximumf>, %109, %cst_31 [2] : vector<4x8x16xf32> to vector<4x8xf32>
    %111 = vector.shape_cast %110 : vector<4x8xf32> to vector<4x8x1xf32>
    %112 = vector.broadcast %111 : vector<4x8x1xf32> to vector<4x8x16xf32>
    %113 = arith.subf %109, %112 : vector<4x8x16xf32>
    %114 = math.exp %113 : vector<4x8x16xf32>
    %cst_32 = arith.constant dense<0.000000e+00> : vector<4x8xf32>
    %115 = vector.multi_reduction <add>, %114, %cst_32 [2] : vector<4x8x16xf32> to vector<4x8xf32>
    %116 = vector.shape_cast %115 : vector<4x8xf32> to vector<4x8x1xf32>
    %117 = vector.broadcast %116 : vector<4x8x1xf32> to vector<4x8x16xf32>
    %118 = arith.divf %114, %117 : vector<4x8x16xf32>
    %119 = vector.extract_strided_slice %118 {offsets = [0, 0, 0], sizes = [1, 8, 16], strides = [1, 1, 1]} : vector<4x8x16xf32> to vector<1x8x16xf32>
    %120 = vector.shape_cast %119 : vector<1x8x16xf32> to vector<8x16xf32>
    %121 = vector.extract_strided_slice %90 {offsets = [0, 128], sizes = [16, 32], strides = [1, 1]} : vector<16x256xf32> to vector<16x32xf32>
    %cst_33 = arith.constant dense<0.000000e+00> : vector<8x32xf32>
    %122 = tpu.matmul %120, %121, %cst_33 {dimension_numbers = #tpu.dot_dimension_numbers<[1], [0], [0], [1], [0, 0, 1, 1], [], []>} : vector<8x16xf32>, vector<16x32xf32>, vector<8x32xf32> -> vector<8x32xf32>
    %123 = vector.extract_strided_slice %118 {offsets = [1, 0, 0], sizes = [1, 8, 16], strides = [1, 1, 1]} : vector<4x8x16xf32> to vector<1x8x16xf32>
    %124 = vector.shape_cast %123 : vector<1x8x16xf32> to vector<8x16xf32>
    %125 = vector.extract_strided_slice %90 {offsets = [0, 160], sizes = [16, 32], strides = [1, 1]} : vector<16x256xf32> to vector<16x32xf32>
    %cst_34 = arith.constant dense<0.000000e+00> : vector<8x32xf32>
    %126 = tpu.matmul %124, %125, %cst_34 {dimension_numbers = #tpu.dot_dimension_numbers<[1], [0], [0], [1], [0, 0, 1, 1], [], []>} : vector<8x16xf32>, vector<16x32xf32>, vector<8x32xf32> -> vector<8x32xf32>
    %127 = vector.extract_strided_slice %118 {offsets = [2, 0, 0], sizes = [1, 8, 16], strides = [1, 1, 1]} : vector<4x8x16xf32> to vector<1x8x16xf32>
    %128 = vector.shape_cast %127 : vector<1x8x16xf32> to vector<8x16xf32>
    %129 = vector.extract_strided_slice %90 {offsets = [0, 192], sizes = [16, 32], strides = [1, 1]} : vector<16x256xf32> to vector<16x32xf32>
    %cst_35 = arith.constant dense<0.000000e+00> : vector<8x32xf32>
    %130 = tpu.matmul %128, %129, %cst_35 {dimension_numbers = #tpu.dot_dimension_numbers<[1], [0], [0], [1], [0, 0, 1, 1], [], []>} : vector<8x16xf32>, vector<16x32xf32>, vector<8x32xf32> -> vector<8x32xf32>
    %131 = vector.extract_strided_slice %118 {offsets = [3, 0, 0], sizes = [1, 8, 16], strides = [1, 1, 1]} : vector<4x8x16xf32> to vector<1x8x16xf32>
    %132 = vector.shape_cast %131 : vector<1x8x16xf32> to vector<8x16xf32>
    %133 = vector.extract_strided_slice %90 {offsets = [0, 224], sizes = [16, 32], strides = [1, 1]} : vector<16x256xf32> to vector<16x32xf32>
    %cst_36 = arith.constant dense<0.000000e+00> : vector<8x32xf32>
    %134 = tpu.matmul %132, %133, %cst_36 {dimension_numbers = #tpu.dot_dimension_numbers<[1], [0], [0], [1], [0, 0, 1, 1], [], []>} : vector<8x16xf32>, vector<16x32xf32>, vector<8x32xf32> -> vector<8x32xf32>
    %135 = tpu.concatenate %122, %126, %130, %134 in 1 : vector<8x32xf32>, vector<8x32xf32>, vector<8x32xf32>, vector<8x32xf32> -> vector<8x128xf32>
    %136 = vector.shape_cast %87 : vector<8x128xf32> to vector<8x1x128xf32>
    %137 = vector.shape_cast %135 : vector<8x128xf32> to vector<8x1x128xf32>
    %138 = tpu.concatenate %136, %137 in 1 : vector<8x1x128xf32>, vector<8x1x128xf32> -> vector<8x2x128xf32>
    %c0_37 = arith.constant 0 : index
    %c0_38 = arith.constant 0 : index
    %c0_39 = arith.constant 0 : index
    %139 = vector.load %arg7[%c0_37, %c0_38, %c0_39] : memref<8x128x128xf32, #tpu.memory_space<vmem>>, vector<8x128x128xf32>
    "tpu.trace_start"() <{level = 10 : i32, message = "sbk,skn->sbn"}> : () -> ()
    %cst_40 = arith.constant dense<0.000000e+00> : vector<8x2x128xf32>
    %140 = tpu.matmul %138, %139, %cst_40 {dimension_numbers = #tpu.dot_dimension_numbers<[2], [1], [1], [2], [0, 0, 0, 1, 1, 2], [0], [0]>} : vector<8x2x128xf32>, vector<8x128x128xf32>, vector<8x2x128xf32> -> vector<8x2x128xf32>
    "tpu.trace_stop"() : () -> ()
    %141 = arith.addf %39, %140 : vector<8x2x128xf32>
    %142 = vector.extract_strided_slice %141 {offsets = [0, 0, 0], sizes = [8, 2, 64], strides = [1, 1, 1]} : vector<8x2x128xf32> to vector<8x2x64xf32>
    %143 = arith.mulf %142, %142 : vector<8x2x64xf32>
    %144 = arith.mulf %142, %143 : vector<8x2x64xf32>
    %cst_41 = arith.constant 4.471500e-02 : f32
    %145 = vector.broadcast %cst_41 : f32 to vector<8x2x64xf32>
    %146 = arith.mulf %145, %144 : vector<8x2x64xf32>
    %147 = arith.addf %142, %146 : vector<8x2x64xf32>
    %cst_42 = arith.constant 0.797884583 : f32
    %148 = vector.broadcast %cst_42 : f32 to vector<8x2x64xf32>
    %149 = arith.mulf %148, %147 : vector<8x2x64xf32>
    %150 = math.tanh %149 : vector<8x2x64xf32>
    %cst_43 = arith.constant 1.000000e+00 : f32
    %151 = vector.broadcast %cst_43 : f32 to vector<8x2x64xf32>
    %152 = arith.addf %151, %150 : vector<8x2x64xf32>
    %cst_44 = arith.constant 5.000000e-01 : f32
    %153 = vector.broadcast %cst_44 : f32 to vector<8x2x64xf32>
    %154 = arith.mulf %153, %152 : vector<8x2x64xf32>
    %155 = arith.mulf %142, %154 : vector<8x2x64xf32>
    %156 = vector.extract_strided_slice %141 {offsets = [0, 0, 64], sizes = [8, 2, 64], strides = [1, 1, 1]} : vector<8x2x128xf32> to vector<8x2x64xf32>
    %157 = arith.mulf %155, %156 : vector<8x2x64xf32>
    %c0_45 = arith.constant 0 : index
    %c0_46 = arith.constant 0 : index
    %c0_47 = arith.constant 0 : index
    %158 = vector.load %arg8[%c0_45, %c0_46, %c0_47] : memref<8x64x33xf32, #tpu.memory_space<vmem>>, vector<8x64x33xf32>
    "tpu.trace_start"() <{level = 10 : i32, message = "sbf,sfd->sbd"}> : () -> ()
    %cst_48 = arith.constant dense<0.000000e+00> : vector<8x2x33xf32>
    %159 = tpu.matmul %157, %158, %cst_48 {dimension_numbers = #tpu.dot_dimension_numbers<[2], [1], [1], [2], [0, 0, 0, 1, 1, 2], [0], [0]>} : vector<8x2x64xf32>, vector<8x64x33xf32>, vector<8x2x33xf32> -> vector<8x2x33xf32>
    "tpu.trace_stop"() : () -> ()
    %c0_49 = arith.constant 0 : index
    %c0_50 = arith.constant 0 : index
    %c0_51 = arith.constant 0 : index
    %160 = vector.load %arg9[%c0_49, %c0_50, %c0_51] : memref<8x1x33xf32, #tpu.memory_space<vmem>>, vector<8x1x33xf32>
    %161 = vector.broadcast %160 : vector<8x1x33xf32> to vector<8x2x33xf32>
    %162 = arith.addf %159, %161 : vector<8x2x33xf32>
    %163 = vector.extract_strided_slice %162 {offsets = [0, 0, 32], sizes = [8, 2, 1], strides = [1, 1, 1]} : vector<8x2x33xf32> to vector<8x2x1xf32>
    %164 = arith.negf %163 : vector<8x2x1xf32>
    %165 = math.exp %164 : vector<8x2x1xf32>
    %cst_52 = arith.constant 1.000000e+00 : f32
    %166 = vector.broadcast %cst_52 : f32 to vector<8x2x1xf32>
    %167 = arith.addf %166, %165 : vector<8x2x1xf32>
    %168 = arith.divf %166, %167 : vector<8x2x1xf32>
    %cst_53 = arith.constant 2.000000e+00 : f32
    %169 = vector.broadcast %cst_53 : f32 to vector<8x2x1xf32>
    %170 = arith.mulf %168, %169 : vector<8x2x1xf32>
    %171 = vector.extract_strided_slice %162 {offsets = [0, 0, 0], sizes = [8, 2, 32], strides = [1, 1, 1]} : vector<8x2x33xf32> to vector<8x2x32xf32>
    %172 = vector.broadcast %170 : vector<8x2x1xf32> to vector<8x2x32xf32>
    %173 = arith.mulf %171, %172 : vector<8x2x32xf32>
    %c0_54 = arith.constant 0 : index
    %c0_55 = arith.constant 0 : index
    %c0_56 = arith.constant 0 : index
    %174 = vector.load %arg10[%c0_54, %c0_55, %c0_56] : memref<8x2x32xf32, #tpu.memory_space<vmem>>, vector<8x2x32xf32>
    tpu.vector_store %arg10[%c0_54, %c0_55, %c0_56], %173 {strides = array<i32>} : memref<8x2x32xf32, #tpu.memory_space<vmem>>, vector<8x2x32xf32>,
    return
  }
}

</mosaic_0001>

<bundles_post_ra>
// kernel: tpu_custom_call.1
= control target key start
LH: loop header
LB: loop body
LE: loop exit
PB: predicated region body
PF: predicated region fallthrough
CT: control target
= control target key end

     0   :  { %15 = vsyncpa [#allocation3], 0  ;;  %s7232_s0 = inlined_call_operand.vmem [shape: f32[8,2,32], index: 0, kind: input, shape index: {}]   ;;  %s7233_s1 = inlined_call_operand.vmem [shape: f32[32,32], index: 1, kind: input, shape index: {}]   ;;  %s7234_s2 = inlined_call_operand.vmem [shape: f32[2,32], index: 2, kind: input, shape index: {}]   ;;  %s7235_s3 = inlined_call_operand.vmem [shape: f32[8,32,256], index: 3, kind: input, shape index: {}]   ;;  %s7236_s4 = inlined_call_operand.vmem [shape: f32[8,1,256], index: 4, kind: input, shape index: {}]   ;;  %s7237_s5 = inlined_call_operand.vmem [shape: f32[32,256], index: 5, kind: input, shape index: {}]   ;;  %s7238_s6 = inlined_call_operand.vmem [shape: f32[1,256], index: 6, kind: input, shape index: {}]   ;;  %s7239_s7 = inlined_call_operand.hbm [shape: f32[8,128,128], index: 7, kind: input, shape index: {}]   ;;  %s7240_s8 = inlined_call_operand.vmem [shape: f32[8,64,33], index: 8, kind: input, shape index: {}]   ;;  %s7241_s9 = inlined_call_operand.vmem [shape: f32[8,1,33], index: 9, kind: input, shape index: {}]   ;;  %s7242_s10 = inlined_call_operand.hbm [shape: f32[8,2,32], index: 10, kind: output, shape index: {}]  }
   0x1   :  { %16 = vsyncpa [#allocation4], 0  ;;  %s5928_s13 = smov [#allocation2]   ;;  %s5880_s17 = scalar_lea.hbm %s7239_s7, 16384 }
   0x2   :  { %s36_s14 = sshll.u32 %s5928_s13, 4  ;;  %p5881_p0 = scmp.ne.s32.totalorder %s7239_s7, %s5880_s17  ;;  %s37_s14 = int_to_ptr.vmem [resolvable:$true] %s36_s14 }
   0x3   :  { %p5884_p1 = scmp.lt.u32.totalorder %s5880_s17, %s7239_s7 }
   0x5   :  { %p5886_p2 = pnand %p5884_p1, %p5881_p0 }
   0x7   :  { %5889 = shalt.err (!%p5886_p2)
}
   0x8   :  { %s5890_s22 = scalar_lea.vmem %s37_s14, 16384  ;;  %p5895_p4 = scmp.lt.s32.totalorder %s37_s14, %s37_s14 }
   0x9   :  { %p5891_p3 = scmp.ne.s32.totalorder %s37_s14, %s5890_s22  ;;  %p5896_p5 = scmp.lt.s32.totalorder %s5890_s22, %s5890_s22 }
   0xb   :  { %p5897_p6 = por %p5896_p5, %p5895_p4 }
   0xd   :  { %p5898_p7 = pnand %p5897_p6, %p5891_p3 }
   0xf   :  { %5901 = shalt.err (!%p5898_p7)
}
  0x10   :  { %s5929_s23 = smov 128   ;;  %s5930_s24 = smov 8  }
  0x11   :  { %42 = dma.hbm_to_vmem [thread:$0]  %s7239_s7, 16384, %s37_s14, [#allocation3], %s5929_s23, %s5929_s23, %s5930_s24  }
  0x12   :  { %5924 = dma.done.wait [#allocation3], 16384  }
  0x13   :  { %5925 = vsyncadd [#allocation3], 4294950912  ;;  %vm58_vm0 = vcmask 254976   ;;  %v50_v0 = vld [vmem:[%s7232_s0] sm:$0x3]  ;;  %v195_v16 = vld [vmem:[%s7237_s5 + $0x8] sm:$0xff] }
  0x14   :  { %v52_v1 = vld [vmem:[%s7232_s0 + $0x4] sm:$0x3]  ;;  %v51_v2 = vld [vmem:[%s7232_s0 + $0x2] sm:$0x3]  ;;  %v59_v3 = vsel %vm58_vm0, %v50_v0, 0.0  ;;  %v197_v17 = vld [vmem:[%s7237_s5 + $0x18] sm:$0xff] }
  0x15   :  { %v65_v4 = vsel %vm58_vm0, %v52_v1, 0.0  ;;  %v53_v5 = vld [vmem:[%s7232_s0 + $0x6] sm:$0x3]  ;;  %60 = vadd.xlane.f32.xlu0 %v59_v3  ;;  %v62_v6 = vsel %vm58_vm0, %v51_v2, 0.0  ;;  %v54_v8 = vld [vmem:[%s7232_s0 + $0x8] sm:$0x3]  ;;  %v5292_v19 = vpack.c.bf16 %v197_v17, %v195_v16 }
  0x16   :  { %66 = vadd.xlane.f32.xlu1 %v65_v4  ;;  %v68_v7 = vsel %vm58_vm0, %v53_v5, 0.0  ;;  %v55_v9 = vld [vmem:[%s7232_s0 + $0xa] sm:$0x3]  ;;  %v71_v10 = vsel %vm58_vm0, %v54_v8, 0.0  ;;  %v56_v12 = vld [vmem:[%s7232_s0 + $0xc] sm:$0x3] }
  0x17   :  { %v74_v11 = vsel %vm58_vm0, %v55_v9, 0.0  ;;  %v57_v13 = vld [vmem:[%s7232_s0 + $0xe] sm:$0x3]  ;;  %v77_v14 = vsel %vm58_vm0, %v56_v12, 0.0  ;;  %v194_v18 = vld [vmem:[%s7237_s5] sm:$0xff]  ;;  %v196_v20 = vld [vmem:[%s7237_s5 + $0x10] sm:$0xff]  ;;  %5293 = vmatprep.subr.bf16.mxu0 %v5292_v19 }
  0x18   :  { %v80_v15 = vsel %vm58_vm0, %v57_v13, 0.0  ;;  %v199_v21 = vld [vmem:[%s7237_s5 + $0x28] sm:$0xff]  ;;  %v201_v22 = vld [vmem:[%s7237_s5 + $0x38] sm:$0xff]  ;;  %v5294_v23 = vpack.c.bf16 %v196_v20, %v194_v18  ;;  %v198_v25 = vld [vmem:[%s7237_s5 + $0x20] sm:$0xff]  ;;  %v5931_v4 = vmov 0.0   ;;  %vm214_vm1 = vcmask 261120  }
  0x19   :  { %63 = vadd.xlane.f32.xlu0 %v62_v6  ;;  %v5296_v24 = vpack.c.bf16 %v201_v22, %v199_v21  ;;  %v200_v26 = vld [vmem:[%s7237_s5 + $0x30] sm:$0xff]  ;;  %291 = vmatprep.mubr.f32.mxu0 %v5931_v4  ;;  %v191_v6 = vld [vmem:[%s7233_s1 + $0x8] sm:$0xff]  ;;  %v332_v18 = vld [vmem:[%s7235_s3 + $0x80] sm:$0xff]  ;;  %s5934_s11 = smov 64   ;;  %s5935_s12 = smov 32   ;;  %vm5936_vm3 = vmmov 0  }
  0x1a   :  { %69 = vadd.xlane.f32.xlu1 %v68_v7  ;;  %5295 = vmatpush1.bf16.msra.mxu0 %v5294_v23  ;;  %v5298_v27 = vpack.c.bf16 %v200_v26, %v198_v25  ;;  %v317_v7 = vld [vmem:[%s7235_s3 + $0x8] sm:$0xff]  ;;  %v334_v19 = vld [vmem:[%s7235_s3 + $0x90] sm:$0xff]  ;;  %v323_v20 = vld [vmem:[%s7235_s3 + $0x38] sm:$0xff]  ;;  %vm1139_vm4 = vcmask 1041409   ;;  %vm1142_vm5 = vcmask 1042434   ;;  %vm1145_vm6 = vcmask 1043459  }
  0x1b   :  { %5297 = vmatprep.subr.bf16.mxu0 %v5296_v24  ;;  %543 = vmatprep.mubr.f32.mxu1 %v5931_v4  ;;  %v321_v16 = vld [vmem:[%s7235_s3 + $0x28] sm:$0xff]  ;;  %v5318_v21 = vpack.c.bf16 %v334_v19, %v332_v18  ;;  %v193_v22 = vld [vmem:[%s7233_s1 + $0x18] sm:$0xff]  ;;  %v320_v24 = vld [vmem:[%s7235_s3 + $0x20] sm:$0xff]  ;;  %vm1148_vm7 = vcmask 1044484   ;;  %vm1151_vm8 = vcmask 1045509   ;;  %vm1154_vm9 = vcmask 1046534  }
  0x1c   :  { %v5304_v23 = vpack.c.bf16 %v323_v20, %v321_v16  ;;  %v322_v25 = vld [vmem:[%s7235_s3 + $0x30] sm:$0xff]  ;;  %v328_v20 = vld [vmem:[%s7235_s3 + $0x60] sm:$0xff]  ;;  %vm6387_vm2 = vmpackc.low %vm214_vm1, %vm214_vm1  ;;  %vm1157_vm10 = vcmask 1047559   ;;  %vm1505_vm11 = vcmask 130048   ;;  %vm1877_vm12 = vcmask 785408  }
  0x1d   :  { %72 = vadd.xlane.f32.xlu0 %v71_v10  ;;  %v316_v10 = vld [vmem:[%s7235_s3] sm:$0xff]  ;;  %v5306_v26 = vpack.c.bf16 %v322_v25, %v320_v24  ;;  %v341_v24 = vld [vmem:[%s7235_s3 + $0xc8] sm:$0xff]  ;;  %v343_v25 = vld [vmem:[%s7235_s3 + $0xd8] sm:$0xff]  ;;  %vm1875_vm13 = vcmask 523264   ;;  %vm2772_vm14 = vcmask 1040384  }
  0x1e   :  { %75 = vadd.xlane.f32.xlu1 %v74_v11  ;;  %5299 = vmatpush1.bf16.msra.mxu0 %v5298_v27  ;;  %v318_v11 = vld [vmem:[%s7235_s3 + $0x10] sm:$0xff]  ;;  %v337_v27 = vld [vmem:[%s7235_s3 + $0xa8] sm:$0xff] }
  0x21   :  { %78 = vadd.xlane.f32.xlu0 %v77_v14  ;;  %v333_v14 = vld [vmem:[%s7235_s3 + $0x88] sm:$0xff] }
  0x22   :  { %81 = vadd.xlane.f32.xlu1 %v80_v15  ;;  %v335_v15 = vld [vmem:[%s7235_s3 + $0x98] sm:$0xff] }
  0x23   :  { %v5316_v17 = vpack.c.bf16 %v335_v15, %v333_v14 }
  0x25   :  { %5317 = vmatprep.subr.bf16.mxu0 %v5316_v17 }
  0xa2   :  { %v61_v28 = vpop.xlane.xlu0 %60 }
  0xa3   :  { %v67_v29 = vpop.xlane.xlu1 %66  ;;  %v84_v30 = vmul.f32 0.03125, %v61_v28  ;;  %v339_v28 = vld [vmem:[%s7235_s3 + $0xb8] sm:$0xff] }
  0xa4   :  { %v86_v31 = vmul.f32 0.03125, %v67_v29  ;;  %v5320_v29 = vpack.c.bf16 %v339_v28, %v337_v27 }
  0xa5   :  { %v6064_v32 = vsub.f32 %v50_v0, %v84_v30  ;;  %v336_v30 = vld [vmem:[%s7235_s3 + $0xa0] sm:$0xff] }
  0xa6   :  { %v6066_v33 = vsub.f32 %v52_v1, %v86_v31  ;;  %v64_v34 = vpop.xlane.xlu0 %63  ;;  %v338_v31 = vld [vmem:[%s7235_s3 + $0xb0] sm:$0xff] }
  0xa7   :  { %v70_v35 = vpop.xlane.xlu1 %69  ;;  %v85_v36 = vmul.f32 0.03125, %v64_v34  ;;  %v100_v38 = vmul.f32 %v6064_v32, %v6064_v32  ;;  %v325_v34 = vld [vmem:[%s7235_s3 + $0x48] sm:$0xff] }
  0xa8   :  { %v87_v37 = vmul.f32 0.03125, %v70_v35  ;;  %v102_v39 = vmul.f32 %v6066_v33, %v6066_v33  ;;  %v5322_v35 = vpack.c.bf16 %v338_v31, %v336_v30  ;;  %v340_v30 = vld [vmem:[%s7235_s3 + $0xc0] sm:$0xff] }
  0xa9   :  { %v6072_v40 = vsub.f32 %v51_v2, %v85_v36  ;;  %v108_v42 = vsel %vm58_vm0, %v100_v38, 0.0  ;;  %v327_v36 = vld [vmem:[%s7235_s3 + $0x58] sm:$0xff]  ;;  %v349_v38 = vld [vmem:[%s7235_s3 + $0x108] sm:$0xff] }
  0xaa   :  { %v6074_v41 = vsub.f32 %v53_v5, %v87_v37  ;;  %109 = vadd.xlane.f32.xlu0 %v108_v42  ;;  %v73_v43 = vpop.xlane.xlu0 %72  ;;  %v114_v45 = vsel %vm58_vm0, %v102_v39, 0.0  ;;  %v190_v5 = vld [vmem:[%s7233_s1] sm:$0xff]  ;;  %v5308_v37 = vpack.c.bf16 %v327_v36, %v325_v34  ;;  %v351_v39 = vld [vmem:[%s7235_s3 + $0x118] sm:$0xff]  ;;  %v5324_v36 = vpack.c.bf16 %v343_v25, %v341_v24  ;;  %v362_v25 = vld [vmem:[%s7235_s3 + $0x170] sm:$0xff] }
  0xab   :  { %v76_v44 = vpop.xlane.xlu1 %75  ;;  %v88_v46 = vmul.f32 0.03125, %v73_v43  ;;  %v101_v48 = vmul.f32 %v6072_v40, %v6072_v40  ;;  %4424 = vmatmul.mubr.msk.f32.vlgmr.msra.gmra.mrb[0].mxu0 %vm214_vm1, %v190_v5  ;;  %v5332_v42 = vpack.c.bf16 %v351_v39, %v349_v38  ;;  %v352_v38 = vld [vmem:[%s7235_s3 + $0x120] sm:$0xff]  ;;  %v354_v39 = vld [vmem:[%s7235_s3 + $0x130] sm:$0xff] }
  0xac   :  { %v89_v47 = vmul.f32 0.03125, %v76_v44  ;;  %v103_v49 = vmul.f32 %v6074_v41, %v6074_v41  ;;  %297 = vmatprep.mubr.f32.mxu0 %v5931_v4  ;;  %5319 = vmatpush1.bf16.msra.mxu0 %v5318_v21  ;;  %v330_v21 = vld [vmem:[%s7235_s3 + $0x70] sm:$0xff]  ;;  %v360_v24 = vld [vmem:[%s7235_s3 + $0x160] sm:$0xff] }
  0xad   :  { %v6082_v50 = vsub.f32 %v54_v8, %v88_v46  ;;  %v111_v52 = vsel %vm58_vm0, %v101_v48, 0.0  ;;  %v319_v8 = vld [vmem:[%s7235_s3 + $0x18] sm:$0xff]  ;;  %5321 = vmatprep.subr.bf16.mxu0 %v5320_v29  ;;  %v5314_v29 = vpack.c.bf16 %v330_v21, %v328_v20 }
  0xae   :  { %v6084_v51 = vsub.f32 %v55_v9, %v89_v47  ;;  %115 = vadd.xlane.f32.xlu0 %v114_v45  ;;  %112 = vadd.xlane.f32.xlu1 %v111_v52  ;;  %v79_v53 = vpop.xlane.xlu0 %78  ;;  %v117_v55 = vsel %vm58_vm0, %v103_v49, 0.0  ;;  %v5300_v9 = vpack.c.bf16 %v319_v8, %v317_v7  ;;  %v324_v7 = vld [vmem:[%s7235_s3 + $0x40] sm:$0xff]  ;;  %v326_v8 = vld [vmem:[%s7235_s3 + $0x50] sm:$0xff]  ;;  %v363_v20 = vld [vmem:[%s7235_s3 + $0x178] sm:$0xff] }
  0xaf   :  { %v82_v54 = vpop.xlane.xlu1 %81  ;;  %v90_v56 = vmul.f32 0.03125, %v79_v53  ;;  %v104_v58 = vmul.f32 %v6082_v50, %v6082_v50  ;;  %4425 = vmatmul.mubr.msk.f32.gmra.mrb[2].mxu0 %vm214_vm1, %v191_v6  ;;  %v5310_v14 = vpack.c.bf16 %v326_v8, %v324_v7  ;;  %v356_v8 = vld [vmem:[%s7235_s3 + $0x140] sm:$0xff] }
  0xb0   :  { %v91_v57 = vmul.f32 0.03125, %v82_v54  ;;  %v105_v59 = vmul.f32 %v6084_v51, %v6084_v51  ;;  %303 = vmatprep.mubr.f32.mxu0 %v5931_v4  ;;  %5301 = vmatprep.subr.bf16.mxu1 %v5300_v9  ;;  %v6201_v9 = vld [vmem:[%s7234_s2 + $0x1] ss:$0 sm:$0xff] }
  0xb1   :  { %v6092_v60 = vsub.f32 %v56_v12, %v90_v56  ;;  %v120_v62 = vsel %vm58_vm0, %v104_v58, 0.0  ;;  %v192_v12 = vld [vmem:[%s7233_s1 + $0x10] sm:$0xff]  ;;  %5323 = vmatpush1.bf16.msra.mxu0 %v5322_v35 }
  0xb2   :  { %v6094_v61 = vsub.f32 %v57_v13, %v91_v57  ;;  %118 = vadd.xlane.f32.xlu1 %v117_v55  ;;  %121 = vadd.xlane.f32.xlu0 %v120_v62  ;;  %v123_v63 = vsel %vm58_vm0, %v105_v59, 0.0  ;;  %v5302_v13 = vpack.c.bf16 %v318_v11, %v316_v10  ;;  %v329_v10 = vld [vmem:[%s7235_s3 + $0x68] sm:$0xff] }
  0xb3   :  { %v106_v0 = vmul.f32 %v6092_v60, %v6092_v60  ;;  %4426 = vmatmul.mubr.msk.f32.gmra.mrb[4].mxu0 %vm214_vm1, %v192_v12  ;;  %5333 = vmatprep.subr.bf16.mxu0 %v5332_v42 }
  0xb4   :  { %v107_v1 = vmul.f32 %v6094_v61, %v6094_v61  ;;  %5303 = vmatpush1.bf16.msra.mxu1 %v5302_v13  ;;  %309 = vmatprep.mubr.f32.mxu0 %v5931_v4 }
  0xb5   :  { %v126_v2 = vsel %vm58_vm0, %v106_v0, 0.0  ;;  %5305 = vmatprep.subr.bf16.mxu1 %v5304_v23 }
  0xb6   :  { %124 = vadd.xlane.f32.xlu1 %v123_v63  ;;  %127 = vadd.xlane.f32.xlu0 %v126_v2  ;;  %v129_v3 = vsel %vm58_vm0, %v107_v1, 0.0  ;;  %v6189_v2 = vld [vmem:[%s7234_s2] ss:$0 sm:$0xff] }
  0xb7   :  { %4427 = vmatmul.mubr.msk.f32.gmra.mrb[6].mxu0 %vm214_vm1, %v193_v22  ;;  %v348_v22 = vld [vmem:[%s7235_s3 + $0x100] sm:$0xff] }
  0xb8   :  { %691 = vmatprep.mubr.f32.mxu0 %v5931_v4  ;;  %5307 = vmatpush1.bf16.msra.mxu1 %v5306_v26  ;;  %v353_v26 = vld [vmem:[%s7235_s3 + $0x128] sm:$0xff] }
  0xb9   :  { %5309 = vmatprep.subr.bf16.mxu1 %v5308_v37  ;;  %v342_v37 = vld [vmem:[%s7235_s3 + $0xd0] sm:$0xff] }
  0xba   :  { %130 = vadd.xlane.f32.xlu1 %v129_v3 }
 0x137   :  { %v110_v43 = vpop.xlane.xlu0 %109 }
 0x138   :  { %v132_v44 = vmul.f32 0.03125, %v110_v43 }
 0x13a   :  { %v140_v45 = vadd.f32 1e-05, %v132_v44 }
 0x13b   :  { %v113_v46 = vpop.xlane.xlu1 %112  ;;  %v116_v47 = vpop.xlane.xlu0 %115 }
 0x13c   :  { %5783 = vrsqrt.f32 %v140_v45  ;;  %v133_v48 = vmul.f32 0.03125, %v113_v46  ;;  %v134_v49 = vmul.f32 0.03125, %v116_v47  ;;  %v345_v46 = vld [vmem:[%s7235_s3 + $0xe8] sm:$0xff]  ;;  %v347_v47 = vld [vmem:[%s7235_s3 + $0xf8] sm:$0xff] }
 0x13e   :  { %v141_v52 = vadd.f32 1e-05, %v133_v48  ;;  %v142_v53 = vadd.f32 1e-05, %v134_v49  ;;  %v365_v48 = vld [vmem:[%s7235_s3 + $0x188] sm:$0xff]  ;;  %v367_v49 = vld [vmem:[%s7235_s3 + $0x198] sm:$0xff] }
 0x13f   :  { %v119_v54 = vpop.xlane.xlu1 %118  ;;  %v122_v55 = vpop.xlane.xlu0 %121 }
 0x140   :  { %5785 = vrsqrt.f32 %v141_v52  ;;  %v135_v56 = vmul.f32 0.03125, %v119_v54  ;;  %v136_v57 = vmul.f32 0.03125, %v122_v55 }
 0x141   :  { %5787 = vrsqrt.f32 %v142_v53  ;;  %v5338_v53 = vpack.c.bf16 %v354_v39, %v352_v38  ;;  %v5932_v38 = vmov 0.0|0.0  }
 0x142   :  { %v143_v58 = vadd.f32 1e-05, %v135_v56  ;;  %v144_v59 = vadd.f32 1e-05, %v136_v57  ;;  %v5328_v56 = vpack.c.bf16 %v347_v47, %v345_v46  ;;  %v344_v57 = vld [vmem:[%s7235_s3 + $0xe0] sm:$0xff]  ;;  %v378_v46 = vld [vmem:[%s7235_s3 + $0x1f0] sm:$0xff] }
 0x143   :  { %v125_v62 = vpop.xlane.xlu1 %124  ;;  %v128_v63 = vpop.xlane.xlu0 %127 }
 0x144   :  { %v138_v0 = vmul.f32 0.03125, %v128_v63  ;;  %5789 = vrsqrt.f32 %v144_v59  ;;  %v137_v3 = vmul.f32 0.03125, %v125_v62  ;;  %v364_v59 = vld [vmem:[%s7235_s3 + $0x180] sm:$0xff]  ;;  %v5348_v62 = vpack.c.bf16 %v367_v49, %v365_v48  ;;  %v366_v63 = vld [vmem:[%s7235_s3 + $0x190] sm:$0xff] }
 0x145   :  { %5791 = vrsqrt.f32 %v143_v58  ;;  %v346_v58 = vld [vmem:[%s7235_s3 + $0xf0] sm:$0xff]  ;;  %v204_v49 = vlaneseq }
 0x146   :  { %v5784_v1 = vpop.eup %5783  ;;  %v146_v5 = vadd.f32 1e-05, %v138_v0  ;;  %v145_v13 = vadd.f32 1e-05, %v137_v3  ;;  %v357_v0 = vld [vmem:[%s7235_s3 + $0x148] sm:$0xff]  ;;  %v5330_v7 = vpack.c.bf16 %v346_v58, %v344_v57 }
 0x147   :  { %v156_v6 = vmul.f32 %v5784_v1, %v6064_v32  ;;  %v331_v32 = vld [vmem:[%s7235_s3 + $0x78] sm:$0xff]  ;;  %v131_v17 = vpop.xlane.xlu1 %130 }
 0x148   :  { %5793 = vrsqrt.f32 %v146_v5  ;;  %v5312_v19 = vpack.c.bf16 %v331_v32, %v329_v10  ;;  %v139_v28 = vmul.f32 0.03125, %v131_v17  ;;  %v359_v1 = vld [vmem:[%s7235_s3 + $0x158] sm:$0xff]  ;;  %v369_v5 = vld [vmem:[%s7235_s3 + $0x1a8] sm:$0xff]  ;;  %v5350_v10 = vpack.c.bf16 %v366_v63, %v364_v59 }
 0x149   :  { %v169_v11 = vmul.f32 %v6189_v2, %v156_v6  ;;  %5795 = vrsqrt.f32 %v145_v13  ;;  %v371_v6 = vld [vmem:[%s7235_s3 + $0x1b8] sm:$0xff]  ;;  %v368_v13 = vld [vmem:[%s7235_s3 + $0x1a0] sm:$0xff] }
 0x14a   :  { %v5786_v12 = vpop.eup %5785  ;;  %v147_v52 = vadd.f32 1e-05, %v139_v28 }
 0x14b   :  { %v5788_v15 = vpop.eup %5787  ;;  %v157_v16 = vmul.f32 %v5786_v12, %v6072_v40  ;;  %v182_v18 = vadd.f32 %v6201_v9, %v169_v11  ;;  %v350_v40 = vld [vmem:[%s7235_s3 + $0x110] sm:$0xff]  ;;  %v5340_v11 = vpack.c.bf16 %v359_v1, %v357_v0 }
 0x14c   :  { %v158_v23 = vmul.f32 %v5788_v15, %v6066_v33  ;;  %v355_v33 = vld [vmem:[%s7235_s3 + $0x138] sm:$0xff]  ;;  %v5334_v34 = vpack.c.bf16 %v350_v40, %v348_v22  ;;  %5797 = vrsqrt.f32 %v147_v52  ;;  %v358_v12 = vld [vmem:[%s7235_s3 + $0x150] sm:$0xff]  ;;  %v6368_v52 = vshrl.u32 %v204_v49, 7 }
 0x14d   :  { %4428 = vmatmul.mubr.msk.f32.vlgmr.msra.gmra.mrb[0].mxu1 %vm214_vm1, %v182_v18  ;;  %v170_v35 = vmul.f32 %v6189_v2, %v157_v16  ;;  %v5336_v45 = vpack.c.bf16 %v355_v33, %v353_v26  ;;  %v5352_v18 = vpack.c.bf16 %v371_v6, %v369_v5  ;;  %v5342_v21 = vpack.c.bf16 %v358_v12, %v356_v8  ;;  %v375_v33 = vld [vmem:[%s7235_s3 + $0x1d8] sm:$0xff] }
 0x14e   :  { %v171_v27 = vmul.f32 %v6189_v2, %v158_v23  ;;  %5311 = vmatpush1.bf16.msra.mxu1 %v5310_v14  ;;  %617 = vmatprep.mubr.f32.mxu1 %v5931_v4  ;;  %v5790_v31 = vpop.eup %5789  ;;  %v370_v14 = vld [vmem:[%s7235_s3 + $0x1b0] sm:$0xff] }
 0x14f   :  { %5313 = vmatprep.subr.bf16.mxu1 %v5312_v19  ;;  %v5792_v42 = vpop.eup %5791  ;;  %v160_v44 = vmul.f32 %v5790_v31, %v6082_v50  ;;  %v5326_v50 = vpack.c.bf16 %v342_v37, %v340_v30  ;;  %v183_v55 = vadd.f32 %v6201_v9, %v170_v35  ;;  %v361_v19 = vld [vmem:[%s7235_s3 + $0x168] sm:$0xff]  ;;  %v5354_v22 = vpack.c.bf16 %v370_v14, %v368_v13  ;;  %v372_v30 = vld [vmem:[%s7235_s3 + $0x1c0] sm:$0xff]  ;;  %v374_v31 = vld [vmem:[%s7235_s3 + $0x1d0] sm:$0xff] }
 0x150   :  { %v184_v43 = vadd.f32 %v6201_v9, %v171_v27  ;;  %v159_v54 = vmul.f32 %v5792_v42, %v6074_v41  ;;  %v5344_v40 = vpack.c.bf16 %v363_v20, %v361_v19  ;;  %v5346_v27 = vpack.c.bf16 %v362_v25, %v360_v24  ;;  %v379_v37 = vld [vmem:[%s7235_s3 + $0x1f8] sm:$0xff] }
 0x151   :  { %v173_v41 = vmul.f32 %v6189_v2, %v160_v44  ;;  %v5358_v39 = vpack.c.bf16 %v374_v31, %v372_v30 }
 0x152   :  { %5315 = vmatpush1.bf16.msra.mxu1 %v5314_v29  ;;  %4430 = vmatmul.mubr.msk.f32.vlgmr.msra.gmra.mrb[8].mxu0 %vm214_vm1, %v184_v43  ;;  %v5794_v3 = vpop.eup %5793  ;;  %v172_v32 = vmul.f32 %v6189_v2, %v159_v54 }
 0x153   :  { %5335 = vmatpush1.bf16.msra.mxu0 %v5334_v34  ;;  %5325 = vmatprep.subr.bf16.mxu1 %v5324_v36  ;;  %v5796_v15 = vpop.eup %5795  ;;  %v162_v16 = vmul.f32 %v5794_v3, %v6092_v60  ;;  %v186_v17 = vadd.f32 %v6201_v9, %v173_v41  ;;  %v377_v36 = vld [vmem:[%s7235_s3 + $0x1e8] sm:$0xff] }
 0x154   :  { %5337 = vmatprep.subr.bf16.mxu0 %v5336_v45  ;;  %839 = vmatprep.mubr.f32.mxu0 %v5931_v4  ;;  %v161_v23 = vmul.f32 %v5796_v15, %v6084_v51  ;;  %v185_v60 = vadd.f32 %v6201_v9, %v172_v32  ;;  %v373_v51 = vld [vmem:[%s7235_s3 + $0x1c8] sm:$0xff]  ;;  %v5360_v44 = vpack.c.bf16 %v379_v37, %v377_v36  ;;  %v376_v45 = vld [vmem:[%s7235_s3 + $0x1e0] sm:$0xff] }
 0x155   :  { %4429 = vmatmul.mubr.msk.f32.vlgmr.msra.gmra.mrb[2].mxu1 %vm214_vm1, %v183_v55  ;;  %v175_v26 = vmul.f32 %v6189_v2, %v162_v16  ;;  %v5356_v29 = vpack.c.bf16 %v375_v33, %v373_v51  ;;  %v5362_v47 = vpack.c.bf16 %v378_v46, %v376_v45  ;;  %v381_v33 = vld [vmem:[%s7236_s4 + $0x2] sm:$0x3]  ;;  %v384_v37 = vld [vmem:[%s7236_s4 + $0x8] sm:$0x3]  ;;  %v383_v46 = vld [vmem:[%s7236_s4 + $0x6] sm:$0x3] }
 0x156   :  { %5327 = vmatpush1.bf16.msra.mxu1 %v5326_v50  ;;  %765 = vmatprep.mubr.f32.mxu1 %v5931_v4  ;;  %v174_v28 = vmul.f32 %v6189_v2, %v161_v23  ;;  %v5798_v34 = vpop.eup %5797  ;;  %v6371_v50 = vsub.s32 1, %v6368_v52  ;;  %v380_v23 = vld [vmem:[%s7236_s4] sm:$0x3] }
 0x157   :  { %5339 = vmatpush1.bf16.msra.mxu0 %v5338_v53  ;;  %5329 = vmatprep.subr.bf16.mxu1 %v5328_v56  ;;  %v188_v35 = vadd.f32 %v6201_v9, %v175_v26  ;;  %v163_v42 = vmul.f32 %v5798_v34, %v6094_v61  ;;  %v6374_v53 = vsub.s32 0, %v6368_v52 }
 0x158   :  { %5349 = vmatprep.subr.bf16.mxu0 %v5348_v62  ;;  %v187_v43 = vadd.f32 %v6201_v9, %v174_v28  ;;  %v411_v34 = vrot.slane %v381_v33, %v6371_v50 }
 0x159   :  { %v176_v61 = vmul.f32 %v6189_v2, %v163_v42  ;;  %v202_v2 = vld [vmem:[%s7238_s6] sm:$0x3]  ;;  %s5933_s6 = smov 96  }
 0x15a   :  { %4432 = vmatmul.mubr.msk.f32.vlgmr.msra.gmra.mrb[10].mxu0 %vm214_vm1, %v186_v17  ;;  %5331 = vmatpush1.bf16.msra.mxu1 %v5330_v7  ;;  %v211_v54 = vrot.slane %v202_v2, %v6371_v50 }
 0x15b   :  { %5351 = vmatpush1.bf16.msra.mxu0 %v5350_v10  ;;  %5341 = vmatprep.subr.bf16.mxu1 %v5340_v11  ;;  %v189_v48 = vadd.f32 %v6201_v9, %v176_v61  ;;  %v207_v9 = vrot.slane %v202_v2, %v6374_v53 }
 0x15c   :  { %5353 = vmatprep.subr.bf16.mxu0 %v5352_v18  ;;  %987 = vmatprep.mubr.f32.mxu0 %v5931_v4 }
 0x15d   :  { %4431 = vmatmul.mubr.msk.f32.vlgmr.msra.gmra.mrb[4].mxu1 %vm214_vm1, %v185_v60  ;;  %v399_v60 = vrot.slane %v380_v23, %v6374_v53 }
 0x15e   :  { %5343 = vmatpush1.bf16.msra.mxu1 %v5342_v21  ;;  %913 = vmatprep.mubr.f32.mxu1 %v5931_v4 }
 0x15f   :  { %5355 = vmatpush1.bf16.msra.mxu0 %v5354_v22  ;;  %5345 = vmatprep.subr.bf16.mxu1 %v5344_v40  ;;  %v382_v40 = vld [vmem:[%s7236_s4 + $0x4] sm:$0x3] }
 0x160   :  { %5364 = vmatprep.subr.bf16.mxu0 %v5932_v38  ;;  %v415_v51 = vrot.slane %v382_v40, %v6374_v53 }
 0x162   :  { %4434 = vmatmul.mubr.msk.f32.vlgmr.msra.gmra.mrb[12].mxu0 %vm214_vm1, %v188_v35  ;;  %5347 = vmatpush1.bf16.msra.mxu1 %v5346_v27  ;;  %v419_v27 = vrot.slane %v382_v40, %v6371_v50 }
 0x163   :  { %5357 = vmatprep.subr.bf16.mxu1 %v5356_v29  ;;  %4752 = vmatprep.mubr.msk.f32.mxu0 %vm5936_vm3, %v5931_v4  ;;  %v407_v29 = vrot.slane %v381_v33, %v6374_v53 }
 0x165   :  { %4433 = vmatmul.mubr.msk.f32.vlgmr.msra.gmra.mrb[6].mxu1 %vm214_vm1, %v187_v43 }
 0x166   :  { %5359 = vmatpush1.bf16.msra.mxu1 %v5358_v39  ;;  %1061 = vmatprep.mubr.f32.mxu1 %v5931_v4 }
 0x167   :  { %5361 = vmatprep.subr.bf16.mxu1 %v5360_v44 }
 0x16a   :  { %5363 = vmatpush1.bf16.msra.mxu1 %v5362_v47 }
 0x16b   :  { %5368 = vmatprep.subr.bf16.mxu1 %v5932_v38 }
 0x16d   :  { %4435 = vmatmul.mubr.msk.f32.vlgmr.msra.gmra.mrb[8].mxu1 %vm214_vm1, %v189_v48  ;;  %v435_v48 = vrot.slane %v384_v37, %v6371_v50 }
 0x16e   :  { %4759 = vmatprep.mubr.msk.f32.mxu1 %vm5936_vm3, %v5931_v4 }
 0x17e   :  { %v293_v55 = vpop.f32.mrb[0].mxu0 }
 0x17f   :  { %v295_v56 = vpop.f32.mrb[1].mxu0  ;;  %v294_v58 = vadd.f32 %v293_v55, %v207_v9 }
 0x180   :  { %v6381_v57 = vadd.f32 %v295_v56, %v211_v54  ;;  %v423_v56 = vrot.slane %v383_v46, %v6374_v53 }
 0x182   :  { %v299_v59 = vpop.f32.mrb[2].mxu0 }
 0x183   :  { %v300_v41 = vadd.f32 %v299_v59, %v207_v9  ;;  %v301_v62 = vpop.f32.mrb[3].mxu0  ;;  %v427_v59 = vrot.slane %v383_v46, %v6371_v50 }
 0x184   :  { %v6383_v63 = vadd.f32 %v301_v62, %v211_v54 }
 0x185   :  { %v5365_v0 = vpack.c.bf16 %v300_v41, %v294_v58  ;;  %v5721_v1 = vpack.i.bf16 %v300_v41, %v294_v58 }
 0x186   :  { %v305_v5 = vpop.f32.mrb[4].mxu0  ;;  %v5381_v8 = vpack.c.bf16 %v6383_v63, %v6381_v57  ;;  %v6405_v32 = vpack.i.bf16 %v6383_v63, %v6381_v57 }
 0x187   :  { %5722 = vrot.lane.b32.xlu1 %v5721_v1, %s5933_s6  ;;  %5727 = vrot.lane.b32.xlu0 %v5721_v1, %s5934_s11  ;;  %v6396_v6 = vadd.f32 %v305_v5, %v207_v9  ;;  %v307_v7 = vpop.f32.mrb[5].mxu0  ;;  %v386_v5 = vld [vmem:[%s7236_s4 + $0xc] sm:$0x3] }
 0x188   :  { %5367 = vmatpush3.bf16.xpose.msk.msra.mxu0 %vm6387_vm2, %v5365_v0  ;;  %v6401_v10 = vadd.f32 %v307_v7, %v211_v54  ;;  %v447_v40 = vrot.slane %v386_v5, %v6374_v53 }
 0x189   :  { %5372 = vmatprep.subr.bf16.mxu0 %v5932_v38 }
 0x18a   :  { %v311_v11 = vpop.f32.mrb[6].mxu0 }
 0x18b   :  { %5732 = vrot.lane.b32.xlu1 %v5721_v1, %s5935_s12  ;;  %v6407_v12 = vadd.f32 %v311_v11, %v207_v9  ;;  %v313_v13 = vpop.f32.mrb[7].mxu0 }
 0x18c   :  { %v6409_v14 = vadd.f32 %v313_v13, %v211_v54  ;;  %v431_v54 = vrot.slane %v384_v37, %v6374_v53 }
 0x18d   :  { %v5393_v15 = vpack.c.bf16 %v6407_v12, %v6396_v6  ;;  %v6415_v16 = vpack.i.bf16 %v6407_v12, %v6396_v6 }
 0x18e   :  { %v5409_v17 = vpack.c.bf16 %v6409_v14, %v6401_v10  ;;  %v6421_v18 = vpack.i.bf16 %v6409_v14, %v6401_v10 }
 0x1f9   :  { %v5723_v19 = vpop.permute.xlu1 %5722 }
 0x1fa   :  { %v5725_v20 = vunpack.i.h.bf16 %v5723_v19  ;;  %v5724_v21 = vunpack.i.l.bf16 %v5723_v19  ;;  %v385_v19 = vld [vmem:[%s7236_s4 + $0xa] sm:$0x3] }
 0x1fc   :  { %v5369_v22 = vpack.c.bf16 %v5725_v20, %v5724_v21 }
 0x1fe   :  { %5371 = vmatpush3.bf16.xpose.msk.msra.mxu1 %vm6387_vm2, %v5369_v22  ;;  %v451_v22 = vrot.slane %v386_v5, %v6371_v50 }
 0x1ff   :  { %5376 = vmatprep.subr.bf16.mxu1 %v5932_v38 }
 0x220   :  { %v545_v24 = vpop.f32.mrb[0].mxu1 }
 0x221   :  { %v546_v25 = vadd.f32 %v545_v24, %v399_v60  ;;  %v6437_v26 = vpop.f32.mrb[1].mxu1 }
 0x223   :  { %1092 = vrot.lane.b32.xlu0 %v546_v25, %s5934_s11  ;;  %v1893_v39 = vrot.slane %v546_v25, 1 }
 0x225   :  { %v693_v28 = vpop.f32.mrb[8].mxu0 }
 0x226   :  { %v694_v30 = vadd.f32 %v693_v28, %v415_v51  ;;  %v695_v31 = vpop.f32.mrb[9].mxu0  ;;  %v443_v28 = vrot.slane %v385_v19, %v6371_v50 }
 0x227   :  { %v6447_v35 = vadd.f32 %v695_v31, %v419_v27 }
 0x228   :  { %v619_v36 = vpop.f32.mrb[2].mxu1  ;;  %1112 = vrot.lane.b32.xlu0 %v694_v30, %s5935_s12  ;;  %1080 = vrot.lane.b32.xlu1 %v694_v30, %s5933_s6  ;;  %v1895_v44 = vrot.slane %v694_v30, 7  ;;  %v1141_v49 = vrot.slane %v694_v30, 6 }
 0x229   :  { %v620_v42 = vadd.f32 %v619_v36, %v407_v29  ;;  %v621_v43 = vpop.f32.mrb[3].mxu1 }
 0x22a   :  { %v6454_v45 = vadd.f32 %v621_v43, %v411_v34 }
 0x22b   :  { %v1138_v47 = vrot.slane %v620_v42, 7  ;;  %v1894_v61 = vsel %vm1139_vm4, %v620_v42, %v1893_v39 }
 0x22c   :  { %v1896_v2 = vsel %vm1142_vm5, %v1895_v44, %v1894_v61  ;;  %1108 = vrot.lane.b32.xlu0 %v546_v25, %s5935_s12  ;;  %1076 = vrot.lane.b32.xlu1 %v546_v25, %s5933_s6  ;;  %v387_v44 = vld [vmem:[%s7236_s4 + $0xe] sm:$0x3] }
 0x22d   :  { %v1140_v9 = vsel %vm1139_vm4, %v1138_v47, %v546_v25  ;;  %v841_v55 = vpop.f32.mrb[10].mxu0  ;;  %v439_v25 = vrot.slane %v385_v19, %v6374_v53 }
 0x22e   :  { %v843_v58 = vpop.f32.mrb[11].mxu0  ;;  %v1143_v41 = vsel %vm1142_vm5, %v1141_v49, %v1140_v9  ;;  %v842_v0 = vadd.f32 %v841_v55, %v431_v54  ;;  %v459_v9 = vrot.slane %v387_v44, %v6371_v50 }
 0x22f   :  { %v6469_v62 = vadd.f32 %v843_v58, %v435_v48  ;;  %v5728_v48 = vpop.permute.xlu0 %5727 }
 0x230   :  { %v767_v1 = vpop.f32.mrb[4].mxu1  ;;  %1078 = vrot.lane.b32.xlu0 %v620_v42, %s5933_s6  ;;  %1096 = vrot.lane.b32.xlu1 %v694_v30, %s5934_s11  ;;  %v1147_v23 = vrot.slane %v842_v0, 4  ;;  %v1899_v60 = vrot.slane %v842_v0, 5  ;;  %v5730_v58 = vunpack.i.h.bf16 %v5728_v48 }
 0x231   :  { %v6476_v7 = vadd.f32 %v767_v1, %v423_v56  ;;  %v769_v11 = vpop.f32.mrb[5].mxu1 }
 0x232   :  { %v6478_v13 = vadd.f32 %v769_v11, %v427_v59  ;;  %v5729_v59 = vunpack.i.l.bf16 %v5728_v48 }
 0x233   :  { %v1144_v20 = vrot.slane %v6476_v7, 5  ;;  %v1897_v21 = vrot.slane %v6476_v7, 6 }
 0x234   :  { %1110 = vrot.lane.b32.xlu0 %v620_v42, %s5935_s12  ;;  %1084 = vrot.lane.b32.xlu1 %v842_v0, %s5933_s6 }
 0x235   :  { %v989_v24 = vpop.f32.mrb[12].mxu0  ;;  %v1146_v51 = vsel %vm1145_vm6, %v1144_v20, %v1143_v41  ;;  %v1898_v33 = vsel %vm1145_vm6, %v1897_v21, %v1896_v2  ;;  %v5373_v20 = vpack.c.bf16 %v5730_v58, %v5729_v59 }
 0x236   :  { %v991_v27 = vpop.f32.mrb[13].mxu0  ;;  %v1149_v29 = vsel %vm1148_vm7, %v1147_v23, %v1146_v51  ;;  %v1900_v30 = vsel %vm1148_vm7, %v1899_v60, %v1898_v33  ;;  %v990_v34 = vadd.f32 %v989_v24, %v447_v40  ;;  %v5733_v60 = vpop.permute.xlu1 %5732 }
 0x237   :  { %v6495_v31 = vadd.f32 %v991_v27, %v451_v22 }
 0x238   :  { %v915_v36 = vpop.f32.mrb[6].mxu1  ;;  %1082 = vrot.lane.b32.xlu0 %v6476_v7, %s5933_s6  ;;  %1094 = vrot.lane.b32.xlu1 %v620_v42, %s5934_s11  ;;  %v1153_v61 = vrot.slane %v990_v34, 2  ;;  %v1903_v49 = vrot.slane %v990_v34, 3  ;;  %v455_v42 = vrot.slane %v387_v44, %v6374_v53 }
 0x239   :  { %v916_v37 = vadd.f32 %v915_v36, %v439_v25  ;;  %v917_v39 = vpop.f32.mrb[7].mxu1 }
 0x23a   :  { %v6500_v43 = vadd.f32 %v917_v39, %v443_v28 }
 0x23b   :  { %v1150_v46 = vrot.slane %v916_v37, 3  ;;  %v1901_v47 = vrot.slane %v916_v37, 4 }
 0x23c   :  { %1086 = vrot.lane.b32.xlu0 %v916_v37, %s5933_s6  ;;  %1100 = vrot.lane.b32.xlu1 %v842_v0, %s5934_s11 }
 0x23d   :  { %v1152_v2 = vsel %vm1151_vm8, %v1150_v46, %v1149_v29  ;;  %v1902_v54 = vsel %vm1151_vm8, %v1901_v47, %v1900_v30 }
 0x23e   :  { %v1155_v55 = vsel %vm1154_vm9, %v1153_v61, %v1152_v2  ;;  %v1904_v56 = vsel %vm1154_vm9, %v1903_v49, %v1902_v54 }
 0x240   :  { %v1063_v41 = vpop.f32.mrb[8].mxu1  ;;  %1102 = vrot.lane.b32.xlu0 %v916_v37, %s5934_s11  ;;  %1116 = vrot.lane.b32.xlu1 %v842_v0, %s5935_s12 }
 0x241   :  { %v1064_v1 = vadd.f32 %v1063_v41, %v455_v42  ;;  %v1065_v5 = vpop.f32.mrb[9].mxu1 }
 0x242   :  { %v6515_v11 = vadd.f32 %v1065_v5, %v459_v9 }
 0x243   :  { %v1156_v19 = vrot.slane %v1064_v1, 1  ;;  %v1905_v21 = vrot.slane %v1064_v1, 2 }
 0x244   :  { %1090 = vrot.lane.b32.xlu0 %v1064_v1, %s5933_s6  ;;  %1088 = vrot.lane.b32.xlu1 %v990_v34, %s5933_s6 }
 0x245   :  { %v1158_v22 = vsel %vm1157_vm10, %v1156_v19, %v1155_v55  ;;  %v6521_v23 = vsel %vm1157_vm10, %v1905_v21, %v1904_v56 }
 0x246   :  { %4753 = vmatmul.mubr.msk.f32.vlgmr.msra.gmra.mrb[14].mxu0 %vm214_vm1, %v1158_v22 }
 0x247   :  { %5375 = vmatpush3.bf16.xpose.msk.msra.mxu0 %vm6387_vm2, %v5373_v20  ;;  %4766 = vmatprep.mubr.msk.f32.mxu0 %vm5936_vm3, %v5931_v4 }
 0x248   :  { %1104 = vrot.lane.b32.xlu0 %v990_v34, %s5934_s11  ;;  %1098 = vrot.lane.b32.xlu1 %v6476_v7, %s5934_s11 }
 0x249   :  { %5380 = vmatprep.subr.bf16.mxu0 %v5932_v38 }
 0x24c   :  { %1106 = vrot.lane.b32.xlu0 %v1064_v1, %s5934_s11  ;;  %1114 = vrot.lane.b32.xlu1 %v6476_v7, %s5935_s12 }
 0x250   :  { %1122 = vrot.lane.b32.xlu0 %v1064_v1, %s5935_s12  ;;  %1118 = vrot.lane.b32.xlu1 %v916_v37, %s5935_s12 }
 0x254   :  { %1120 = vrot.lane.b32.xlu1 %v990_v34, %s5935_s12 }
 0x295   :  { %v1093_v0 = vpop.permute.xlu0 %1092 }
 0x296   :  { %v2073_v47 = vrot.slane %v1093_v0, 1 }
 0x29a   :  { %v1081_v40 = vpop.permute.xlu1 %1080  ;;  %v6538_v24 = vpop.permute.xlu0 %1112 }
 0x29b   :  { %v1985_v27 = vrot.slane %v1081_v40, 7  ;;  %v2165_v37 = vrot.slane %v6538_v24, 7  ;;  %v1237_v20 = vrot.slane %v1081_v40, 6 }
 0x29e   :  { %v1077_v25 = vpop.permute.xlu1 %1076  ;;  %v1109_v51 = vpop.permute.xlu0 %1108 }
 0x29f   :  { %v1983_v33 = vrot.slane %v1077_v25, 1  ;;  %v2163_v36 = vrot.slane %v1109_v51, 1 }
 0x2a2   :  { %v6540_v28 = vpop.permute.xlu1 %1096  ;;  %v1079_v29 = vpop.permute.xlu0 %1078 }
 0x2a3   :  { %v1984_v7 = vsel %vm1139_vm4, %v1079_v29, %v1983_v33  ;;  %v2075_v61 = vrot.slane %v6540_v28, 7  ;;  %v1235_v42 = vrot.slane %v1079_v29, 7 }
 0x2a4   :  { %v1986_v30 = vsel %vm1142_vm5, %v1985_v27, %v1984_v7 }
 0x2a5   :  { %v1236_v1 = vsel %vm1139_vm4, %v1235_v42, %v1077_v25 }
 0x2a6   :  { %v1085_v34 = vpop.permute.xlu1 %1084  ;;  %v1111_v39 = vpop.permute.xlu0 %1110  ;;  %v1238_v22 = vsel %vm1142_vm5, %v1237_v20, %v1236_v1 }
 0x2a7   :  { %v2164_v44 = vsel %vm1139_vm4, %v1111_v39, %v2163_v36  ;;  %v1989_v9 = vrot.slane %v1085_v34, 5  ;;  %v1241_v7 = vrot.slane %v1085_v34, 4 }
 0x2a8   :  { %v6547_v46 = vsel %vm1142_vm5, %v2165_v37, %v2164_v44  ;;  %v5735_v37 = vunpack.i.h.bf16 %v5733_v60  ;;  %v5734_v44 = vunpack.i.l.bf16 %v5733_v60  ;;  %v1327_v60 = vrot.slane %v6540_v28, 6 }
 0x2aa   :  { %v1095_v48 = vpop.permute.xlu1 %1094  ;;  %v1083_v49 = vpop.permute.xlu0 %1082 }
 0x2ab   :  { %v2074_v2 = vsel %vm1139_vm4, %v1095_v48, %v2073_v47  ;;  %v1987_v54 = vrot.slane %v1083_v49, 6  ;;  %v1239_v5 = vrot.slane %v1083_v49, 5  ;;  %v1325_v36 = vrot.slane %v1095_v48, 7 }
 0x2ac   :  { %v2076_v55 = vsel %vm1142_vm5, %v2075_v61, %v2074_v2  ;;  %v1415_v47 = vrot.slane %v1111_v39, 7  ;;  %v5377_v48 = vpack.c.bf16 %v5735_v37, %v5734_v44 }
 0x2ad   :  { %v1988_v56 = vsel %vm1145_vm6, %v1987_v54, %v1986_v30  ;;  %v1240_v29 = vsel %vm1145_vm6, %v1239_v5, %v1238_v22 }
 0x2ae   :  { %v1101_v58 = vpop.permute.xlu1 %1100  ;;  %v1990_v59 = vsel %vm1148_vm7, %v1989_v9, %v1988_v56  ;;  %v1087_v41 = vpop.permute.xlu0 %1086  ;;  %v1242_v25 = vsel %vm1148_vm7, %v1241_v7, %v1240_v29  ;;  %v1326_v56 = vsel %vm1139_vm4, %v1325_v36, %v1093_v0 }
 0x2af   :  { %v1991_v19 = vrot.slane %v1087_v41, 4  ;;  %v1243_v30 = vrot.slane %v1087_v41, 3  ;;  %v1331_v0 = vrot.slane %v1101_v58, 4  ;;  %v2079_v29 = vrot.slane %v1101_v58, 5 }
 0x2b0   :  { %v1328_v7 = vsel %vm1142_vm5, %v1327_v60, %v1326_v56  ;;  %v1417_v56 = vrot.slane %v6538_v24, 6 }
 0x2b1   :  { %v1992_v21 = vsel %vm1151_vm8, %v1991_v19, %v1990_v59  ;;  %v1244_v9 = vsel %vm1151_vm8, %v1243_v30, %v1242_v25  ;;  %v1416_v19 = vsel %vm1139_vm4, %v1415_v47, %v1109_v51 }
 0x2b2   :  { %v6557_v33 = vpop.permute.xlu1 %1116  ;;  %v1103_v27 = vpop.permute.xlu0 %1102 }
 0x2b3   :  { %v1333_v28 = vrot.slane %v1103_v27, 3  ;;  %v2081_v30 = vrot.slane %v1103_v27, 4  ;;  %v1421_v24 = vrot.slane %v6557_v33, 4 }
 0x2b6   :  { %v1089_v61 = vpop.permute.xlu1 %1088  ;;  %v1091_v49 = vpop.permute.xlu0 %1090 }
 0x2b7   :  { %v1245_v40 = vrot.slane %v1089_v61, 2  ;;  %v1993_v42 = vrot.slane %v1089_v61, 3  ;;  %v1247_v2 = vrot.slane %v1091_v49, 1  ;;  %v1995_v54 = vrot.slane %v1091_v49, 2 }
 0x2b9   :  { %v1246_v59 = vsel %vm1154_vm9, %v1245_v40, %v1244_v9  ;;  %v1994_v34 = vsel %vm1154_vm9, %v1993_v42, %v1992_v21  ;;  %v2169_v21 = vrot.slane %v6557_v33, 5 }
 0x2ba   :  { %v1099_v39 = vpop.permute.xlu1 %1098  ;;  %v1105_v41 = vpop.permute.xlu0 %1104  ;;  %v1248_v1 = vsel %vm1157_vm10, %v1247_v2, %v1246_v59  ;;  %v6568_v5 = vsel %vm1157_vm10, %v1995_v54, %v1994_v34 }
 0x2bb   :  { %v1329_v20 = vrot.slane %v1099_v39, 5  ;;  %v2077_v22 = vrot.slane %v1099_v39, 6  ;;  %4760 = vmatmul.mubr.msk.f32.vlgmr.msra.gmra.mrb[10].mxu1 %vm214_vm1, %v1248_v1  ;;  %v1335_v44 = vrot.slane %v1105_v41, 2  ;;  %v2083_v47 = vrot.slane %v1105_v41, 3 }
 0x2bc   :  { %5379 = vmatpush3.bf16.xpose.msk.msra.mxu1 %vm6387_vm2, %v5377_v48  ;;  %4773 = vmatprep.mubr.msk.f32.mxu1 %vm5936_vm3, %v5931_v4  ;;  %v1418_v41 = vsel %vm1142_vm5, %v1417_v56, %v1416_v19 }
 0x2bd   :  { %v1330_v51 = vsel %vm1145_vm6, %v1329_v20, %v1328_v7  ;;  %v2078_v36 = vsel %vm1145_vm6, %v2077_v22, %v2076_v55  ;;  %5383 = vmatprep.subr.bf16.mxu1 %v5932_v38 }
 0x2be   :  { %v1332_v58 = vsel %vm1148_vm7, %v1331_v0, %v1330_v51  ;;  %v2080_v37 = vsel %vm1148_vm7, %v2079_v29, %v2078_v36  ;;  %v1115_v25 = vpop.permute.xlu1 %1114  ;;  %v1107_v61 = vpop.permute.xlu0 %1106 }
 0x2bf   :  { %v1334_v49 = vsel %vm1151_vm8, %v1333_v28, %v1332_v58  ;;  %v2082_v40 = vsel %vm1151_vm8, %v2081_v30, %v2080_v37  ;;  %v1419_v42 = vrot.slane %v1115_v25, 5  ;;  %v2167_v27 = vrot.slane %v1115_v25, 6 }
 0x2c0   :  { %v1336_v2 = vsel %vm1154_vm9, %v1335_v44, %v1334_v49  ;;  %v2084_v55 = vsel %vm1154_vm9, %v2083_v47, %v2082_v40  ;;  %v1337_v54 = vrot.slane %v1107_v61, 1  ;;  %v2085_v9 = vrot.slane %v1107_v61, 2 }
 0x2c1   :  { %v2168_v59 = vsel %vm1145_vm6, %v2167_v27, %v6547_v46  ;;  %v1420_v20 = vsel %vm1145_vm6, %v1419_v42, %v1418_v41 }
 0x2c2   :  { %v1119_v34 = vpop.permute.xlu1 %1118  ;;  %v2170_v48 = vsel %vm1148_vm7, %v2169_v21, %v2168_v59  ;;  %v1338_v60 = vsel %vm1157_vm10, %v1337_v54, %v1336_v2  ;;  %v6593_v39 = vsel %vm1157_vm10, %v2085_v9, %v2084_v55  ;;  %v6607_v0 = vpop.permute.xlu0 %1122  ;;  %v1422_v29 = vsel %vm1148_vm7, %v1421_v24, %v1420_v20 }
 0x2c3   :  { %v2171_v1 = vrot.slane %v1119_v34, 4  ;;  %4767 = vmatmul.mubr.msk.f32.vlgmr.msra.gmra.mrb[16].mxu0 %vm214_vm1, %v1338_v60  ;;  %v1423_v22 = vrot.slane %v1119_v34, 3  ;;  %v1427_v63 = vrot.slane %v6607_v0, 1 }
 0x2c4   :  { %5382 = vmatpush3.bf16.msra.mxu0 %v5381_v8  ;;  %4780 = vmatprep.mubr.msk.f32.mxu0 %vm5936_vm3, %v5931_v4 }
 0x2c5   :  { %v6605_v46 = vsel %vm1151_vm8, %v2171_v1, %v2170_v48  ;;  %5386 = vmatprep.subr.bf16.mxu0 %v5932_v38  ;;  %v1424_v57 = vsel %vm1151_vm8, %v1423_v22, %v1422_v29 }
 0x2c6   :  { %v6610_v19 = vpop.permute.xlu1 %1120 }
 0x2c7   :  { %v1425_v21 = vrot.slane %v6610_v19, 2 }
 0x2c9   :  { %v1426_v8 = vsel %vm1154_vm9, %v1425_v21, %v1424_v57 }
 0x2ca   :  { %v1428_v33 = vsel %vm1157_vm10, %v1427_v63, %v1426_v8 }
 0x2cb   :  { %4774 = vmatmul.mubr.msk.f32.vlgmr.msra.gmra.mrb[12].mxu1 %vm214_vm1, %v1428_v33 }
 0x2cc   :  { %4787 = vmatprep.mubr.msk.f32.mxu1 %vm5936_vm3, %v5931_v4 }
 0x319   :  { %v1231_v7 = vpop.f32.mrb[14].mxu0 }
 0x31a   :  { %v4754_v28 = vpop.f32.mrb[15].mxu0  ;;  %v1506_v30 = vsel %vm1505_vm11, %v1231_v7, -inf }
 0x31b   :  { %1507 = vmax.xlane.f32.xlu1 %v1506_v30 }
 0x32c   :  { %5737 = vrot.lane.b32.xlu1 %v6405_v32, %s5933_s6 }
 0x38e   :  { %v1321_v51 = vpop.f32.mrb[10].mxu1 }
 0x38f   :  { %v4761_v36 = vpop.f32.mrb[11].mxu1  ;;  %v1509_v58 = vsel %vm1505_vm11, %v1321_v51, -inf }
 0x390   :  { %1510 = vmax.xlane.f32.xlu0 %v1509_v58 }
 0x396   :  { %v1411_v37 = vpop.f32.mrb[16].mxu0 }
 0x397   :  { %v4768_v44 = vpop.f32.mrb[17].mxu0  ;;  %v1512_v47 = vsel %vm1505_vm11, %v1411_v37, -inf }
 0x398   :  { %1513 = vmax.xlane.f32.xlu0 %v1512_v47 }
 0x39e   :  { %v1501_v25 = vpop.f32.mrb[12].mxu1 }
 0x39f   :  { %v4775_v61 = vpop.f32.mrb[13].mxu1  ;;  %v1515_v49 = vsel %vm1505_vm11, %v1501_v25, -inf }
 0x3a0   :  { %1516 = vmax.xlane.f32.xlu0 %v1515_v49 }
 0x3a8   :  { %v1508_v40 = vpop.xlane.xlu1 %1507 }
 0x3a9   :  { %v1518_v42 = vsub.f32 %v1231_v7, %v1508_v40 }
 0x3ab   :  { %v1522_v27 = vmul.f32 1.442695, %v1518_v42 }
 0x3ac   :  { %v5738_v2 = vpop.permute.xlu1 %5737 }
 0x3ad   :  { %5799 = vpow2.f32 %v1522_v27  ;;  %v5740_v55 = vunpack.i.h.bf16 %v5738_v2  ;;  %v5739_v54 = vunpack.i.l.bf16 %v5738_v2 }
 0x3af   :  { %v5384_v9 = vpack.c.bf16 %v5740_v55, %v5739_v54 }
 0x3b1   :  { %5385 = vmatpush3.bf16.msra.mxu1 %v5384_v9 }
 0x3b2   :  { %5389 = vmatprep.subr.bf16.mxu1 %v5932_v38 }
 0x3b7   :  { %v5800_v56 = vpop.eup %5799 }
 0x3b8   :  { %v1530_v59 = vsel %vm1505_vm11, %v5800_v56, 0.0 }
 0x3b9   :  { %1531 = vadd.xlane.f32.xlu1 %v1530_v59 }
 0x41d   :  { %v1511_v34 = vpop.xlane.xlu0 %1510 }
 0x41e   :  { %v1519_v48 = vsub.f32 %v1321_v51, %v1511_v34 }
 0x420   :  { %v1524_v60 = vmul.f32 1.442695, %v1519_v48 }
 0x422   :  { %5801 = vpow2.f32 %v1524_v60 }
 0x425   :  { %v1514_v41 = vpop.xlane.xlu0 %1513 }
 0x426   :  { %v1520_v1 = vsub.f32 %v1411_v37, %v1514_v41 }
 0x428   :  { %v1526_v20 = vmul.f32 1.442695, %v1520_v1 }
 0x42a   :  { %5803 = vpow2.f32 %v1526_v20 }
 0x42c   :  { %v5802_v22 = vpop.eup %5801 }
 0x42d   :  { %v1517_v24 = vpop.xlane.xlu0 %1516  ;;  %v1533_v29 = vsel %vm1505_vm11, %v5802_v22, 0.0 }
 0x42e   :  { %v1521_v21 = vsub.f32 %v1501_v25, %v1517_v24  ;;  %1534 = vadd.xlane.f32.xlu0 %v1533_v29 }
 0x430   :  { %v1528_v57 = vmul.f32 1.442695, %v1521_v21  ;;  %v2173_v21 = vrot.slane %v6610_v19, 3 }
 0x432   :  { %5805 = vpow2.f32 %v1528_v57  ;;  %v2174_v12 = vsel %vm1154_vm9, %v2173_v21, %v6605_v46 }
 0x434   :  { %v5804_v63 = vpop.eup %5803 }
 0x435   :  { %v1536_v8 = vsel %vm1505_vm11, %v5804_v63, 0.0 }
 0x436   :  { %1537 = vadd.xlane.f32.xlu1 %v1536_v8 }
 0x43c   :  { %v5806_v33 = vpop.eup %5805 }
 0x43d   :  { %v1539_v7 = vsel %vm1505_vm11, %v5806_v33, 0.0 }
 0x43e   :  { %1540 = vadd.xlane.f32.xlu0 %v1539_v7 }
 0x446   :  { %v1532_v28 = vpop.xlane.xlu1 %1531 }
 0x447   :  { %5807 = vrcp.f32 %v1532_v28  ;;  %5747 = vrot.lane.b32.xlu1 %v6405_v32, %s5935_s12 }
 0x44b   :  { %5752 = vrot.lane.b32.xlu1 %v6415_v16, %s5933_s6 }
 0x44f   :  { %5757 = vrot.lane.b32.xlu1 %v6415_v16, %s5934_s11 }
 0x451   :  { %v5808_v30 = vpop.eup %5807 }
 0x452   :  { %v1543_v51 = vmul.f32 %v5808_v30, %v5800_v56 }
 0x454   :  { %4781 = vmatmul.mubr.msk.f32.vlgmr.msra.gmra.mrb[18].mxu0 %vm1505_vm11, %v1543_v51  ;;  %5742 = vrot.lane.b32.xlu0 %v6405_v32, %s5934_s11 }
 0x455   :  { %4794 = vmatprep.mubr.msk.f32.mxu0 %vm5936_vm3, %v5931_v4 }
 0x458   :  { %5762 = vrot.lane.b32.xlu0 %v6415_v16, %s5935_s12 }
 0x4bb   :  { %v1535_v36 = vpop.xlane.xlu0 %1534 }
 0x4bc   :  { %5809 = vrcp.f32 %v1535_v36 }
 0x4c3   :  { %v1538_v58 = vpop.xlane.xlu1 %1537 }
 0x4c4   :  { %5811 = vrcp.f32 %v1538_v58 }
 0x4c6   :  { %v5810_v37 = vpop.eup %5809 }
 0x4c7   :  { %v1545_v44 = vmul.f32 %v5810_v37, %v5802_v22  ;;  %v5748_v47 = vpop.permute.xlu1 %5747 }
 0x4c8   :  { %v5750_v25 = vunpack.i.h.bf16 %v5748_v47  ;;  %v5749_v61 = vunpack.i.l.bf16 %v5748_v47 }
 0x4c9   :  { %4788 = vmatmul.mubr.msk.f32.vlgmr.msra.gmra.mrb[14].mxu1 %vm1505_vm11, %v1545_v44 }
 0x4ca   :  { %v5390_v49 = vpack.c.bf16 %v5750_v25, %v5749_v61  ;;  %4801 = vmatprep.mubr.msk.f32.mxu1 %vm5936_vm3, %v5931_v4 }
 0x4cb   :  { %v1541_v32 = vpop.xlane.xlu0 %1540  ;;  %v5753_v27 = vpop.permute.xlu1 %5752 }
 0x4cc   :  { %5391 = vmatpush3.bf16.msra.mxu1 %v5390_v49  ;;  %5813 = vrcp.f32 %v1541_v32  ;;  %v5755_v54 = vunpack.i.h.bf16 %v5753_v27  ;;  %v5754_v9 = vunpack.i.l.bf16 %v5753_v27 }
 0x4cd   :  { %5396 = vmatprep.subr.bf16.mxu1 %v5932_v38 }
 0x4ce   :  { %v5812_v2 = vpop.eup %5811  ;;  %v5397_v48 = vpack.c.bf16 %v5755_v54, %v5754_v9 }
 0x4cf   :  { %v5743_v16 = vpop.permute.xlu0 %5742  ;;  %v1547_v56 = vmul.f32 %v5812_v2, %v5804_v63  ;;  %v5758_v41 = vpop.permute.xlu1 %5757 }
 0x4d0   :  { %v5745_v40 = vunpack.i.h.bf16 %v5743_v16  ;;  %v5744_v42 = vunpack.i.l.bf16 %v5743_v16  ;;  %v5760_v22 = vunpack.i.h.bf16 %v5758_v41  ;;  %v5759_v24 = vunpack.i.l.bf16 %v5758_v41 }
 0x4d2   :  { %v5387_v55 = vpack.c.bf16 %v5745_v40, %v5744_v42  ;;  %v5401_v6 = vpack.c.bf16 %v5760_v22, %v5759_v24 }
 0x4d3   :  { %v5763_v60 = vpop.permute.xlu0 %5762 }
 0x4d4   :  { %5388 = vmatpush3.bf16.msra.mxu0 %v5387_v55  ;;  %v5765_v1 = vunpack.i.h.bf16 %v5763_v60  ;;  %v5764_v20 = vunpack.i.l.bf16 %v5763_v60 }
 0x4d5   :  { %5392 = vmatprep.subr.bf16.mxu0 %v5932_v38 }
 0x4d6   :  { %v5814_v59 = vpop.eup %5813  ;;  %v5405_v29 = vpack.c.bf16 %v5765_v1, %v5764_v20 }
 0x4d7   :  { %v1549_v34 = vmul.f32 %v5814_v59, %v5806_v33  ;;  %4795 = vmatmul.mubr.msk.f32.vlgmr.msra.gmra.mrb[20].mxu0 %vm1505_vm11, %v1547_v56 }
 0x4d8   :  { %4808 = vmatprep.mubr.msk.f32.mxu0 %vm5936_vm3, %v5931_v4 }
 0x4d9   :  { %4802 = vmatmul.mubr.msk.f32.vlgmr.msra.gmra.mrb[16].mxu1 %vm1505_vm11, %v1549_v34 }
 0x4da   :  { %5399 = vmatpush3.bf16.xpose.msk.msra.mxu1 %vm6387_vm2, %v5397_v48  ;;  %4815 = vmatprep.mubr.msk.f32.mxu1 %vm5936_vm3, %v5931_v4 }
 0x4db   :  { %5404 = vmatprep.subr.bf16.mxu1 %v5932_v38 }
 0x4dd   :  { %5395 = vmatpush3.bf16.xpose.msk.msra.mxu0 %vm6387_vm2, %v5393_v15  ;;  %v2175_v15 = vrot.slane %v6607_v0, 2 }
 0x4de   :  { %5400 = vmatprep.subr.bf16.mxu0 %v5932_v38 }
 0x4e1   :  { %4816 = vmatmul.mubr.msk.f32.vlgmr.msra.gmra.mrb[18].mxu1 %vm214_vm1, %v6568_v5  ;;  %v2176_v5 = vsel %vm1157_vm10, %v2175_v15, %v2174_v12 }
 0x4e2   :  { %5407 = vmatpush3.bf16.xpose.msk.msra.mxu1 %vm6387_vm2, %v5405_v29  ;;  %4829 = vmatprep.mubr.msk.f32.mxu1 %vm5936_vm3, %v5931_v4 }
 0x4e3   :  { %5411 = vmatprep.subr.bf16.mxu1 %v5932_v38 }
 0x4e4   :  { %4809 = vmatmul.mubr.msk.f32.vlgmr.msra.gmra.mrb[22].mxu0 %vm214_vm1, %v6521_v23 }
 0x4e5   :  { %5403 = vmatpush3.bf16.xpose.msk.msra.mxu0 %vm6387_vm2, %v5401_v6  ;;  %4822 = vmatprep.mubr.msk.f32.mxu0 %vm5936_vm3, %v5931_v4 }
 0x4e6   :  { %5408 = vmatprep.subr.bf16.mxu0 %v5932_v38 }
 0x4e9   :  { %4830 = vmatmul.mubr.msk.f32.vlgmr.msra.gmra.mrb[20].mxu1 %vm214_vm1, %v2176_v5 }
 0x4ea   :  { %4843 = vmatprep.mubr.msk.f32.mxu1 %vm5936_vm3, %v5931_v4 }
 0x4ec   :  { %4823 = vmatmul.mubr.msk.f32.vlgmr.msra.gmra.mrb[24].mxu0 %vm214_vm1, %v6593_v39 }
 0x4ed   :  { %5410 = vmatpush3.bf16.msra.mxu0 %v5409_v17  ;;  %4836 = vmatprep.mubr.msk.f32.mxu0 %vm5936_vm3, %v5931_v4 }
 0x4ee   :  { %5414 = vmatprep.subr.bf16.mxu0 %v5932_v38 }
 0x527   :  { %v6695_v3 = vpop.f32.mrb[18].mxu0 }
 0x528   :  { %v4782_v23 = vpop.f32.mrb[19].mxu0 }
 0x59c   :  { %v1700_v46 = vpop.f32.mrb[14].mxu1 }
 0x59d   :  { %v4789_v0 = vpop.f32.mrb[15].mxu1 }
 0x5aa   :  { %v1779_v19 = vpop.f32.mrb[20].mxu0 }
 0x5ab   :  { %v4796_v57 = vpop.f32.mrb[21].mxu0 }
 0x5ac   :  { %v6697_v63 = vpop.f32.mrb[16].mxu1 }
 0x5ad   :  { %v4803_v8 = vpop.f32.mrb[17].mxu1 }
 0x5b4   :  { %v2069_v39 = vpop.f32.mrb[18].mxu1 }
 0x5b5   :  { %v4817_v33 = vpop.f32.mrb[19].mxu1  ;;  %v2256_v58 = vsel %vm1505_vm11, %v2069_v39, -inf }
 0x5b7   :  { %v1979_v7 = vpop.f32.mrb[22].mxu0 }
 0x5b8   :  { %v4810_v10 = vpop.f32.mrb[23].mxu0  ;;  %v2253_v14 = vsel %vm1505_vm11, %v1979_v7, -inf }
 0x5b9   :  { %2254 = vmax.xlane.f32.xlu1 %v2253_v14 }
 0x5bc   :  { %v2249_v17 = vpop.f32.mrb[20].mxu1 }
 0x5bd   :  { %v4831_v28 = vpop.f32.mrb[21].mxu1  ;;  %v2262_v37 = vsel %vm1505_vm11, %v2249_v17, -inf }
 0x5bf   :  { %v2159_v30 = vpop.f32.mrb[24].mxu0 }
 0x5c0   :  { %v4824_v51 = vpop.f32.mrb[25].mxu0  ;;  %v2259_v36 = vsel %vm1505_vm11, %v2159_v30, -inf }
 0x5c1   :  { %2260 = vmax.xlane.f32.xlu0 %v2259_v36  ;;  %v2782_v51 = vld [vmem:[#allocation2 + $0x8] sm:$0xff]  ;;  %v2797_v36 = vld [vmem:[#allocation2 + $0x80] sm:$0xff] }
 0x5c5   :  { %2257 = vmax.xlane.f32.xlu0 %v2256_v58 }
 0x5c9   :  { %2263 = vmax.xlane.f32.xlu0 %v2262_v37  ;;  %v2798_v37 = vld [vmem:[#allocation2 + $0x88] sm:$0xff] }
 0x5ca   :  { %5767 = vrot.lane.b32.xlu1 %v6421_v18, %s5933_s6 }
 0x646   :  { %v2255_v44 = vpop.xlane.xlu1 %2254 }
 0x647   :  { %v2265_v47 = vsub.f32 %v1979_v7, %v2255_v44  ;;  %v2783_v44 = vld [vmem:[#allocation2 + $0x10] sm:$0xff] }
 0x649   :  { %v2269_v25 = vmul.f32 1.442695, %v2265_v47  ;;  %v2784_v47 = vld [vmem:[#allocation2 + $0x18] sm:$0xff] }
 0x64a   :  { %v5768_v61 = vpop.permute.xlu1 %5767 }
 0x64b   :  { %5815 = vpow2.f32 %v2269_v25  ;;  %v5770_v49 = vunpack.i.h.bf16 %v5768_v61  ;;  %v5769_v32 = vunpack.i.l.bf16 %v5768_v61  ;;  %v5445_v25 = vpack.c.bf16 %v2798_v37, %v2797_v36  ;;  %v2799_v61 = vld [vmem:[#allocation2 + $0x90] sm:$0xff] }
 0x64c   :  { %v2811_v37 = vld [vmem:[#allocation2 + $0xf0] sm:$0xff] }
 0x64d   :  { %v5412_v16 = vpack.c.bf16 %v5770_v49, %v5769_v32  ;;  %v2800_v49 = vld [vmem:[#allocation2 + $0x98] sm:$0xff]  ;;  %v5424_v32 = vpack.c.bf16 %v2784_v47, %v2783_v44 }
 0x64e   :  { %v2261_v40 = vpop.xlane.xlu0 %2260  ;;  %v2812_v44 = vld [vmem:[#allocation2 + $0xf8] sm:$0xff] }
 0x64f   :  { %v2267_v42 = vsub.f32 %v2159_v30, %v2261_v40  ;;  %5413 = vmatpush3.bf16.msra.mxu1 %v5412_v16  ;;  %v2781_v30 = vld [vmem:[#allocation2] sm:$0xff]  ;;  %v5448_v16 = vpack.c.bf16 %v2800_v49, %v2799_v61  ;;  %v5466_v47 = vpack.c.bf16 %v2812_v44, %v2811_v37 }
 0x650   :  { %5417 = vmatprep.subr.bf16.mxu1 %v5932_v38  ;;  %v5421_v58 = vpack.c.bf16 %v2782_v51, %v2781_v30  ;;  %v2785_v40 = vld [vmem:[#allocation2 + $0x20] sm:$0xff]  ;;  %v2796_v30 = vld [vmem:[#allocation2 + $0x78] sm:$0xff] }
 0x651   :  { %v2273_v27 = vmul.f32 1.442695, %v2267_v42  ;;  %v2786_v42 = vld [vmem:[#allocation2 + $0x28] sm:$0xff] }
 0x652   :  { %v2258_v2 = vpop.xlane.xlu0 %2257 }
 0x653   :  { %5817 = vpow2.f32 %v2273_v27  ;;  %v2266_v55 = vsub.f32 %v2069_v39, %v2258_v2  ;;  %v2801_v27 = vld [vmem:[#allocation2 + $0xa0] sm:$0xff]  ;;  %v2802_v2 = vld [vmem:[#allocation2 + $0xa8] sm:$0xff] }
 0x655   :  { %v5816_v54 = vpop.eup %5815  ;;  %v2271_v9 = vmul.f32 1.442695, %v2266_v55  ;;  %v5427_v55 = vpack.c.bf16 %v2786_v42, %v2785_v40 }
 0x656   :  { %v2264_v56 = vpop.xlane.xlu0 %2263  ;;  %v2277_v59 = vsel %vm1505_vm11, %v5816_v54, 0.0 }
 0x657   :  { %5819 = vpow2.f32 %v2271_v9  ;;  %v2268_v34 = vsub.f32 %v2249_v17, %v2264_v56  ;;  %2278 = vadd.xlane.f32.xlu1 %v2277_v59  ;;  %v2787_v9 = vld [vmem:[#allocation2 + $0x30] sm:$0xff]  ;;  %v2788_v56 = vld [vmem:[#allocation2 + $0x38] sm:$0xff] }
 0x658   :  { %v5430_v59 = vpack.c.bf16 %v2788_v56, %v2787_v9 }
 0x659   :  { %v2275_v48 = vmul.f32 1.442695, %v2268_v34 }
 0x65b   :  { %5821 = vpow2.f32 %v2275_v48 }
 0x65d   :  { %v5818_v60 = vpop.eup %5817 }
 0x65e   :  { %v2283_v41 = vsel %vm1505_vm11, %v5818_v60, 0.0 }
 0x65f   :  { %2284 = vadd.xlane.f32.xlu1 %v2283_v41  ;;  %v2804_v41 = vld [vmem:[#allocation2 + $0xb8] sm:$0xff] }
 0x661   :  { %v5820_v1 = vpop.eup %5819 }
 0x662   :  { %v2280_v20 = vsel %vm1505_vm11, %v5820_v1, 0.0 }
 0x663   :  { %2281 = vadd.xlane.f32.xlu0 %v2280_v20 }
 0x665   :  { %v5822_v22 = vpop.eup %5821 }
 0x666   :  { %v2286_v24 = vsel %vm1505_vm11, %v5822_v22, 0.0 }
 0x667   :  { %2287 = vadd.xlane.f32.xlu0 %v2286_v24 }
 0x670   :  { %5777 = vrot.lane.b32.xlu1 %v6421_v18, %s5935_s12 }
 0x67d   :  { %5772 = vrot.lane.b32.xlu0 %v6421_v18, %s5934_s11 }
 0x681   :  { %1863 = vrot.lane.b32.xlu0 %v1700_v46, %s5935_s12 }
 0x685   :  { %1867 = vrot.lane.b32.xlu0 %v1779_v19, %s5934_s11 }
 0x6e4   :  { %v2279_v29 = vpop.xlane.xlu1 %2278 }
 0x6e5   :  { %5823 = vrcp.f32 %v2279_v29  ;;  %v2805_v29 = vld [vmem:[#allocation2 + $0xc0] sm:$0xff] }
 0x6ec   :  { %v2285_v21 = vpop.xlane.xlu1 %2284 }
 0x6ed   :  { %5825 = vrcp.f32 %v2285_v21  ;;  %v2806_v21 = vld [vmem:[#allocation2 + $0xc8] sm:$0xff] }
 0x6ef   :  { %v5824_v6 = vpop.eup %5823 }
 0x6f0   :  { %v2290_v12 = vmul.f32 %v5824_v6, %v5816_v54  ;;  %v2282_v15 = vpop.xlane.xlu0 %2281  ;;  %v5778_v18 = vpop.permute.xlu1 %5777  ;;  %v5451_v54 = vpack.c.bf16 %v2802_v2, %v2801_v27  ;;  %v5457_v6 = vpack.c.bf16 %v2806_v21, %v2805_v29  ;;  %v2830_v29 = vld [vmem:[#allocation2 + $0x188] sm:$0xff]  ;;  %v2815_v21 = vld [vmem:[#allocation2 + $0x110] sm:$0xff] }
 0x6f1   :  { %5827 = vrcp.f32 %v2282_v15  ;;  %v5780_v46 = vunpack.i.h.bf16 %v5778_v18  ;;  %v5779_v0 = vunpack.i.l.bf16 %v5778_v18  ;;  %v2792_v15 = vld [vmem:[#allocation2 + $0x58] sm:$0xff]  ;;  %v2807_v18 = vld [vmem:[#allocation2 + $0xd0] sm:$0xff] }
 0x6f2   :  { %4837 = vmatmul.mubr.msk.f32.vlgmr.msra.gmra.mrb[26].mxu0 %vm1505_vm11, %v2290_v12  ;;  %v2791_v12 = vld [vmem:[#allocation2 + $0x50] sm:$0xff] }
 0x6f3   :  { %4850 = vmatprep.mubr.msk.f32.mxu0 %vm5936_vm3, %v5931_v4  ;;  %v5418_v10 = vpack.c.bf16 %v5780_v46, %v5779_v0  ;;  %v2793_v0 = vld [vmem:[#allocation2 + $0x60] sm:$0xff] }
 0x6f4   :  { %v2288_v5 = vpop.xlane.xlu0 %2287 }
 0x6f5   :  { %5829 = vrcp.f32 %v2288_v5  ;;  %v5436_v5 = vpack.c.bf16 %v2792_v15, %v2791_v12 }
 0x6f7   :  { %v5826_v8 = vpop.eup %5825 }
 0x6f8   :  { %v5773_v23 = vpop.permute.xlu0 %5772  ;;  %v2294_v14 = vmul.f32 %v5826_v8, %v5818_v60  ;;  %v2803_v60 = vld [vmem:[#allocation2 + $0xb0] sm:$0xff] }
 0x6f9   :  { %v5775_v19 = vunpack.i.h.bf16 %v5773_v23  ;;  %v5774_v57 = vunpack.i.l.bf16 %v5773_v23  ;;  %v5454_v20 = vpack.c.bf16 %v2804_v41, %v2803_v60  ;;  %v2808_v23 = vld [vmem:[#allocation2 + $0xd8] sm:$0xff] }
 0x6fa   :  { %v5460_v46 = vpack.c.bf16 %v2808_v23, %v2807_v18 }
 0x6fb   :  { %v5828_v39 = vpop.eup %5827  ;;  %v5415_v33 = vpack.c.bf16 %v5775_v19, %v5774_v57  ;;  %v2794_v19 = vld [vmem:[#allocation2 + $0x68] sm:$0xff] }
 0x6fc   :  { %v2292_v7 = vmul.f32 %v5828_v39, %v5820_v1  ;;  %v2789_v1 = vld [vmem:[#allocation2 + $0x40] sm:$0xff]  ;;  %v5439_v8 = vpack.c.bf16 %v2794_v19, %v2793_v0 }
 0x6fd   :  { %5416 = vmatpush3.bf16.msra.mxu0 %v5415_v33  ;;  %v2809_v33 = vld [vmem:[#allocation2 + $0xe0] sm:$0xff] }
 0x6fe   :  { %4844 = vmatmul.mubr.msk.f32.vlgmr.msra.gmra.mrb[22].mxu1 %vm1505_vm11, %v2292_v7  ;;  %5420 = vmatprep.subr.bf16.mxu0 %v5932_v38  ;;  %v2810_v7 = vld [vmem:[#allocation2 + $0xe8] sm:$0xff] }
 0x6ff   :  { %v5830_v17 = vpop.eup %5829  ;;  %5419 = vmatpush3.bf16.msra.mxu1 %v5418_v10  ;;  %4857 = vmatprep.mubr.msk.f32.mxu1 %vm5936_vm3, %v5931_v4 }
 0x700   :  { %v2296_v28 = vmul.f32 %v5830_v17, %v5822_v22  ;;  %4851 = vmatmul.mubr.msk.f32.vlgmr.msra.gmra.mrb[28].mxu0 %vm1505_vm11, %v2294_v14  ;;  %5444 = vmatprep.subr.bf16.mxu1 %v5932_v38  ;;  %v2790_v22 = vld [vmem:[#allocation2 + $0x48] sm:$0xff]  ;;  %v5463_v14 = vpack.c.bf16 %v2810_v7, %v2809_v33 }
 0x701   :  { %4892 = vmatprep.mubr.msk.f32.mxu0 %vm5936_vm3, %v5931_v4  ;;  %5422 = vmatpush3.bf16.msra.mxu0 %v5421_v58  ;;  %v5433_v24 = vpack.c.bf16 %v2790_v22, %v2789_v1  ;;  %v2829_v22 = vld [vmem:[#allocation2 + $0x180] sm:$0xff] }
 0x702   :  { %4858 = vmatmul.mubr.msk.f32.vlgmr.msra.gmra.mrb[24].mxu1 %vm1505_vm11, %v2296_v28  ;;  %5423 = vmatprep.subr.bf16.mxu0 %v5932_v38  ;;  %v2795_v28 = vld [vmem:[#allocation2 + $0x70] sm:$0xff] }
 0x703   :  { %4927 = vmatprep.mubr.msk.f32.mxu1 %vm5936_vm3, %v5931_v4  ;;  %5446 = vmatpush3.bf16.msra.mxu1 %v5445_v25  ;;  %v5442_v36 = vpack.c.bf16 %v2796_v30, %v2795_v28  ;;  %v5937_v25 = vmov 1966171168  }
 0x704   :  { %5447 = vmatprep.subr.bf16.mxu1 %v5932_v38  ;;  %v2627_v61 = vunpack.c.l.s4 %v5937_v25  ;;  %v2832_v25 = vld [vmem:[#allocation2 + $0x198] sm:$0xff] }
 0x705   :  { %5425 = vmatpush3.bf16.msra.mxu0 %v5424_v32 }
 0x706   :  { %5426 = vmatprep.subr.bf16.mxu0 %v5932_v38  ;;  %v2628_v32 = vunpack.c.0.s8 %v2627_v61 }
 0x707   :  { %5449 = vmatpush3.bf16.msra.mxu1 %v5448_v16  ;;  %v1864_v16 = vpop.permute.xlu0 %1863 }
 0x708   :  { %5450 = vmatprep.subr.bf16.mxu1 %v5932_v38  ;;  %v2631_v27 = vsub.s32 %v2628_v32, %v6368_v52  ;;  %v2814_v52 = vld [vmem:[#allocation2 + $0x108] sm:$0xff] }
 0x709   :  { %5428 = vmatpush3.bf16.msra.mxu0 %v5427_v55 }
 0x70a   :  { %5429 = vmatprep.subr.bf16.mxu0 %v5932_v38 }
 0x70b   :  { %5452 = vmatpush3.bf16.msra.mxu1 %v5451_v54  ;;  %v1868_v54 = vpop.permute.xlu0 %1867 }
 0x70c   :  { %5453 = vmatprep.subr.bf16.mxu1 %v5932_v38 }
 0x70d   :  { %5431 = vmatpush3.bf16.msra.mxu0 %v5430_v59  ;;  %v1874_v59 = vsel %vm214_vm1, %v6695_v3, %v1864_v16 }
 0x70e   :  { %5432 = vmatprep.subr.bf16.mxu0 %v5932_v38 }
 0x70f   :  { %5455 = vmatpush3.bf16.msra.mxu1 %v5454_v20  ;;  %v2813_v20 = vld [vmem:[#allocation2 + $0x100] sm:$0xff] }
 0x710   :  { %5456 = vmatprep.subr.bf16.mxu1 %v5932_v38 }
 0x711   :  { %5434 = vmatpush3.bf16.msra.mxu0 %v5433_v24 }
 0x712   :  { %5435 = vmatprep.subr.bf16.mxu0 %v5932_v38 }
 0x713   :  { %5458 = vmatpush3.bf16.msra.mxu1 %v5457_v6  ;;  %v2816_v6 = vld [vmem:[#allocation2 + $0x118] sm:$0xff] }
 0x714   :  { %5459 = vmatprep.subr.bf16.mxu1 %v5932_v38 }
 0x715   :  { %5437 = vmatpush3.bf16.msra.mxu0 %v5436_v5 }
 0x716   :  { %5438 = vmatprep.subr.bf16.mxu0 %v5932_v38 }
 0x717   :  { %5461 = vmatpush3.bf16.msra.mxu1 %v5460_v46  ;;  %v5469_v46 = vpack.c.bf16 %v2814_v52, %v2813_v20 }
 0x718   :  { %5462 = vmatprep.subr.bf16.mxu1 %v5932_v38 }
 0x719   :  { %5440 = vmatpush3.bf16.msra.mxu0 %v5439_v8  ;;  %v5472_v8 = vpack.c.bf16 %v2816_v6, %v2815_v21  ;;  %v2835_v21 = vld [vmem:[#allocation2 + $0x1b0] sm:$0xff]  ;;  %v2836_v6 = vld [vmem:[#allocation2 + $0x1b8] sm:$0xff] }
 0x71a   :  { %5441 = vmatprep.subr.bf16.mxu0 %v5932_v38 }
 0x71b   :  { %5464 = vmatpush3.bf16.msra.mxu1 %v5463_v14 }
 0x71c   :  { %5465 = vmatprep.subr.bf16.mxu1 %v5932_v38 }
 0x71d   :  { %5443 = vmatpush3.bf16.msra.mxu0 %v5442_v36 }
 0x71e   :  { %5468 = vmatprep.subr.bf16.mxu0 %v5932_v38 }
 0x71f   :  { %5467 = vmatpush3.bf16.msra.mxu1 %v5466_v47  ;;  %v2831_v47 = vld [vmem:[#allocation2 + $0x190] sm:$0xff] }
 0x720   :  { %5492 = vmatprep.subr.bf16.mxu1 %v5932_v38 }
 0x7c5   :  { %v6737_v34 = vpop.f32.mrb[26].mxu0 }
 0x7c6   :  { %v4838_v48 = vpop.f32.mrb[27].mxu0 }
 0x7c7   :  { %v1876_v48 = vsel %vm1875_vm13, %v1874_v59, %v1868_v54  ;;  %v2818_v59 = vld [vmem:[#allocation2 + $0x128] sm:$0xff] }
 0x7d1   :  { %v2447_v57 = vpop.f32.mrb[22].mxu1 }
 0x7d2   :  { %v4845_v39 = vpop.f32.mrb[23].mxu1 }
 0x7d3   :  { %v2526_v10 = vpop.f32.mrb[28].mxu0 }
 0x7d4   :  { %2614 = vrot.lane.b32.xlu1 %v2526_v10, %s5934_s11  ;;  %v4852_v17 = vpop.f32.mrb[29].mxu0 }
 0x7d5   :  { %v2605_v51 = vpop.f32.mrb[24].mxu1 }
 0x7d6   :  { %v4859_v58 = vpop.f32.mrb[25].mxu1 }
 0x7d8   :  { %2610 = vrot.lane.b32.xlu1 %v2447_v57, %s5935_s12  ;;  %v5493_v57 = vpack.c.bf16 %v2830_v29, %v2829_v22  ;;  %v2820_v29 = vld [vmem:[#allocation2 + $0x138] sm:$0xff] }
 0x7dc   :  { %2618 = vrot.lane.b32.xlu1 %v2605_v51, %s5933_s6 }
 0x7e0   :  { %1871 = vrot.lane.b32.xlu1 %v6697_v63, %s5933_s6 }
 0x846   :  { %v2615_v49 = vpop.permute.xlu1 %2614 }
 0x84a   :  { %v2611_v40 = vpop.permute.xlu1 %2610 }
 0x84b   :  { %v2621_v42 = vsel %vm214_vm1, %v6737_v34, %v2611_v40 }
 0x84c   :  { %v2622_v2 = vsel %vm1875_vm13, %v2621_v42, %v2615_v49 }
 0x84e   :  { %v2619_v55 = vpop.permute.xlu1 %2618 }
 0x84f   :  { %v2623_v9 = vsel %vm1877_vm12, %v2622_v2, %v2619_v55 }
 0x850   :  { %v2683_v63 = vcombine.high %v2623_v9, %v2623_v9  ;;  %v2690_v56 = vrot.slane %v2623_v9, %v2631_v27 }
 0x852   :  { %v2697_v60 = vrot.slane %v2683_v63, %v2631_v27  ;;  %v2698_v41 = vcombine.high %v2690_v56, %v2690_v56  ;;  %v2706_v34 = vrot.slane %v2690_v56, %v2631_v27  ;;  %v1872_v1 = vpop.permute.xlu1 %1871  ;;  %v5496_v63 = vpack.c.bf16 %v2832_v25, %v2831_v47  ;;  %v2817_v56 = vld [vmem:[#allocation2 + $0x120] sm:$0xff] }
 0x853   :  { %v1878_v24 = vsel %vm1877_vm12, %v1876_v48, %v1872_v1  ;;  %v5475_v52 = vpack.c.bf16 %v2818_v59, %v2817_v56  ;;  %v2864_v56 = vld [vmem:[#allocation2 + $0x298] sm:$0xff] }
 0x854   :  { %v2699_v12 = vcombine.high %v2697_v60, %v2697_v60  ;;  %v2713_v15 = vrot.slane %v2697_v60, %v2631_v27  ;;  %v2720_v5 = vrot.slane %v2698_v41, %v2631_v27  ;;  %v2728_v18 = vcombine.high %v2706_v34, %v2706_v34  ;;  %v2833_v41 = vld [vmem:[#allocation2 + $0x1a0] sm:$0xff] }
 0x855   :  { %v2625_v23 = vcombine.high %v1878_v24, %v1878_v24  ;;  %v2632_v3 = vrot.slane %v1878_v24, %v2631_v27  ;;  %v2735_v39 = vrot.slane %v2706_v34, %v6374_v53  ;;  %v2834_v34 = vld [vmem:[#allocation2 + $0x1a8] sm:$0xff]  ;;  %v2819_v24 = vld [vmem:[#allocation2 + $0x130] sm:$0xff] }
 0x856   :  { %v2727_v0 = vrot.slane %v2699_v12, %v2631_v27  ;;  %v2730_v19 = vcombine.high %v2720_v5, %v2720_v5  ;;  %v2729_v14 = vcombine.high %v2713_v15, %v2713_v15  ;;  %v2739_v17 = vrot.slane %v2720_v5, %v6374_v53  ;;  %v2821_v5 = vld [vmem:[#allocation2 + $0x140] sm:$0xff] }
 0x857   :  { %v2639_v33 = vrot.slane %v2625_v23, %v2631_v27  ;;  %v2640_v7 = vcombine.high %v2632_v3, %v2632_v3  ;;  %v2648_v10 = vrot.slane %v2632_v3, %v2631_v27  ;;  %v2743_v28 = vrot.slane %v2728_v18, %v6374_v53  ;;  %v2822_v18 = vld [vmem:[#allocation2 + $0x148] sm:$0xff]  ;;  %v2837_v23 = vld [vmem:[#allocation2 + $0x1c0] sm:$0xff] }
 0x858   :  { %v2751_v30 = vrot.slane %v2713_v15, %v6374_v53  ;;  %v2747_v61 = vrot.slane %v2730_v19, %v6374_v53  ;;  %v2755_v49 = vrot.slane %v2727_v0, %v6374_v53  ;;  %v2731_v32 = vcombine.high %v2727_v0, %v2727_v0  ;;  %v2838_v3 = vld [vmem:[#allocation2 + $0x1c8] sm:$0xff]  ;;  %v2823_v19 = vld [vmem:[#allocation2 + $0x150] sm:$0xff] }
 0x859   :  { %v2641_v51 = vcombine.high %v2639_v33, %v2639_v33  ;;  %v2655_v36 = vrot.slane %v2639_v33, %v2631_v27  ;;  %v2662_v58 = vrot.slane %v2640_v7, %v2631_v27  ;;  %v2670_v37 = vcombine.high %v2648_v10, %v2648_v10 }
 0x85a   :  { %v2773_v44 = vsel %vm2772_vm14, %v2648_v10, %v2735_v39  ;;  %v2759_v9 = vrot.slane %v2729_v14, %v6374_v53  ;;  %v2763_v60 = vrot.slane %v2731_v32, %v6374_v53  ;;  %v5499_v22 = vpack.c.bf16 %v2834_v34, %v2833_v41  ;;  %v2840_v39 = vld [vmem:[#allocation2 + $0x1d8] sm:$0xff]  ;;  %v2825_v10 = vld [vmem:[#allocation2 + $0x160] sm:$0xff]  ;;  %v2826_v14 = vld [vmem:[#allocation2 + $0x168] sm:$0xff] }
 0x85b   :  { %4893 = vmatmul.mubr.f32.vlgmr.msra.gmra.mrb[30].mxu0 %v2773_v44  ;;  %v2774_v16 = vsel %vm2772_vm14, %v2662_v58, %v2739_v17  ;;  %v6771_v40 = vsel %vm2772_vm14, %v2670_v37, %v2743_v28  ;;  %v2672_v42 = vcombine.high %v2662_v58, %v2662_v58  ;;  %v6774_v2 = vsel %vm2772_vm14, %v2655_v36, %v2751_v30  ;;  %v2841_v17 = vld [vmem:[#allocation2 + $0x1e0] sm:$0xff]  ;;  %v2842_v28 = vld [vmem:[#allocation2 + $0x1e8] sm:$0xff]  ;;  %v2828_v58 = vld [vmem:[#allocation2 + $0x178] sm:$0xff] }
 0x85c   :  { %5470 = vmatpush3.bf16.msra.mxu0 %v5469_v46  ;;  %4928 = vmatmul.mubr.f32.vlgmr.msra.gmra.mrb[26].mxu1 %v2774_v16  ;;  %v2669_v55 = vrot.slane %v2641_v51, %v2631_v27  ;;  %v2671_v54 = vcombine.high %v2655_v36, %v2655_v36  ;;  %v5478_v12 = vpack.c.bf16 %v2820_v29, %v2819_v24  ;;  %v2827_v36 = vld [vmem:[#allocation2 + $0x170] sm:$0xff]  ;;  %v2844_v44 = vld [vmem:[#allocation2 + $0x1f8] sm:$0xff]  ;;  %v2861_v32 = vld [vmem:[#allocation2 + $0x280] sm:$0xff] }
 0x85d   :  { %5494 = vmatpush3.bf16.msra.mxu1 %v5493_v57  ;;  %5471 = vmatprep.subr.bf16.mxu0 %v5932_v38  ;;  %v6779_v48 = vsel %vm2772_vm14, %v2672_v42, %v2747_v61  ;;  %v5502_v15 = vpack.c.bf16 %v2836_v6, %v2835_v21  ;;  %v5481_v46 = vpack.c.bf16 %v2822_v18, %v2821_v5  ;;  %v2824_v57 = vld [vmem:[#allocation2 + $0x158] sm:$0xff]  ;;  %v2843_v37 = vld [vmem:[#allocation2 + $0x1f0] sm:$0xff]  ;;  %v2845_v61 = vld [vmem:[#allocation2 + $0x200] sm:$0xff] }
 0x85e   :  { %5495 = vmatprep.subr.bf16.mxu1 %v5932_v38  ;;  %4962 = vmatprep.mubr.msk.f32.mxu0 %vm5936_vm3, %v5931_v4  ;;  %v6786_v27 = vsel %vm2772_vm14, %v2669_v55, %v2755_v49  ;;  %v6789_v1 = vsel %vm2772_vm14, %v2671_v54, %v2759_v9  ;;  %v2673_v20 = vcombine.high %v2669_v55, %v2669_v55  ;;  %v2846_v49 = vld [vmem:[#allocation2 + $0x208] sm:$0xff]  ;;  %v2847_v54 = vld [vmem:[#allocation2 + $0x210] sm:$0xff]  ;;  %v2848_v9 = vld [vmem:[#allocation2 + $0x218] sm:$0xff] }
 0x85f   :  { %4997 = vmatprep.mubr.msk.f32.mxu1 %vm5936_vm3, %v5931_v4  ;;  %v5505_v0 = vpack.c.bf16 %v2838_v3, %v2837_v23  ;;  %v5484_v33 = vpack.c.bf16 %v2824_v57, %v2823_v19  ;;  %v5487_v30 = vpack.c.bf16 %v2826_v14, %v2825_v10  ;;  %v5511_v51 = vpack.c.bf16 %v2842_v28, %v2841_v17  ;;  %v2862_v16 = vld [vmem:[#allocation2 + $0x288] sm:$0xff]  ;;  %v2849_v41 = vld [vmem:[#allocation2 + $0x220] sm:$0xff]  ;;  %v2852_v24 = vld [vmem:[#allocation2 + $0x238] sm:$0xff] }
 0x860   :  { %5473 = vmatpush3.bf16.msra.mxu0 %v5472_v8  ;;  %v6794_v53 = vsel %vm2772_vm14, %v2673_v20, %v2763_v60  ;;  %v2839_v8 = vld [vmem:[#allocation2 + $0x1d0] sm:$0xff]  ;;  %v5490_v47 = vpack.c.bf16 %v2828_v58, %v2827_v36  ;;  %v5514_v25 = vpack.c.bf16 %v2844_v44, %v2843_v37  ;;  %v5517_v42 = vpack.c.bf16 %v2846_v49, %v2845_v61  ;;  %v2850_v34 = vld [vmem:[#allocation2 + $0x228] sm:$0xff]  ;;  %v2865_v20 = vld [vmem:[#allocation2 + $0x2a0] sm:$0xff] }
 0x861   :  { %5497 = vmatpush3.bf16.msra.mxu1 %v5496_v63  ;;  %5474 = vmatprep.subr.bf16.mxu0 %v5932_v38  ;;  %v5508_v7 = vpack.c.bf16 %v2840_v39, %v2839_v8  ;;  %v5541_v55 = vpack.c.bf16 %v2862_v16, %v2861_v32  ;;  %v2863_v63 = vld [vmem:[#allocation2 + $0x290] sm:$0xff]  ;;  %v5520_v59 = vpack.c.bf16 %v2848_v9, %v2847_v54  ;;  %v2868_v21 = vld [vmem:[#allocation2 + $0x2b8] sm:$0xff]  ;;  %v2854_v5 = vld [vmem:[#allocation2 + $0x248] sm:$0xff] }
 0x862   :  { %5498 = vmatprep.subr.bf16.mxu1 %v5932_v38  ;;  %v5544_v60 = vpack.c.bf16 %v2864_v56, %v2863_v63  ;;  %v2867_v29 = vld [vmem:[#allocation2 + $0x2b0] sm:$0xff]  ;;  %v2869_v18 = vld [vmem:[#allocation2 + $0x2c0] sm:$0xff]  ;;  %v2870_v23 = vld [vmem:[#allocation2 + $0x2c8] sm:$0xff] }
 0x863   :  { %v2856_v19 = vld [vmem:[#allocation2 + $0x258] sm:$0xff]  ;;  %v2871_v57 = vld [vmem:[#allocation2 + $0x2d0] sm:$0xff]  ;;  %v2858_v10 = vld [vmem:[#allocation2 + $0x268] sm:$0xff] }
 0x864   :  { %5476 = vmatpush3.bf16.msra.mxu0 %v5475_v52  ;;  %v2866_v52 = vld [vmem:[#allocation2 + $0x2a8] sm:$0xff]  ;;  %v2872_v8 = vld [vmem:[#allocation2 + $0x2d8] sm:$0xff]  ;;  %v2873_v14 = vld [vmem:[#allocation2 + $0x2e0] sm:$0xff] }
 0x865   :  { %5500 = vmatpush3.bf16.msra.mxu1 %v5499_v22  ;;  %5477 = vmatprep.subr.bf16.mxu0 %v5932_v38  ;;  %v2851_v22 = vld [vmem:[#allocation2 + $0x230] sm:$0xff]  ;;  %v2874_v17 = vld [vmem:[#allocation2 + $0x2e8] sm:$0xff]  ;;  %v2860_v36 = vld [vmem:[#allocation2 + $0x278] sm:$0xff] }
 0x866   :  { %5501 = vmatprep.subr.bf16.mxu1 %v5932_v38  ;;  %v5526_v6 = vpack.c.bf16 %v2852_v24, %v2851_v22  ;;  %v2875_v58 = vld [vmem:[#allocation2 + $0x2f0] sm:$0xff]  ;;  %v2876_v37 = vld [vmem:[#allocation2 + $0x2f8] sm:$0xff]  ;;  %v2878_v61 = vld [vmem:[#allocation2 + $0x308] sm:$0xff] }
 0x867   :  { %v2893_v49 = vld [vmem:[#allocation2 + $0x380] sm:$0xff]  ;;  %v2894_v32 = vld [vmem:[#allocation2 + $0x388] sm:$0xff]  ;;  %v2880_v54 = vld [vmem:[#allocation2 + $0x318] sm:$0xff] }
 0x868   :  { %5479 = vmatpush3.bf16.msra.mxu0 %v5478_v12  ;;  %v5550_v12 = vpack.c.bf16 %v2868_v21, %v2867_v29  ;;  %v2895_v9 = vld [vmem:[#allocation2 + $0x390] sm:$0xff]  ;;  %v2896_v63 = vld [vmem:[#allocation2 + $0x398] sm:$0xff]  ;;  %v2885_v21 = vld [vmem:[#allocation2 + $0x340] sm:$0xff] }
 0x869   :  { %5503 = vmatpush3.bf16.msra.mxu1 %v5502_v15  ;;  %5480 = vmatprep.subr.bf16.mxu0 %v5932_v38  ;;  %v2853_v15 = vld [vmem:[#allocation2 + $0x240] sm:$0xff]  ;;  %v2900_v22 = vld [vmem:[#allocation2 + $0x3b8] sm:$0xff] }
 0x86a   :  { %5504 = vmatprep.subr.bf16.mxu1 %v5932_v38  ;;  %v5529_v3 = vpack.c.bf16 %v2854_v5, %v2853_v15  ;;  %v2902_v15 = vld [vmem:[#allocation2 + $0x3c8] sm:$0xff] }
 0x86c   :  { %5482 = vmatpush3.bf16.msra.mxu0 %v5481_v46  ;;  %v5553_v46 = vpack.c.bf16 %v2870_v23, %v2869_v18  ;;  %v2887_v23 = vld [vmem:[#allocation2 + $0x350] sm:$0xff] }
 0x86d   :  { %5506 = vmatpush3.bf16.msra.mxu1 %v5505_v0  ;;  %5483 = vmatprep.subr.bf16.mxu0 %v5932_v38  ;;  %v2855_v0 = vld [vmem:[#allocation2 + $0x250] sm:$0xff] }
 0x86e   :  { %5507 = vmatprep.subr.bf16.mxu1 %v5932_v38  ;;  %v5532_v39 = vpack.c.bf16 %v2856_v19, %v2855_v0  ;;  %v2904_v0 = vld [vmem:[#allocation2 + $0x3d8] sm:$0xff] }
 0x870   :  { %5485 = vmatpush3.bf16.msra.mxu0 %v5484_v33  ;;  %v5556_v33 = vpack.c.bf16 %v2872_v8, %v2871_v57  ;;  %v2889_v8 = vld [vmem:[#allocation2 + $0x360] sm:$0xff] }
 0x871   :  { %5509 = vmatpush3.bf16.msra.mxu1 %v5508_v7  ;;  %5486 = vmatprep.subr.bf16.mxu0 %v5932_v38  ;;  %v2857_v7 = vld [vmem:[#allocation2 + $0x260] sm:$0xff] }
 0x872   :  { %5510 = vmatprep.subr.bf16.mxu1 %v5932_v38  ;;  %v5535_v28 = vpack.c.bf16 %v2858_v10, %v2857_v7  ;;  %v2906_v7 = vld [vmem:[#allocation2 + $0x3e8] sm:$0xff] }
 0x874   :  { %5488 = vmatpush3.bf16.msra.mxu0 %v5487_v30  ;;  %v5559_v30 = vpack.c.bf16 %v2874_v17, %v2873_v14  ;;  %v2891_v17 = vld [vmem:[#allocation2 + $0x370] sm:$0xff] }
 0x875   :  { %5512 = vmatpush3.bf16.msra.mxu1 %v5511_v51  ;;  %5489 = vmatprep.subr.bf16.mxu0 %v5932_v38  ;;  %v2859_v51 = vld [vmem:[#allocation2 + $0x270] sm:$0xff] }
 0x876   :  { %5513 = vmatprep.subr.bf16.mxu1 %v5932_v38  ;;  %v5538_v44 = vpack.c.bf16 %v2860_v36, %v2859_v51  ;;  %v2908_v51 = vld [vmem:[#allocation2 + $0x3f8] sm:$0xff] }
 0x878   :  { %5491 = vmatpush3.bf16.msra.mxu0 %v5490_v47  ;;  %v5562_v47 = vpack.c.bf16 %v2876_v37, %v2875_v58  ;;  %v3589_v37 = vld [vmem:[%s7240_s8] sm:$0xff] }
 0x879   :  { %5515 = vmatpush3.bf16.msra.mxu1 %v5514_v25  ;;  %5516 = vmatprep.subr.bf16.mxu0 %v5932_v38  ;;  %v2877_v25 = vld [vmem:[#allocation2 + $0x300] sm:$0xff] }
 0x87a   :  { %5540 = vmatprep.subr.bf16.mxu1 %v5932_v38  ;;  %v5565_v16 = vpack.c.bf16 %v2878_v61, %v2877_v25  ;;  %v3591_v25 = vld [vmem:[%s7240_s8 + $0x10] sm:$0xff]  ;;  %v3592_v61 = vld [vmem:[%s7240_s8 + $0x18] sm:$0xff] }
 0x87b   :  { %4963 = vmatmul.mubr.f32.vlgmr.msra.gmra.mrb[32].mxu0 %v6771_v40  ;;  %v5523_v40 = vpack.c.bf16 %v2850_v34, %v2849_v41  ;;  %v2882_v41 = vld [vmem:[#allocation2 + $0x328] sm:$0xff]  ;;  %v2897_v34 = vld [vmem:[#allocation2 + $0x3a0] sm:$0xff] }
 0x87c   :  { %5518 = vmatpush3.bf16.msra.mxu0 %v5517_v42  ;;  %4998 = vmatmul.mubr.f32.vlgmr.msra.gmra.mrb[28].mxu1 %v6779_v48  ;;  %v5547_v48 = vpack.c.bf16 %v2866_v52, %v2865_v20  ;;  %v5589_v42 = vpack.c.bf16 %v2894_v32, %v2893_v49  ;;  %v2898_v20 = vld [vmem:[#allocation2 + $0x3a8] sm:$0xff]  ;;  %v2883_v52 = vld [vmem:[#allocation2 + $0x330] sm:$0xff] }
 0x87d   :  { %5542 = vmatpush3.bf16.msra.mxu1 %v5541_v55  ;;  %5519 = vmatprep.subr.bf16.mxu0 %v5932_v38  ;;  %v2879_v55 = vld [vmem:[#allocation2 + $0x310] sm:$0xff] }
 0x87e   :  { %5543 = vmatprep.subr.bf16.mxu1 %v5932_v38  ;;  %5032 = vmatprep.mubr.msk.f32.mxu0 %vm5936_vm3, %v5931_v4  ;;  %v5568_v56 = vpack.c.bf16 %v2880_v54, %v2879_v55  ;;  %v3599_v32 = vld [vmem:[%s7240_s8 + $0x50] sm:$0xff]  ;;  %v3593_v54 = vld [vmem:[%s7240_s8 + $0x20] sm:$0xff] }
 0x87f   :  { %5067 = vmatprep.mubr.msk.f32.mxu1 %vm5936_vm3, %v5931_v4 }
 0x880   :  { %5521 = vmatpush3.bf16.msra.mxu0 %v5520_v59  ;;  %v5592_v59 = vpack.c.bf16 %v2896_v63, %v2895_v9  ;;  %v3594_v9 = vld [vmem:[%s7240_s8 + $0x28] sm:$0xff]  ;;  %v3601_v63 = vld [vmem:[%s7240_s8 + $0x60] sm:$0xff] }
 0x881   :  { %5545 = vmatpush3.bf16.msra.mxu1 %v5544_v60  ;;  %5522 = vmatprep.subr.bf16.mxu0 %v5932_v38  ;;  %v2881_v60 = vld [vmem:[#allocation2 + $0x320] sm:$0xff] }
 0x882   :  { %5546 = vmatprep.subr.bf16.mxu1 %v5932_v38 }
 0x884   :  { %5524 = vmatpush3.bf16.msra.mxu0 %v5523_v40  ;;  %v2884_v40 = vld [vmem:[#allocation2 + $0x338] sm:$0xff] }
 0x885   :  { %5548 = vmatpush3.bf16.msra.mxu1 %v5547_v48  ;;  %5525 = vmatprep.subr.bf16.mxu0 %v5932_v38  ;;  %v2899_v48 = vld [vmem:[#allocation2 + $0x3b0] sm:$0xff]  ;;  %v5574_v24 = vpack.c.bf16 %v2884_v40, %v2883_v52  ;;  %v5879_v40 = vld [vmem:[%s7236_s4] sm:$0x3] }
 0x886   :  { %5549 = vmatprep.subr.bf16.mxu1 %v5932_v38  ;;  %v5598_v29 = vpack.c.bf16 %v2900_v22, %v2899_v48  ;;  %v403_v48 = vrot.slane %v5879_v40, %v6371_v50 }
 0x888   :  { %5527 = vmatpush3.bf16.msra.mxu0 %v5526_v6  ;;  %v2886_v6 = vld [vmem:[#allocation2 + $0x348] sm:$0xff]  ;;  %v548_v22 = vadd.f32 %v6437_v26, %v403_v48  ;;  %v3615_v48 = vld [vmem:[%s7240_s8 + $0xd0] sm:$0xff] }
 0x889   :  { %5551 = vmatpush3.bf16.msra.mxu1 %v5550_v12  ;;  %5528 = vmatprep.subr.bf16.mxu0 %v5932_v38  ;;  %v2901_v12 = vld [vmem:[#allocation2 + $0x3c0] sm:$0xff]  ;;  %v5577_v5 = vpack.c.bf16 %v2886_v6, %v2885_v21 }
 0x88a   :  { %5552 = vmatprep.subr.bf16.mxu1 %v5932_v38  ;;  %v5601_v18 = vpack.c.bf16 %v2902_v15, %v2901_v12 }
 0x88c   :  { %5530 = vmatpush3.bf16.msra.mxu0 %v5529_v3  ;;  %v2888_v3 = vld [vmem:[#allocation2 + $0x358] sm:$0xff] }
 0x88d   :  { %5554 = vmatpush3.bf16.msra.mxu1 %v5553_v46  ;;  %5531 = vmatprep.subr.bf16.mxu0 %v5932_v38  ;;  %v2903_v46 = vld [vmem:[#allocation2 + $0x3d0] sm:$0xff]  ;;  %v5580_v19 = vpack.c.bf16 %v2888_v3, %v2887_v23 }
 0x88e   :  { %5555 = vmatprep.subr.bf16.mxu1 %v5932_v38  ;;  %v5604_v57 = vpack.c.bf16 %v2904_v0, %v2903_v46 }
 0x890   :  { %5533 = vmatpush3.bf16.msra.mxu0 %v5532_v39  ;;  %v2890_v39 = vld [vmem:[#allocation2 + $0x368] sm:$0xff] }
 0x891   :  { %5557 = vmatpush3.bf16.msra.mxu1 %v5556_v33  ;;  %5534 = vmatprep.subr.bf16.mxu0 %v5932_v38  ;;  %v2905_v33 = vld [vmem:[#allocation2 + $0x3e0] sm:$0xff]  ;;  %v5583_v10 = vpack.c.bf16 %v2890_v39, %v2889_v8 }
 0x892   :  { %5558 = vmatprep.subr.bf16.mxu1 %v5932_v38  ;;  %v5607_v14 = vpack.c.bf16 %v2906_v7, %v2905_v33 }
 0x894   :  { %5536 = vmatpush3.bf16.msra.mxu0 %v5535_v28  ;;  %v2892_v28 = vld [vmem:[#allocation2 + $0x378] sm:$0xff] }
 0x895   :  { %5560 = vmatpush3.bf16.msra.mxu1 %v5559_v30  ;;  %5537 = vmatprep.subr.bf16.mxu0 %v5932_v38  ;;  %v2907_v30 = vld [vmem:[#allocation2 + $0x3f0] sm:$0xff]  ;;  %v5586_v36 = vpack.c.bf16 %v2892_v28, %v2891_v17 }
 0x896   :  { %5561 = vmatprep.subr.bf16.mxu1 %v5932_v38  ;;  %v5610_v58 = vpack.c.bf16 %v2908_v51, %v2907_v30 }
 0x898   :  { %5539 = vmatpush3.bf16.msra.mxu0 %v5538_v44  ;;  %v3590_v44 = vld [vmem:[%s7240_s8 + $0x8] sm:$0xff] }
 0x899   :  { %5563 = vmatpush3.bf16.msra.mxu1 %v5562_v47  ;;  %5564 = vmatprep.subr.bf16.mxu0 %v5932_v38  ;;  %v5613_v47 = vpack.c.bf16 %v3590_v44, %v3589_v37 }
 0x89a   :  { %5588 = vmatprep.subr.bf16.mxu1 %v5932_v38 }
 0x89b   :  { %5033 = vmatmul.mubr.f32.vlgmr.msra.gmra.mrb[34].mxu0 %v6774_v2  ;;  %v5571_v2 = vpack.c.bf16 %v2882_v41, %v2881_v60  ;;  %v3595_v41 = vld [vmem:[%s7240_s8 + $0x30] sm:$0xff] }
 0x89c   :  { %5566 = vmatpush3.bf16.msra.mxu0 %v5565_v16  ;;  %5068 = vmatmul.mubr.f32.vlgmr.msra.gmra.mrb[30].mxu1 %v6786_v27  ;;  %v5595_v27 = vpack.c.bf16 %v2898_v20, %v2897_v34  ;;  %v3600_v16 = vld [vmem:[%s7240_s8 + $0x58] sm:$0xff] }
 0x89d   :  { %5590 = vmatpush3.bf16.msra.mxu1 %v5589_v42  ;;  %5567 = vmatprep.subr.bf16.mxu0 %v5932_v38  ;;  %v5616_v42 = vpack.c.bf16 %v3592_v61, %v3591_v25  ;;  %v5628_v55 = vpack.c.bf16 %v3600_v16, %v3599_v32  ;;  %v3596_v34 = vld [vmem:[%s7240_s8 + $0x38] sm:$0xff]  ;;  %v3605_v16 = vld [vmem:[%s7240_s8 + $0x80] sm:$0xff] }
 0x89e   :  { %5591 = vmatprep.subr.bf16.mxu1 %v5932_v38  ;;  %5102 = vmatprep.mubr.msk.f32.mxu0 %vm5936_vm3, %v5931_v4  ;;  %v5622_v20 = vpack.c.bf16 %v3596_v34, %v3595_v41 }
 0x89f   :  { %5137 = vmatprep.mubr.msk.f32.mxu1 %vm5936_vm3, %v5931_v4 }
 0x8a0   :  { %5569 = vmatpush3.bf16.msra.mxu0 %v5568_v56  ;;  %v3602_v56 = vld [vmem:[%s7240_s8 + $0x68] sm:$0xff] }
 0x8a1   :  { %5593 = vmatpush3.bf16.msra.mxu1 %v5592_v59  ;;  %5570 = vmatprep.subr.bf16.mxu0 %v5932_v38  ;;  %v5619_v59 = vpack.c.bf16 %v3594_v9, %v3593_v54  ;;  %v5631_v60 = vpack.c.bf16 %v3602_v56, %v3601_v63  ;;  %v3614_v54 = vld [vmem:[%s7240_s8 + $0xc8] sm:$0xff] }
 0x8a2   :  { %5594 = vmatprep.subr.bf16.mxu1 %v5932_v38 }
 0x8a4   :  { %5572 = vmatpush3.bf16.msra.mxu0 %v5571_v2  ;;  %v3603_v2 = vld [vmem:[%s7240_s8 + $0x70] sm:$0xff] }
 0x8a5   :  { %5596 = vmatpush3.bf16.msra.mxu1 %v5595_v27  ;;  %5573 = vmatprep.subr.bf16.mxu0 %v5932_v38  ;;  %v3604_v27 = vld [vmem:[%s7240_s8 + $0x78] sm:$0xff] }
 0x8a6   :  { %5597 = vmatprep.subr.bf16.mxu1 %v5932_v38  ;;  %v5634_v52 = vpack.c.bf16 %v3604_v27, %v3603_v2  ;;  %v3607_v27 = vld [vmem:[%s7240_s8 + $0x90] sm:$0xff] }
 0x8a8   :  { %5575 = vmatpush3.bf16.msra.mxu0 %v5574_v24 }
 0x8a9   :  { %5599 = vmatpush3.bf16.msra.mxu1 %v5598_v29  ;;  %5576 = vmatprep.subr.bf16.mxu0 %v5932_v38 }
 0x8aa   :  { %5600 = vmatprep.subr.bf16.mxu1 %v5932_v38 }
 0x8ac   :  { %5578 = vmatpush3.bf16.msra.mxu0 %v5577_v5 }
 0x8ad   :  { %5602 = vmatpush3.bf16.msra.mxu1 %v5601_v18  ;;  %5579 = vmatprep.subr.bf16.mxu0 %v5932_v38 }
 0x8ae   :  { %5603 = vmatprep.subr.bf16.mxu1 %v5932_v38 }
 0x8b0   :  { %5581 = vmatpush3.bf16.msra.mxu0 %v5580_v19 }
 0x8b1   :  { %5605 = vmatpush3.bf16.msra.mxu1 %v5604_v57  ;;  %5582 = vmatprep.subr.bf16.mxu0 %v5932_v38 }
 0x8b2   :  { %5606 = vmatprep.subr.bf16.mxu1 %v5932_v38 }
 0x8b4   :  { %5584 = vmatpush3.bf16.msra.mxu0 %v5583_v10 }
 0x8b5   :  { %5608 = vmatpush3.bf16.msra.mxu1 %v5607_v14  ;;  %5585 = vmatprep.subr.bf16.mxu0 %v5932_v38 }
 0x8b6   :  { %5609 = vmatprep.subr.bf16.mxu1 %v5932_v38 }
 0x8b8   :  { %5587 = vmatpush3.bf16.msra.mxu0 %v5586_v36 }
 0x8b9   :  { %5611 = vmatpush3.bf16.msra.mxu1 %v5610_v58  ;;  %5612 = vmatprep.subr.bf16.mxu0 %v5932_v38 }
 0x8ba   :  { %5624 = vmatprep.subr.bf16.mxu1 %v5932_v38 }
 0x8bb   :  { %5103 = vmatmul.mubr.f32.vlgmr.msra.gmra.mrb[36].mxu0 %v6789_v1  ;;  %v3597_v1 = vld [vmem:[%s7240_s8 + $0x40] sm:$0xff] }
 0x8bc   :  { %5138 = vmatmul.mubr.f32.vlgmr.msra.gmra.mrb[32].mxu1 %v6794_v53  ;;  %5156 = vmatprep.mubr.msk.f32.mxu0 %vm5936_vm3, %v5931_v4  ;;  %v3598_v53 = vld [vmem:[%s7240_s8 + $0x48] sm:$0xff] }
 0x8bd   :  { %5175 = vmatprep.mubr.msk.f32.mxu1 %vm5936_vm3, %v5931_v4  ;;  %v5625_v49 = vpack.c.bf16 %v3598_v53, %v3597_v1  ;;  %5614 = vmatpush3.bf16.msra.mxu0 %v5613_v47 }
 0x8be   :  { %5615 = vmatprep.subr.bf16.mxu0 %v5932_v38 }
 0x8bf   :  { %5626 = vmatpush3.bf16.msra.mxu1 %v5625_v49 }
 0x8c0   :  { %5627 = vmatprep.subr.bf16.mxu1 %v5932_v38 }
 0x8c1   :  { %5617 = vmatpush3.bf16.msra.mxu0 %v5616_v42  ;;  %v3606_v42 = vld [vmem:[%s7240_s8 + $0x88] sm:$0xff] }
 0x8c2   :  { %5618 = vmatprep.subr.bf16.mxu0 %v5932_v38  ;;  %v5637_v41 = vpack.c.bf16 %v3606_v42, %v3605_v16 }
 0x8c3   :  { %5629 = vmatpush3.bf16.msra.mxu1 %v5628_v55  ;;  %v3613_v55 = vld [vmem:[%s7240_s8 + $0xc0] sm:$0xff] }
 0x8c4   :  { %5630 = vmatprep.subr.bf16.mxu1 %v5932_v38  ;;  %v5649_v2 = vpack.c.bf16 %v3614_v54, %v3613_v55  ;;  %v3623_v54 = vld [vmem:[%s7240_s8 + $0x110] sm:$0xff] }
 0x8c5   :  { %5620 = vmatpush3.bf16.msra.mxu0 %v5619_v59 }
 0x8c6   :  { %5621 = vmatprep.subr.bf16.mxu0 %v5932_v38 }
 0x8c7   :  { %5632 = vmatpush3.bf16.msra.mxu1 %v5631_v60 }
 0x8c8   :  { %5633 = vmatprep.subr.bf16.mxu1 %v5932_v38 }
 0x8c9   :  { %5623 = vmatpush3.bf16.msra.mxu0 %v5622_v20 }
 0x8ca   :  { %5636 = vmatprep.subr.bf16.mxu0 %v5932_v38 }
 0x8cb   :  { %5635 = vmatpush3.bf16.msra.mxu1 %v5634_v52  ;;  %v3608_v52 = vld [vmem:[%s7240_s8 + $0x98] sm:$0xff] }
 0x8cc   :  { %5648 = vmatprep.subr.bf16.mxu1 %v5932_v38 }
 0x92e   :  { %v2975_v24 = vpop.f32.mrb[30].mxu0 }
 0x92f   :  { %v3469_v29 = vadd.f32 %v2975_v24, %v548_v22  ;;  %v4894_v21 = vpop.f32.mrb[31].mxu0  ;;  %v3045_v6 = vpop.f32.mrb[26].mxu1  ;;  %v3616_v22 = vld [vmem:[%s7240_s8 + $0xd8] sm:$0xff] }
 0x930   :  { %v3470_v12 = vadd.f32 %v3045_v6, %v6454_v45  ;;  %v4929_v15 = vpop.f32.mrb[27].mxu1  ;;  %v5640_v21 = vpack.c.bf16 %v3608_v52, %v3607_v27  ;;  %v5652_v6 = vpack.c.bf16 %v3616_v22, %v3615_v48  ;;  %v3634_v27 = vld [vmem:[%s7240_s8 + $0x168] sm:$0xff] }
 0x931   :  { %3557 = vrot.lane.b32.xlu0 %v3469_v29, %s5934_s11  ;;  %v3610_v15 = vld [vmem:[%s7240_s8 + $0xa8] sm:$0xff] }
 0x932   :  { %3559 = vrot.lane.b32.xlu1 %v3470_v12, %s5934_s11  ;;  %v3478_v8 = vmul.f32 %v3470_v12, %v3470_v12 }
 0x934   :  { %v3486_v33 = vmul.f32 %v3478_v8, %v3470_v12  ;;  %v3620_v8 = vld [vmem:[%s7240_s8 + $0xf8] sm:$0xff] }
 0x936   :  { %v3494_v10 = vmul.f32 0.044715, %v3486_v33 }
 0x938   :  { %v3502_v14 = vadd.f32 %v3494_v10, %v3470_v12 }
 0x93a   :  { %v3510_v28 = vmul.f32 0.7978846, %v3502_v14 }
 0x94e   :  { %v3115_v5 = vpop.f32.mrb[32].mxu0 }
 0x94f   :  { %v6925_v18 = vadd.f32 %v3115_v5, %v6447_v35  ;;  %v4964_v23 = vpop.f32.mrb[33].mxu0  ;;  %v3185_v3 = vpop.f32.mrb[28].mxu1  ;;  %v3617_v5 = vld [vmem:[%s7240_s8 + $0xe0] sm:$0xff] }
 0x950   :  { %v6928_v50 = vadd.f32 %v3185_v3, %v6478_v13  ;;  %v4999_v26 = vpop.f32.mrb[29].mxu1  ;;  %v3477_v13 = vmul.f32 %v3469_v29, %v3469_v29  ;;  %v3618_v23 = vld [vmem:[%s7240_s8 + $0xe8] sm:$0xff] }
 0x951   :  { %3561 = vrot.lane.b32.xlu0 %v6925_v18, %s5934_s11  ;;  %v3479_v47 = vmul.f32 %v6925_v18, %v6925_v18 }
 0x952   :  { %3563 = vrot.lane.b32.xlu1 %v6928_v50, %s5934_s11  ;;  %v3485_v39 = vmul.f32 %v3477_v13, %v3469_v29  ;;  %v3619_v13 = vld [vmem:[%s7240_s8 + $0xf0] sm:$0xff] }
 0x953   :  { %v5658_v33 = vpack.c.bf16 %v3620_v8, %v3619_v13 }
 0x954   :  { %v3493_v7 = vmul.f32 0.044715, %v3485_v39 }
 0x96e   :  { %v3255_v45 = vpop.f32.mrb[34].mxu0 }
 0x96f   :  { %v6935_v46 = vadd.f32 %v3255_v45, %v6469_v62  ;;  %v5034_v0 = vpop.f32.mrb[35].mxu0  ;;  %v3325_v19 = vpop.f32.mrb[30].mxu1  ;;  %v3501_v62 = vadd.f32 %v3493_v7, %v3469_v29 }
 0x970   :  { %v6938_v35 = vadd.f32 %v3325_v19, %v6500_v43  ;;  %v5069_v57 = vpop.f32.mrb[31].mxu1  ;;  %v5655_v0 = vpack.c.bf16 %v3618_v23, %v3617_v5  ;;  %v3611_v19 = vld [vmem:[%s7240_s8 + $0xb0] sm:$0xff] }
 0x971   :  { %3565 = vrot.lane.b32.xlu0 %v6935_v46, %s5934_s11  ;;  %v3509_v17 = vmul.f32 0.7978846, %v3501_v62  ;;  %v3612_v57 = vld [vmem:[%s7240_s8 + $0xb8] sm:$0xff]  ;;  %v3481_v62 = vmul.f32 %v6935_v46, %v6935_v46 }
 0x972   :  { %3567 = vrot.lane.b32.xlu1 %v6938_v35, %s5934_s11  ;;  %v5646_v39 = vpack.c.bf16 %v3612_v57, %v3611_v19  ;;  %v3482_v14 = vmul.f32 %v6938_v35, %v6938_v35 }
 0x973   :  { %5831 = vtanh.f32 %v3509_v17 }
 0x974   :  { %5833 = vtanh.f32 %v3510_v28 }
 0x97d   :  { %v5832_v44 = vpop.eup %5831 }
 0x97e   :  { %v5834_v1 = vpop.eup %5833  ;;  %v3525_v53 = vadd.f32 1.0, %v5832_v44  ;;  %v3621_v44 = vld [vmem:[%s7240_s8 + $0x100] sm:$0xff] }
 0x97f   :  { %v3526_v25 = vadd.f32 1.0, %v5834_v1  ;;  %v3622_v1 = vld [vmem:[%s7240_s8 + $0x108] sm:$0xff] }
 0x980   :  { %v3533_v61 = vmul.f32 0.5, %v3525_v53 }
 0x981   :  { %v3534_v32 = vmul.f32 0.5, %v3526_v25 }
 0x982   :  { %v3541_v63 = vmul.f32 %v3533_v61, %v3469_v29 }
 0x983   :  { %v3542_v60 = vmul.f32 %v3534_v32, %v3470_v12  ;;  %v3609_v12 = vld [vmem:[%s7240_s8 + $0xa0] sm:$0xff]  ;;  %v5661_v32 = vpack.c.bf16 %v3622_v1, %v3621_v44  ;;  %v3639_v1 = vld [vmem:[%s7240_s8 + $0x190] sm:$0xff] }
 0x984   :  { %v5643_v45 = vpack.c.bf16 %v3610_v15, %v3609_v12 }
 0x98e   :  { %v3395_v43 = vpop.f32.mrb[36].mxu0 }
 0x98f   :  { %v6945_v30 = vadd.f32 %v3395_v43, %v6495_v31  ;;  %v5104_v51 = vpop.f32.mrb[37].mxu0  ;;  %v3465_v36 = vpop.f32.mrb[32].mxu1  ;;  %v3480_v31 = vmul.f32 %v6928_v50, %v6928_v50  ;;  %v3489_v43 = vmul.f32 %v3481_v62, %v6935_v46 }
 0x990   :  { %v6948_v58 = vadd.f32 %v3465_v36, %v6515_v11  ;;  %v5139_v37 = vpop.f32.mrb[33].mxu1  ;;  %v3487_v11 = vmul.f32 %v3479_v47, %v6925_v18  ;;  %v3490_v36 = vmul.f32 %v3482_v14, %v6938_v35  ;;  %v3629_v47 = vld [vmem:[%s7240_s8 + $0x140] sm:$0xff] }
 0x991   :  { %3569 = vrot.lane.b32.xlu0 %v6945_v30, %s5934_s11  ;;  %v3488_v49 = vmul.f32 %v3480_v31, %v6928_v50  ;;  %v3630_v31 = vld [vmem:[%s7240_s8 + $0x148] sm:$0xff]  ;;  %v3497_v53 = vmul.f32 0.044715, %v3489_v43 }
 0x992   :  { %3571 = vrot.lane.b32.xlu1 %v6948_v58, %s5934_s11  ;;  %v3495_v9 = vmul.f32 0.044715, %v3487_v11  ;;  %v3498_v11 = vmul.f32 0.044715, %v3490_v36  ;;  %v5673_v55 = vpack.c.bf16 %v3630_v31, %v3629_v47  ;;  %v3640_v47 = vld [vmem:[%s7240_s8 + $0x198] sm:$0xff] }
 0x993   :  { %v3496_v56 = vmul.f32 0.044715, %v3488_v49 }
 0x994   :  { %v3503_v24 = vadd.f32 %v3495_v9, %v6925_v18  ;;  %v3624_v9 = vld [vmem:[%s7240_s8 + $0x118] sm:$0xff] }
 0x995   :  { %v3504_v29 = vadd.f32 %v3496_v56, %v6928_v50  ;;  %v3505_v56 = vadd.f32 %v3497_v53, %v6935_v46 }
 0x996   :  { %v3511_v3 = vmul.f32 0.7978846, %v3503_v24  ;;  %v3627_v24 = vld [vmem:[%s7240_s8 + $0x130] sm:$0xff] }
 0x997   :  { %v3512_v26 = vmul.f32 0.7978846, %v3504_v29  ;;  %v3513_v52 = vmul.f32 0.7978846, %v3505_v56  ;;  %v3628_v29 = vld [vmem:[%s7240_s8 + $0x138] sm:$0xff] }
 0x998   :  { %5835 = vtanh.f32 %v3511_v3  ;;  %v5670_v12 = vpack.c.bf16 %v3628_v29, %v3627_v24  ;;  %v3483_v3 = vmul.f32 %v6945_v30, %v6945_v30  ;;  %v3652_v56 = vld [vmem:[%s7240_s8 + $0x1f8] sm:$0xff] }
 0x999   :  { %5837 = vtanh.f32 %v3512_v26  ;;  %v3484_v26 = vmul.f32 %v6948_v58, %v6948_v58 }
 0x99a   :  { %5839 = vtanh.f32 %v3513_v52  ;;  %v3491_v19 = vmul.f32 %v3483_v3, %v6945_v30 }
 0x99b   :  { %v3492_v13 = vmul.f32 %v3484_v26, %v6948_v58 }
 0x99c   :  { %v3499_v62 = vmul.f32 0.044715, %v3491_v19 }
 0x99e   :  { %v3507_v53 = vadd.f32 %v3499_v62, %v6945_v30  ;;  %v4471_v62 = vld [vmem:[%s7241_s9 + $0x3] ss:$0 sm:$0xff] }
 0x9a2   :  { %v5836_v7 = vpop.eup %5835 }
 0x9a3   :  { %v3558_v59 = vpop.permute.xlu0 %3557  ;;  %v5838_v10 = vpop.eup %5837  ;;  %v3527_v17 = vadd.f32 1.0, %v5836_v7  ;;  %v3645_v7 = vld [vmem:[%s7240_s8 + $0x1c0] sm:$0xff] }
 0x9a4   :  { %v3581_v34 = vmul.f32 %v3558_v59, %v3541_v63  ;;  %v3560_v20 = vpop.permute.xlu1 %3559  ;;  %v3528_v28 = vadd.f32 1.0, %v5838_v10  ;;  %v3506_v59 = vadd.f32 %v3498_v11, %v6938_v35  ;;  %v5840_v5 = vpop.eup %5839  ;;  %v3646_v10 = vld [vmem:[%s7240_s8 + $0x1c8] sm:$0xff]  ;;  %v5688_v11 = vpack.c.bf16 %v3640_v47, %v3639_v1 }
 0x9a5   :  { %v3582_v40 = vmul.f32 %v3560_v20, %v3542_v60  ;;  %v3535_v51 = vmul.f32 0.5, %v3527_v17  ;;  %v5664_v60 = vpack.c.bf16 %v3624_v9, %v3623_v54  ;;  %v3626_v20 = vld [vmem:[%s7240_s8 + $0x128] sm:$0xff]  ;;  %v3500_v17 = vmul.f32 0.044715, %v3492_v13 }
 0x9a6   :  { %5157 = vmatmul.mubr.msk.f32.vlgmr.msra.gmra.mrb[38].mxu0 %vm1875_vm13, %v3581_v34  ;;  %v3536_v37 = vmul.f32 0.5, %v3528_v28  ;;  %v3625_v34 = vld [vmem:[%s7240_s8 + $0x120] sm:$0xff]  ;;  %v5697_v44 = vpack.c.bf16 %v3646_v10, %v3645_v7 }
 0x9a7   :  { %5176 = vmatmul.mubr.msk.f32.vlgmr.msra.gmra.mrb[34].mxu1 %vm1875_vm13, %v3582_v40  ;;  %5638 = vmatpush3.bf16.msra.mxu0 %v5637_v41  ;;  %v3543_v25 = vmul.f32 %v3535_v51, %v6925_v18  ;;  %v3631_v18 = vld [vmem:[%s7240_s8 + $0x150] sm:$0xff]  ;;  %v3514_v40 = vmul.f32 0.7978846, %v3506_v59  ;;  %v5667_v48 = vpack.c.bf16 %v3626_v20, %v3625_v34  ;;  %v4470_v7 = vld [vmem:[%s7241_s9 + $0x2] ss:$0 sm:$0xff] }
 0x9a8   :  { %5650 = vmatpush3.bf16.msra.mxu1 %v5649_v2  ;;  %5639 = vmatprep.subr.bf16.mxu0 %v5932_v38  ;;  %v3544_v49 = vmul.f32 %v3536_v37, %v6928_v50  ;;  %v3632_v50 = vld [vmem:[%s7240_s8 + $0x158] sm:$0xff]  ;;  %v3633_v2 = vld [vmem:[%s7240_s8 + $0x160] sm:$0xff] }
 0x9a9   :  { %5651 = vmatprep.subr.bf16.mxu1 %v5932_v38  ;;  %5194 = vmatprep.mubr.msk.f32.mxu0 %vm5936_vm3, %v5931_v4  ;;  %v5676_v41 = vpack.c.bf16 %v3632_v50, %v3631_v18  ;;  %v5679_v22 = vpack.c.bf16 %v3634_v27, %v3633_v2  ;;  %5841 = vtanh.f32 %v3514_v40  ;;  %v3643_v18 = vld [vmem:[%s7240_s8 + $0x1b0] sm:$0xff]  ;;  %v3644_v50 = vld [vmem:[%s7240_s8 + $0x1b8] sm:$0xff] }
 0x9aa   :  { %5213 = vmatprep.mubr.msk.f32.mxu1 %vm5936_vm3, %v5931_v4  ;;  %v5694_v59 = vpack.c.bf16 %v3644_v50, %v3643_v18 }
 0x9ab   :  { %5641 = vmatpush3.bf16.msra.mxu0 %v5640_v21  ;;  %v3635_v21 = vld [vmem:[%s7240_s8 + $0x170] sm:$0xff] }
 0x9ac   :  { %5653 = vmatpush3.bf16.msra.mxu1 %v5652_v6  ;;  %5642 = vmatprep.subr.bf16.mxu0 %v5932_v38  ;;  %v3636_v6 = vld [vmem:[%s7240_s8 + $0x178] sm:$0xff] }
 0x9ad   :  { %5654 = vmatprep.subr.bf16.mxu1 %v5932_v38  ;;  %v5682_v15 = vpack.c.bf16 %v3636_v6, %v3635_v21  ;;  %v4468_v6 = vld [vmem:[%s7241_s9] ss:$0 sm:$0xff] }
 0x9af   :  { %5644 = vmatpush3.bf16.msra.mxu0 %v5643_v45  ;;  %v3529_v45 = vadd.f32 1.0, %v5840_v5 }
 0x9b0   :  { %5656 = vmatpush3.bf16.msra.mxu1 %v5655_v0  ;;  %5645 = vmatprep.subr.bf16.mxu0 %v5932_v38 }
 0x9b1   :  { %5657 = vmatprep.subr.bf16.mxu1 %v5932_v38  ;;  %v3537_v57 = vmul.f32 0.5, %v3529_v45 }
 0x9b3   :  { %5647 = vmatpush3.bf16.msra.mxu0 %v5646_v39  ;;  %v5842_v23 = vpop.eup %5841  ;;  %v3637_v39 = vld [vmem:[%s7240_s8 + $0x180] sm:$0xff]  ;;  %v3545_v14 = vmul.f32 %v3537_v57, %v6935_v46  ;;  %v3647_v46 = vld [vmem:[%s7240_s8 + $0x1d0] sm:$0xff] }
 0x9b4   :  { %5659 = vmatpush3.bf16.msra.mxu1 %v5658_v33  ;;  %5660 = vmatprep.subr.bf16.mxu0 %v5932_v38  ;;  %v3530_v0 = vadd.f32 1.0, %v5842_v23  ;;  %v3638_v33 = vld [vmem:[%s7240_s8 + $0x188] sm:$0xff] }
 0x9b5   :  { %5672 = vmatprep.subr.bf16.mxu1 %v5932_v38  ;;  %v5685_v51 = vpack.c.bf16 %v3638_v33, %v3637_v39 }
 0x9b6   :  { %v3538_v8 = vmul.f32 0.5, %v3530_v0 }
 0x9b8   :  { %v3546_v43 = vmul.f32 %v3538_v8, %v6938_v35  ;;  %v3648_v35 = vld [vmem:[%s7240_s8 + $0x1d8] sm:$0xff] }
 0x9c3   :  { %v3562_v61 = vpop.permute.xlu0 %3561 }
 0x9c4   :  { %v3583_v16 = vmul.f32 %v3562_v61, %v3543_v25  ;;  %v3564_v42 = vpop.permute.xlu1 %3563  ;;  %v3508_v25 = vadd.f32 %v3500_v17, %v6948_v58  ;;  %v5700_v61 = vpack.c.bf16 %v3648_v35, %v3647_v46 }
 0x9c5   :  { %v3584_v63 = vmul.f32 %v3564_v42, %v3544_v49  ;;  %v3641_v49 = vld [vmem:[%s7240_s8 + $0x1a0] sm:$0xff]  ;;  %v3650_v42 = vld [vmem:[%s7240_s8 + $0x1e8] sm:$0xff] }
 0x9c6   :  { %5195 = vmatmul.mubr.msk.f32.vlgmr.msra.gmra.mrb[40].mxu0 %vm1875_vm13, %v3583_v16  ;;  %v3649_v16 = vld [vmem:[%s7240_s8 + $0x1e0] sm:$0xff]  ;;  %v3516_v54 = vmul.f32 0.7978846, %v3508_v25 }
 0x9c7   :  { %5214 = vmatmul.mubr.msk.f32.vlgmr.msra.gmra.mrb[36].mxu1 %vm1875_vm13, %v3584_v63  ;;  %5662 = vmatpush3.bf16.msra.mxu0 %v5661_v32  ;;  %v3642_v32 = vld [vmem:[%s7240_s8 + $0x1a8] sm:$0xff]  ;;  %v5703_v63 = vpack.c.bf16 %v3650_v42, %v3649_v16 }
 0x9c8   :  { %5674 = vmatpush3.bf16.msra.mxu1 %v5673_v55  ;;  %5663 = vmatprep.subr.bf16.mxu0 %v5932_v38  ;;  %v3515_v55 = vmul.f32 0.7978846, %v3507_v53  ;;  %v5691_v9 = vpack.c.bf16 %v3642_v32, %v3641_v49  ;;  %v4473_v49 = vld [vmem:[%s7241_s9 + $0x5] ss:$0 sm:$0xff] }
 0x9c9   :  { %5675 = vmatprep.subr.bf16.mxu1 %v5932_v38  ;;  %5232 = vmatprep.mubr.msk.f32.mxu0 %vm5936_vm3, %v5931_v4 }
 0x9ca   :  { %5251 = vmatprep.mubr.msk.f32.mxu1 %vm5936_vm3, %v5931_v4  ;;  %5843 = vtanh.f32 %v3515_v55 }
 0x9cb   :  { %5665 = vmatpush3.bf16.msra.mxu0 %v5664_v60  ;;  %5845 = vtanh.f32 %v3516_v54 }
 0x9cc   :  { %5677 = vmatpush3.bf16.msra.mxu1 %v5676_v41  ;;  %5666 = vmatprep.subr.bf16.mxu0 %v5932_v38 }
 0x9cd   :  { %5678 = vmatprep.subr.bf16.mxu1 %v5932_v38 }
 0x9cf   :  { %5668 = vmatpush3.bf16.msra.mxu0 %v5667_v48 }
 0x9d0   :  { %5680 = vmatpush3.bf16.msra.mxu1 %v5679_v22  ;;  %5669 = vmatprep.subr.bf16.mxu0 %v5932_v38 }
 0x9d1   :  { %5681 = vmatprep.subr.bf16.mxu1 %v5932_v38 }
 0x9d3   :  { %5671 = vmatpush3.bf16.msra.mxu0 %v5670_v12 }
 0x9d4   :  { %5683 = vmatpush3.bf16.msra.mxu1 %v5682_v15  ;;  %5684 = vmatprep.subr.bf16.mxu0 %v5932_v38  ;;  %v5844_v41 = vpop.eup %5843 }
 0x9d5   :  { %5696 = vmatprep.subr.bf16.mxu1 %v5932_v38  ;;  %v5846_v34 = vpop.eup %5845  ;;  %v3531_v20 = vadd.f32 1.0, %v5844_v41 }
 0x9d6   :  { %v3532_v2 = vadd.f32 1.0, %v5846_v34 }
 0x9d7   :  { %v3539_v27 = vmul.f32 0.5, %v3531_v20  ;;  %v4474_v20 = vld [vmem:[%s7241_s9 + $0x6] ss:$0 sm:$0xff] }
 0x9d8   :  { %v3540_v52 = vmul.f32 0.5, %v3532_v2 }
 0x9d9   :  { %v3547_v40 = vmul.f32 %v3539_v27, %v6945_v30  ;;  %v4469_v30 = vld [vmem:[%s7241_s9 + $0x1] ss:$0 sm:$0xff]  ;;  %v4475_v27 = vld [vmem:[%s7241_s9 + $0x7] ss:$0 sm:$0xff] }
 0x9da   :  { %v3548_v22 = vmul.f32 %v3540_v52, %v6948_v58 }
 0x9e3   :  { %v3566_v28 = vpop.permute.xlu0 %3565 }
 0x9e4   :  { %v3585_v36 = vmul.f32 %v3566_v28, %v3545_v14  ;;  %v3568_v37 = vpop.permute.xlu1 %3567 }
 0x9e5   :  { %v3586_v31 = vmul.f32 %v3568_v37, %v3546_v43 }
 0x9e6   :  { %5233 = vmatmul.mubr.msk.f32.vlgmr.msra.gmra.mrb[42].mxu0 %vm1875_vm13, %v3585_v36 }
 0x9e7   :  { %5252 = vmatmul.mubr.msk.f32.vlgmr.msra.gmra.mrb[38].mxu1 %vm1875_vm13, %v3586_v31  ;;  %5686 = vmatpush3.bf16.msra.mxu0 %v5685_v51 }
 0x9e8   :  { %5698 = vmatpush3.bf16.msra.mxu1 %v5697_v44  ;;  %5687 = vmatprep.subr.bf16.mxu0 %v5932_v38 }
 0x9e9   :  { %5699 = vmatprep.subr.bf16.mxu1 %v5932_v38  ;;  %5270 = vmatprep.mubr.msk.f32.mxu0 %vm5936_vm3, %v5931_v4 }
 0x9ea   :  { %5289 = vmatprep.mubr.msk.f32.mxu1 %vm5936_vm3, %v5931_v4  ;;  %v3651_v4 = vld [vmem:[%s7240_s8 + $0x1f0] sm:$0xff] }
 0x9eb   :  { %5689 = vmatpush3.bf16.msra.mxu0 %v5688_v11  ;;  %v5706_v60 = vpack.c.bf16 %v3652_v56, %v3651_v4  ;;  %v4472_v11 = vld [vmem:[%s7241_s9 + $0x4] ss:$0 sm:$0xff]  ;;  %s5939_s9 = smov [#allocation5]  }
 0x9ec   :  { %5701 = vmatpush3.bf16.msra.mxu1 %v5700_v61  ;;  %5690 = vmatprep.subr.bf16.mxu0 %v5932_v38  ;;  %s4410_s13 = sshll.u32 %s5939_s9, 4  ;;  %s4411_s13 = int_to_ptr.vmem [resolvable:$true] %s4410_s13 }
 0x9ed   :  { %5702 = vmatprep.subr.bf16.mxu1 %v5932_v38  ;;  %s5902_s14 = scalar_lea.vmem %s4411_s13, 256  ;;  %p5907_p9 = scmp.lt.s32.totalorder %s4411_s13, %s4411_s13 }
 0x9ee   :  { %p5903_p8 = scmp.ne.s32.totalorder %s4411_s13, %s5902_s14  ;;  %p5908_p10 = scmp.lt.s32.totalorder %s5902_s14, %s5902_s14 }
 0x9ef   :  { %5692 = vmatpush3.bf16.msra.mxu0 %v5691_v9 }
 0x9f0   :  { %5704 = vmatpush3.bf16.msra.mxu1 %v5703_v63  ;;  %5693 = vmatprep.subr.bf16.mxu0 %v5932_v38  ;;  %p5909_p11 = por %p5908_p10, %p5907_p9 }
 0x9f1   :  { %5705 = vmatprep.subr.bf16.mxu1 %v5932_v38  ;;  %v5938_v38 = vmov 32  }
 0x9f2   :  { %5781 = vset.pattern.permute.xlu0 %v5938_v38  ;;  %5782 = vset.pattern.permute.xlu1 %v5938_v38  ;;  %p5910_p12 = pnand %p5909_p11, %p5903_p8 }
 0x9f3   :  { %5695 = vmatpush3.bf16.msra.mxu0 %v5694_v59 }
 0x9f4   :  { %5707 = vmatpush3.bf16.msra.mxu1 %v5706_v60 }
 0xa03   :  { %v3570_v48 = vpop.permute.xlu0 %3569 }
 0xa04   :  { %v3587_v24 = vmul.f32 %v3570_v48, %v3547_v40  ;;  %v3572_v29 = vpop.permute.xlu1 %3571 }
 0xa05   :  { %v3588_v21 = vmul.f32 %v3572_v29, %v3548_v22 }
 0xa06   :  { %5271 = vmatmul.mubr.msk.f32.vlgmr.msra.gmra.mrb[44].mxu0 %vm1875_vm13, %v3587_v24 }
 0xa07   :  { %5290 = vmatmul.mubr.msk.f32.vlgmr.msra.gmra.mrb[40].mxu1 %vm1875_vm13, %v3588_v21 }
 0xa79   :  { %v3778_v12 = vpop.f32.mrb[38].mxu0 }
 0xa7a   :  { %v7176_v58 = vadd.f32 %v4468_v6, %v3778_v12  ;;  %v5158_v15 = vpop.f32.mrb[39].mxu0  ;;  %v3851_v5 = vpop.f32.mrb[34].mxu1 }
 0xa7b   :  { %v7178_v23 = vadd.f32 %v4469_v30, %v3851_v5  ;;  %v5177_v3 = vpop.f32.mrb[35].mxu1 }
 0xa7c   :  { %v4484_v26 = vmul.f32 -1.442695, %v7176_v58 }
 0xa7d   :  { %v4485_v45 = vmul.f32 -1.442695, %v7178_v23 }
 0xa7e   :  { %5847 = vpow2.f32 %v4484_v26 }
 0xa7f   :  { %5849 = vpow2.f32 %v4485_v45 }
 0xa88   :  { %v5848_v0 = vpop.eup %5847 }
 0xa89   :  { %v5850_v19 = vpop.eup %5849  ;;  %v4317_v57 = vadd.f32 1.0, %v5848_v0 }
 0xa8a   :  { %v4318_v13 = vadd.f32 1.0, %v5850_v19 }
 0xa8b   :  { %5851 = vrcp.f32 %v4317_v57 }
 0xa8c   :  { %5853 = vrcp.f32 %v4318_v13 }
 0xa95   :  { %v5852_v8 = vpop.eup %5851 }
 0xa96   :  { %v5854_v39 = vpop.eup %5853  ;;  %v4341_v33 = vmul.f32 2.0, %v5852_v8 }
 0xa97   :  { %v4342_v10 = vmul.f32 2.0, %v5854_v39 }
 0xa98   :  { %4351 = vperm.xlu0 %5781, %v4341_v33  }
 0xa99   :  { %v3924_v14 = vpop.f32.mrb[40].mxu0  ;;  %4356 = vperm.xlu1 %5782, %v4342_v10  }
 0xa9a   :  { %v7188_v17 = vadd.f32 %v4470_v7, %v3924_v14  ;;  %v5196_v28 = vpop.f32.mrb[41].mxu0  ;;  %v3997_v43 = vpop.f32.mrb[36].mxu1 }
 0xa9b   :  { %v7190_v51 = vadd.f32 %v4471_v62, %v3997_v43  ;;  %v5215_v36 = vpop.f32.mrb[37].mxu1 }
 0xa9c   :  { %v4486_v37 = vmul.f32 -1.442695, %v7188_v17 }
 0xa9d   :  { %v4487_v44 = vmul.f32 -1.442695, %v7190_v51 }
 0xa9e   :  { %5855 = vpow2.f32 %v4486_v37 }
 0xa9f   :  { %5857 = vpow2.f32 %v4487_v44 }
 0xaa8   :  { %v5856_v1 = vpop.eup %5855 }
 0xaa9   :  { %v5858_v47 = vpop.eup %5857  ;;  %v4319_v31 = vadd.f32 1.0, %v5856_v1 }
 0xaaa   :  { %v4320_v46 = vadd.f32 1.0, %v5858_v47 }
 0xaab   :  { %5859 = vrcp.f32 %v4319_v31 }
 0xaac   :  { %5861 = vrcp.f32 %v4320_v46 }
 0xab5   :  { %v5860_v35 = vpop.eup %5859 }
 0xab6   :  { %v5862_v53 = vpop.eup %5861  ;;  %v4343_v25 = vmul.f32 2.0, %v5860_v35 }
 0xab7   :  { %v4344_v61 = vmul.f32 2.0, %v5862_v53 }
 0xab8   :  { %4361 = vperm.xlu1 %5782, %v4343_v25  }
 0xab9   :  { %v4070_v32 = vpop.f32.mrb[42].mxu0  ;;  %4366 = vperm.xlu0 %5781, %v4344_v61  }
 0xaba   :  { %v4071_v16 = vadd.f32 %v4472_v11, %v4070_v32  ;;  %v5234_v42 = vpop.f32.mrb[43].mxu0  ;;  %v4143_v55 = vpop.f32.mrb[38].mxu1 }
 0xabb   :  { %v4144_v54 = vadd.f32 %v4473_v49, %v4143_v55  ;;  %v5253_v9 = vpop.f32.mrb[39].mxu1 }
 0xabc   :  { %v4488_v63 = vmul.f32 -1.442695, %v4071_v16 }
 0xabd   :  { %v4489_v18 = vmul.f32 -1.442695, %v4144_v54 }
 0xabe   :  { %5863 = vpow2.f32 %v4488_v63 }
 0xabf   :  { %5865 = vpow2.f32 %v4489_v18 }
 0xac8   :  { %v5864_v50 = vpop.eup %5863 }
 0xac9   :  { %v5866_v4 = vpop.eup %5865  ;;  %v4321_v56 = vadd.f32 1.0, %v5864_v50 }
 0xaca   :  { %v4322_v59 = vadd.f32 1.0, %v5866_v4 }
 0xacb   :  { %5867 = vrcp.f32 %v4321_v56 }
 0xacc   :  { %5869 = vrcp.f32 %v4322_v59 }
 0xad5   :  { %v5868_v60 = vpop.eup %5867 }
 0xad6   :  { %v5870_v41 = vpop.eup %5869  ;;  %v4345_v34 = vmul.f32 2.0, %v5868_v60 }
 0xad7   :  { %v4346_v2 = vmul.f32 2.0, %v5870_v41 }
 0xad8   :  { %4371 = vperm.xlu1 %5782, %v4345_v34  }
 0xad9   :  { %v4216_v52 = vpop.f32.mrb[44].mxu0  ;;  %4376 = vperm.xlu0 %5781, %v4346_v2  }
 0xada   :  { %v4217_v40 = vadd.f32 %v4474_v20, %v4216_v52  ;;  %v5272_v48 = vpop.f32.mrb[45].mxu0  ;;  %v4289_v22 = vpop.f32.mrb[40].mxu1 }
 0xadb   :  { %v4290_v24 = vadd.f32 %v4475_v27, %v4289_v22  ;;  %v5291_v29 = vpop.f32.mrb[41].mxu1 }
 0xadc   :  { %v4490_v21 = vmul.f32 -1.442695, %v4217_v40 }
 0xadd   :  { %v4491_v38 = vmul.f32 -1.442695, %v4290_v24 }
 0xade   :  { %5871 = vpow2.f32 %v4490_v21 }
 0xadf   :  { %5873 = vpow2.f32 %v4491_v38 }
 0xae8   :  { %v5872_v6 = vpop.eup %5871 }
 0xae9   :  { %v5874_v30 = vpop.eup %5873  ;;  %v4323_v12 = vadd.f32 1.0, %v5872_v6 }
 0xaea   :  { %v4324_v15 = vadd.f32 1.0, %v5874_v30 }
 0xaeb   :  { %5875 = vrcp.f32 %v4323_v12 }
 0xaec   :  { %5877 = vrcp.f32 %v4324_v15 }
 0xaf5   :  { %v5876_v5 = vpop.eup %5875 }
 0xaf6   :  { %v5878_v3 = vpop.eup %5877  ;;  %v4347_v26 = vmul.f32 2.0, %v5876_v5 }
 0xaf7   :  { %v4348_v45 = vmul.f32 2.0, %v5878_v3 }
 0xaf8   :  { %4381 = vperm.xlu1 %5782, %v4347_v26  }
 0xaf9   :  { %4386 = vperm.xlu0 %5781, %v4348_v45  }
 0xb17   :  { %v4352_v0 = vpop.permute.xlu0 %4351 }
 0xb18   :  { %v4389_v19 = vmul.f32 %v4352_v0, %v7176_v58  ;;  %v4357_v57 = vpop.permute.xlu1 %4356 }
 0xb19   :  { %v4390_v13 = vmul.f32 %v4357_v57, %v7178_v23 }
 0xb1a   :  { %4397 = vst.msk [vmem:[#allocation5] sm:$0x3] %vm58_vm0, %v4389_v19 }
 0xb1b   :  { %4398 = vst.msk [vmem:[#allocation5 + $0x2] sm:$0x3] %vm58_vm0, %v4390_v13 }
 0xb37   :  { %v4362_v8 = vpop.permute.xlu1 %4361 }
 0xb38   :  { %v4391_v39 = vmul.f32 %v4362_v8, %v7188_v17  ;;  %v4367_v33 = vpop.permute.xlu0 %4366 }
 0xb39   :  { %v4392_v7 = vmul.f32 %v4367_v33, %v7190_v51 }
 0xb3a   :  { %4399 = vst.msk [vmem:[#allocation5 + $0x4] sm:$0x3] %vm58_vm0, %v4391_v39 }
 0xb3b   :  { %4400 = vst.msk [vmem:[#allocation5 + $0x6] sm:$0x3] %vm58_vm0, %v4392_v7 }
 0xb57   :  { %v4372_v10 = vpop.permute.xlu1 %4371 }
 0xb58   :  { %v4393_v62 = vmul.f32 %v4372_v10, %v4071_v16  ;;  %v4377_v58 = vpop.permute.xlu0 %4376 }
 0xb59   :  { %v4394_v14 = vmul.f32 %v4377_v58, %v4144_v54 }
 0xb5a   :  { %4401 = vst.msk [vmem:[#allocation5 + $0x8] sm:$0x3] %vm58_vm0, %v4393_v62 }
 0xb5b   :  { %4402 = vst.msk [vmem:[#allocation5 + $0xa] sm:$0x3] %vm58_vm0, %v4394_v14 }
 0xb77   :  { %v4382_v23 = vpop.permute.xlu1 %4381 }
 0xb78   :  { %v4395_v28 = vmul.f32 %v4382_v23, %v4217_v40  ;;  %v4387_v17 = vpop.permute.xlu0 %4386 }
 0xb79   :  { %v4396_v43 = vmul.f32 %v4387_v17, %v4290_v24 }
 0xb7a   :  { %4403 = vst.msk [vmem:[#allocation5 + $0xc] sm:$0x3] %vm58_vm0, %v4395_v28 }
 0xb7b   :  { %4404 = vst.msk [vmem:[#allocation5 + $0xe] sm:$0x3] %vm58_vm0, %v4396_v43 }
 0xb7c   :  { %5913 = shalt.err (!%p5910_p12)
}
 0xb7d   :  { %s5914_s16 = scalar_lea.hbm %s7242_s10, 256 }
 0xb7e   :  { %p5915_p13 = scmp.ne.s32.totalorder %s7242_s10, %s5914_s16  ;;  %p5918_p0 = scmp.lt.u32.totalorder %s5914_s16, %s7242_s10 }
 0xb80   :  { %p5920_p1 = pnand %p5918_p0, %p5915_p13 }
 0xb82   :  { %5923 = shalt.err (!%p5920_p1)
}
 0xb83   :  { %s5940_s21 = smov 2  }
 0xb84   :  { %4416 = dma.vmem_to_hbm [thread:$0]  %s4411_s13, 256, %s7242_s10, [#allocation4], %s5935_s12, %s5935_s12, %s5940_s21  }
 0xb85   :  { %5926 = dma.done.wait [#allocation4], 256  }
 0xb86   :  { %5927 = vsyncadd [#allocation4], 4294967040 }
 0xb87   :  { %4420 = vsyncpa [#allocation3], 1 }
 0xb88   :  { %4421 = vsyncpa [#allocation4], 1 }

</bundles_post_ra>
